<compile_context>
chip_gen: v5e
topology: v5e:2x2
jax: 0.10.0
libtpu: 0.0.40
codegen_flags: <defaults>
</compile_context>

<pallas_src>
import functools

import jax
import jax.numpy as jnp
from jax import lax
from jax.experimental import pallas as pl
from jax.experimental.pallas import tpu as pltpu


_CONTRACT_LAST = (((1,), (1,)), ((), ()))   # contract last dim of both operands


def _mha_kernel(q_ref, k_ref, v_ref, mask_ref,
                wq_ref, wk_ref, wv_ref, wc_ref,
                out_ref, cov_ref, *, h):
    dh = wq_ref.shape[0] // h
    tq = q_ref.shape[0]
    lk = k_ref.shape[0]
    cdt = wq_ref.dtype                     # MXU operand dtype (bf16 for f32 callers)

    q = q_ref[...].astype(cdt)             # (tq, D)
    k = k_ref[...].astype(cdt)             # (Lk, D)
    v = v_ref[...].astype(cdt)             # (Lk, D)

    # Full-width projections: contraction and output width = d_model on the MXU.
    # The 1/sqrt(d_head) scale is already folded into wq on the host.
    qp = lax.dot_general(q, wq_ref[...], _CONTRACT_LAST,
                         preferred_element_type=jnp.float32)        # (tq, h*dh)
    kp = lax.dot_general(k, wk_ref[...], _CONTRACT_LAST,
                         preferred_element_type=jnp.float32)        # (Lk, h*dh)
    vp = lax.dot_general(v, wv_ref[...], _CONTRACT_LAST,
                         preferred_element_type=jnp.float32)        # (Lk, h*dh)

    # True = masked. int8 -> i32 compare (computed once per grid step).
    masked = mask_ref[...].astype(jnp.int32) != 0                   # (tq, Lk)

    cov_acc = jnp.zeros((tq, lk), jnp.float32)
    pv_parts = []
    # h is small & static -> unrolled.  TODO(synk): fori_loop / grid axis if h grows large.
    for i in range(h):
        qh = qp[:, i * dh:(i + 1) * dh].astype(cdt)                 # (tq, dh)
        kh = kp[:, i * dh:(i + 1) * dh].astype(cdt)                 # (Lk, dh)
        vh = vp[:, i * dh:(i + 1) * dh].astype(cdt)                 # (Lk, dh)

        s = lax.dot_general(qh, kh, _CONTRACT_LAST,
                            preferred_element_type=jnp.float32)     # (tq, Lk)
        # Finite -1e30 (not -inf): a fully masked row gives a uniform row, not NaN.
        s = jnp.where(masked, jnp.float32(-1e30), s)

        # numerically-stable softmax over keys, in f32; EUP reciprocal + multiply.
        s_max = jnp.max(s, axis=-1, keepdims=True)
        e = jnp.exp(s - s_max)
        inv = pl.reciprocal(jnp.sum(e, axis=-1, keepdims=True), approx=True)
        p = e * inv

        cov_acc = cov_acc + p
        pv_parts.append(jnp.dot(p.astype(cdt), vh,
                                preferred_element_type=jnp.float32))  # (tq, dh)

    # Single full-width output projection: concat heads (lane concat) then (tq,D)x(D,D).
    pv = jnp.concatenate(pv_parts, axis=-1)                          # (tq, h*dh)
    out = lax.dot_general(pv.astype(cdt), wc_ref[...], _CONTRACT_LAST,
                          preferred_element_type=jnp.float32)        # (tq, D)

    out_ref[...] = out.astype(out_ref.dtype)
    cov_ref[...] = (cov_acc * jnp.float32(1.0 / h)).astype(cov_ref.dtype)


def _pick_q_tile(lq, max_tile):
    for t in (512, 256, 128, 64, 32, 16, 8):
        if t <= max_tile and t <= lq and lq % t == 0:
            return t
    return lq


def _vmem_limit_bytes(tq, lk, d, in_itm, mxu_itm, cov_itm):
    blocks = 2 * (tq * d * in_itm          # q (double-buffered)
                  + 2 * lk * d * in_itm    # k, v
                  + tq * lk                # int8 mask
                  + tq * d * in_itm        # out
                  + tq * lk * cov_itm)     # coverage
    weights = 2 * 4 * d * d * mxu_itm      # TODO(synk): single-buffer to halve this
    temps = 4 * (3 * lk * d + 2 * tq * d + 6 * tq * lk)   # rough f32 temporaries
    est = int(1.5 * (blocks + weights + temps))
    # Stay within v7x's 64 MiB physical VMEM; bigger shapes want flash-style Lk tiling.
    return min(64 * 1024 * 1024, max(32 * 1024 * 1024, est))


def multi_head_attention(query, key, value, mask, params, h,
                         *, mxu_dtype=None, max_q_tile=512):
    """query: (Lq, B, D); key/value: (Lk, B, D); mask: (B, Lq, Lk) bool (True = masked).

    Returns (out, coverage): out (Lq, B, D), coverage (B, Lq, Lk), both in the input dtype.
    Implements MultiHeadAttention.forward with share=3, eval mode (no dropout).
    """
    Lq, B, D = query.shape
    Lk = key.shape[0]
    assert D % h == 0
    dh = D // h
    in_dt = query.dtype
    if mxu_dtype is None:
        mxu_dtype = jnp.bfloat16 if in_dt == jnp.float32 else in_dt

    # One-time weight transforms: fold 1/sqrt(d_head) into the query weights and
    # ship the full concatenated matrices in the MXU operand dtype.
    scale = jnp.asarray(dh ** (-0.5), params["wq"].dtype)
    wq = (params["wq"] * scale).astype(mxu_dtype)     # (h*dh, D)
    wk = params["wk"].astype(mxu_dtype)               # (h*dh, D)
    wv = params["wv"].astype(mxu_dtype)               # (h*dh, D)
    wc = params["wc"].astype(mxu_dtype)               # (D, h*dh)

    mask_i8 = jnp.broadcast_to(mask, (B, Lq, Lk)).astype(jnp.int8)   # 1 byte/elem

    tq = _pick_q_tile(Lq, max_q_tile)
    grid = (B, Lq // tq)                               # qi (last) varies fastest -> k/v not refetched

    mask_spec = pl.BlockSpec((None, tq, Lk), lambda b, qi: (b, qi, 0))
    cov_spec = pl.BlockSpec((None, tq, Lk), lambda b, qi: (b, qi, 0))
    wq_spec = pl.BlockSpec(wq.shape, lambda b, qi: (0, 0))
    wk_spec = pl.BlockSpec(wk.shape, lambda b, qi: (0, 0))
    wv_spec = pl.BlockSpec(wv.shape, lambda b, qi: (0, 0))
    wc_spec = pl.BlockSpec(wc.shape, lambda b, qi: (0, 0))

    lane_dense = (D % 128 == 0)
    if lane_dense:
        # Keep the time-first layout: view (L, B, D) as (L, B*D) (free reshape) and
        # address batch b with a lane-dense (.., D) block -> no HBM transpose passes.
        q_in = query.reshape(Lq, B * D)
        k_in = key.reshape(Lk, B * D)
        v_in = value.reshape(Lk, B * D)
        q_spec = pl.BlockSpec((tq, D), lambda b, qi: (qi, b))
        k_spec = pl.BlockSpec((Lk, D), lambda b, qi: (0, b))
        v_spec = pl.BlockSpec((Lk, D), lambda b, qi: (0, b))
        out_spec = pl.BlockSpec((tq, D), lambda b, qi: (qi, b))
        out_struct = jax.ShapeDtypeStruct((Lq, B * D), in_dt)
    else:
        # Fallback when D is not a multiple of 128: batch-major (extra HBM pass).
        q_in = jnp.transpose(query, (1, 0, 2))
        k_in = jnp.transpose(key, (1, 0, 2))
        v_in = jnp.transpose(value, (1, 0, 2))
        q_spec = pl.BlockSpec((None, tq, D), lambda b, qi: (b, qi, 0))
        k_spec = pl.BlockSpec((None, Lk, D), lambda b, qi: (b, 0, 0))
        v_spec = pl.BlockSpec((None, Lk, D), lambda b, qi: (b, 0, 0))
        out_spec = pl.BlockSpec((None, tq, D), lambda b, qi: (b, qi, 0))
        out_struct = jax.ShapeDtypeStruct((B, Lq, D), in_dt)

    vmem_limit = _vmem_limit_bytes(tq, Lk, D,
                                   jnp.dtype(in_dt).itemsize,
                                   jnp.dtype(mxu_dtype).itemsize,
                                   jnp.dtype(in_dt).itemsize)

    out_raw, cov = pl.pallas_call(
        functools.partial(_mha_kernel, h=h),
        out_shape=(out_struct, jax.ShapeDtypeStruct((B, Lq, Lk), in_dt)),
        grid=grid,
        in_specs=[q_spec, k_spec, v_spec, mask_spec,
                  wq_spec, wk_spec, wv_spec, wc_spec],
        out_specs=(out_spec, cov_spec),
        compiler_params=pltpu.CompilerParams(
            dimension_semantics=("parallel", "parallel"),
            vmem_limit_bytes=vmem_limit),
    )(q_in, k_in, v_in, mask_i8, wq, wk, wv, wc)

    out = out_raw.reshape(Lq, B, D) if lane_dense else jnp.transpose(out_raw, (1, 0, 2))
    return out, cov


def reference_mha(query, key, value, mask, params, h):
    """Pure-JAX f32 replica of the PyTorch forward (share=3, eval)."""
    Lq, B, D = query.shape
    Lk = key.shape[0]
    dh = D // h
    q = query @ params["wq"].T
    k = key @ params["wk"].T
    v = value @ params["wv"].T
    q = q.reshape(Lq, B * h, dh).transpose(1, 0, 2) * dh ** (-0.5)
    k = k.reshape(Lk, B * h, dh).transpose(1, 0, 2)
    v = v.reshape(Lk, B * h, dh).transpose(1, 0, 2)
    attns = jnp.einsum('bqd,bkd->bqk', q, k).reshape(B, h, Lq, Lk)
    attns = jnp.where(mask[:, None, :, :], -jnp.inf, attns)
    attns = jax.nn.softmax(attns, axis=-1)
    coverage = attns.mean(axis=1)
    v4 = v.reshape(B, h, Lk, dh)
    out = jnp.einsum('bhqk,bhkd->bhqd', attns, v4)
    out = out.transpose(2, 0, 1, 3).reshape(Lq, B, D)
    out = out @ params["wc"].T
    return out, coverage


if __name__ == "__main__":
    # Small but TPU-friendly shapes: lane-dense D and Lk (multiples of 128).
    H, D_MODEL = 4, 128
    LEN_Q, LEN_K, B = 256, 256, 2
    d_head = D_MODEL // H

    key0 = jax.random.PRNGKey(0)
    kq, kk, kv, kwq, kwk, kwv, kwc = jax.random.split(key0, 7)

    query = jax.random.normal(kq, (LEN_Q, B, D_MODEL), jnp.float32)
    key_ = jax.random.normal(kk, (LEN_K, B, D_MODEL), jnp.float32)
    value = jax.random.normal(kv, (LEN_K, B, D_MODEL), jnp.float32)

    # causal-style boolean mask (True = masked); no row fully masked.
    ii = jnp.arange(LEN_Q)[:, None]
    jj = jnp.arange(LEN_K)[None, :]
    mask = jnp.broadcast_to(jj > ii, (B, LEN_Q, LEN_K))

    # Deterministic Linear weights (bias=False), shape (out_features, in_features).
    bound = 1.0 / (D_MODEL ** 0.5)
    params = {
        "wq": jax.random.uniform(kwq, (H * d_head, D_MODEL), jnp.float32, -bound, bound),
        "wk": jax.random.uniform(kwk, (H * d_head, D_MODEL), jnp.float32, -bound, bound),
        "wv": jax.random.uniform(kwv, (H * d_head, D_MODEL), jnp.float32, -bound, bound),
        "wc": jax.random.uniform(kwc, (D_MODEL, H * d_head), jnp.float32, -bound, bound),
    }

    # max_q_tile=128 -> grid=(2, 2): exercises the Lq tiling at this small shape.
    out, coverage = multi_head_attention(query, key_, value, mask, params, H,
                                         max_q_tile=128)
    out = jax.block_until_ready(out)
    coverage = jax.block_until_ready(coverage)

    out_ref, cov_ref = reference_mha(query, key_, value, mask, params, H)
    assert out.shape == (LEN_Q, B, D_MODEL)
    assert coverage.shape == (B, LEN_Q, LEN_K)
    # Tolerances account for bf16 MXU operands (f32 accumulation) and the
    # approximate EUP reciprocal in the softmax denominator.
    assert jnp.allclose(out, out_ref, atol=2e-2, rtol=2e-2), \
        float(jnp.max(jnp.abs(out - out_ref)))
    assert jnp.allclose(coverage, cov_ref, atol=2e-3, rtol=1e-2), \
        float(jnp.max(jnp.abs(coverage - cov_ref)))

    print("KERNEL_OK")
</pallas_src>

<mosaic_0001>
module attributes {stable_mosaic.version = 11 : i64} {
  func.func @_mha_kernel(%arg0: i32, %arg1: i32, %arg2: memref<128x128xf32, #tpu.memory_space<vmem>>, %arg3: memref<256x128xf32, #tpu.memory_space<vmem>>, %arg4: memref<256x128xf32, #tpu.memory_space<vmem>>, %arg5: memref<1x128x256xi8, #tpu.memory_space<vmem>>, %arg6: memref<128x128xbf16, #tpu.memory_space<vmem>>, %arg7: memref<128x128xbf16, #tpu.memory_space<vmem>>, %arg8: memref<128x128xbf16, #tpu.memory_space<vmem>>, %arg9: memref<128x128xbf16, #tpu.memory_space<vmem>>, %arg10: memref<128x128xf32, #tpu.memory_space<vmem>>, %arg11: memref<1x128x256xf32, #tpu.memory_space<vmem>>) attributes {dimension_semantics = [#tpu.dimension_semantics<parallel>, #tpu.dimension_semantics<parallel>], iteration_bounds = array<i64: 2, 2>, scalar_prefetch = 0 : i64, scratch_operands = 0 : i64, tpu.core_type = #tpu.core_type<tc>, window_params = [{transform_indices = @transform_0, window_bounds = array<i64: 128, 128>}, {transform_indices = @transform_1, window_bounds = array<i64: 256, 128>}, {transform_indices = @transform_2, window_bounds = array<i64: 256, 128>}, {transform_indices = @transform_3, window_bounds = array<i64: 1, 128, 256>}, {pipeline_mode = #tpu.pipeline_mode<synchronous>, transform_indices = @transform_4, window_bounds = array<i64: 128, 128>}, {pipeline_mode = #tpu.pipeline_mode<synchronous>, transform_indices = @transform_5, window_bounds = array<i64: 128, 128>}, {pipeline_mode = #tpu.pipeline_mode<synchronous>, transform_indices = @transform_6, window_bounds = array<i64: 128, 128>}, {pipeline_mode = #tpu.pipeline_mode<synchronous>, transform_indices = @transform_7, window_bounds = array<i64: 128, 128>}, {transform_indices = @transform_8, window_bounds = array<i64: 128, 128>}, {transform_indices = @transform_9, window_bounds = array<i64: 1, 128, 256>}]} {
    %c0 = arith.constant 0 : index
    %c0_0 = arith.constant 0 : index
    %0 = vector.load %arg2[%c0, %c0_0] : memref<128x128xf32, #tpu.memory_space<vmem>>, vector<128x128xf32>
    %1 = arith.truncf %0 : vector<128x128xf32> to vector<128x128xbf16>
    %c0_1 = arith.constant 0 : index
    %c0_2 = arith.constant 0 : index
    %2 = vector.load %arg3[%c0_1, %c0_2] : memref<256x128xf32, #tpu.memory_space<vmem>>, vector<256x128xf32>
    %3 = arith.truncf %2 : vector<256x128xf32> to vector<256x128xbf16>
    %c0_3 = arith.constant 0 : index
    %c0_4 = arith.constant 0 : index
    %4 = vector.load %arg4[%c0_3, %c0_4] : memref<256x128xf32, #tpu.memory_space<vmem>>, vector<256x128xf32>
    %5 = arith.truncf %4 : vector<256x128xf32> to vector<256x128xbf16>
    %c0_5 = arith.constant 0 : index
    %c0_6 = arith.constant 0 : index
    %6 = vector.load %arg6[%c0_5, %c0_6] : memref<128x128xbf16, #tpu.memory_space<vmem>>, vector<128x128xbf16>
    %cst = arith.constant dense<0.000000e+00> : vector<128x128xf32>
    %7 = tpu.matmul %1, %6, %cst {dimension_numbers = #tpu.dot_dimension_numbers<[1], [1], [0], [0], [0, 0, 1, 0], [], []>} : vector<128x128xbf16>, vector<128x128xbf16>, vector<128x128xf32> -> vector<128x128xf32>
    %c0_7 = arith.constant 0 : index
    %c0_8 = arith.constant 0 : index
    %8 = vector.load %arg7[%c0_7, %c0_8] : memref<128x128xbf16, #tpu.memory_space<vmem>>, vector<128x128xbf16>
    %cst_9 = arith.constant dense<0.000000e+00> : vector<256x128xf32>
    %9 = tpu.matmul %3, %8, %cst_9 {dimension_numbers = #tpu.dot_dimension_numbers<[1], [1], [0], [0], [0, 0, 1, 0], [], []>} : vector<256x128xbf16>, vector<128x128xbf16>, vector<256x128xf32> -> vector<256x128xf32>
    %c0_10 = arith.constant 0 : index
    %c0_11 = arith.constant 0 : index
    %10 = vector.load %arg8[%c0_10, %c0_11] : memref<128x128xbf16, #tpu.memory_space<vmem>>, vector<128x128xbf16>
    %cst_12 = arith.constant dense<0.000000e+00> : vector<256x128xf32>
    %11 = tpu.matmul %5, %10, %cst_12 {dimension_numbers = #tpu.dot_dimension_numbers<[1], [1], [0], [0], [0, 0, 1, 0], [], []>} : vector<256x128xbf16>, vector<128x128xbf16>, vector<256x128xf32> -> vector<256x128xf32>
    %c0_13 = arith.constant 0 : index
    %c0_14 = arith.constant 0 : index
    %c0_15 = arith.constant 0 : index
    %12 = vector.load %arg5[%c0_13, %c0_14, %c0_15] : memref<1x128x256xi8, #tpu.memory_space<vmem>>, vector<1x128x256xi8>
    %13 = vector.shape_cast %12 : vector<1x128x256xi8> to vector<128x256xi8>
    %14 = arith.extsi %13 : vector<128x256xi8> to vector<128x256xi32>
    %c0_i32 = arith.constant 0 : i32
    %15 = vector.broadcast %c0_i32 : i32 to vector<128x256xi32>
    %16 = arith.cmpi ne, %14, %15 : vector<128x256xi32>
    %cst_16 = arith.constant 0.000000e+00 : f32
    %17 = vector.broadcast %cst_16 : f32 to vector<128x256xf32>
    %18 = vector.extract_strided_slice %7 {offsets = [0, 0], sizes = [128, 32], strides = [1, 1]} : vector<128x128xf32> to vector<128x32xf32>
    %19 = arith.truncf %18 : vector<128x32xf32> to vector<128x32xbf16>
    %20 = vector.extract_strided_slice %9 {offsets = [0, 0], sizes = [256, 32], strides = [1, 1]} : vector<256x128xf32> to vector<256x32xf32>
    %21 = arith.truncf %20 : vector<256x32xf32> to vector<256x32xbf16>
    %22 = vector.extract_strided_slice %11 {offsets = [0, 0], sizes = [256, 32], strides = [1, 1]} : vector<256x128xf32> to vector<256x32xf32>
    %23 = arith.truncf %22 : vector<256x32xf32> to vector<256x32xbf16>
    %cst_17 = arith.constant dense<0.000000e+00> : vector<128x256xf32>
    %24 = tpu.matmul %19, %21, %cst_17 {dimension_numbers = #tpu.dot_dimension_numbers<[1], [1], [0], [0], [0, 0, 1, 0], [], []>} : vector<128x32xbf16>, vector<256x32xbf16>, vector<128x256xf32> -> vector<128x256xf32>
    %cst_18 = arith.constant -1.000000e+30 : f32
    %25 = vector.broadcast %cst_18 : f32 to vector<128x256xf32>
    %26 = arith.select %16, %25, %24 : vector<128x256xi1>, vector<128x256xf32>
    %cst_19 = arith.constant dense<0xFF800000> : vector<128xf32>
    %27 = vector.multi_reduction <maximumf>, %26, %cst_19 [1] : vector<128x256xf32> to vector<128xf32>
    %28 = vector.shape_cast %27 : vector<128xf32> to vector<128x1xf32>
    %29 = vector.broadcast %28 : vector<128x1xf32> to vector<128x256xf32>
    %30 = arith.subf %26, %29 : vector<128x256xf32>
    %31 = math.exp %30 : vector<128x256xf32>
    %cst_20 = arith.constant dense<0.000000e+00> : vector<128xf32>
    %32 = vector.multi_reduction <add>, %31, %cst_20 [1] : vector<128x256xf32> to vector<128xf32>
    %33 = vector.shape_cast %32 : vector<128xf32> to vector<128x1xf32>
    %34 = tpu.reciprocal %33 {approx = true} : vector<128x1xf32> -> vector<128x1xf32>
    %35 = vector.broadcast %34 : vector<128x1xf32> to vector<128x256xf32>
    %36 = arith.mulf %31, %35 : vector<128x256xf32>
    %37 = arith.addf %17, %36 : vector<128x256xf32>
    %38 = arith.truncf %36 : vector<128x256xf32> to vector<128x256xbf16>
    %cst_21 = arith.constant dense<0.000000e+00> : vector<128x32xf32>
    %39 = tpu.matmul %38, %23, %cst_21 {dimension_numbers = #tpu.dot_dimension_numbers<[1], [0], [0], [1], [0, 0, 1, 1], [], []>} : vector<128x256xbf16>, vector<256x32xbf16>, vector<128x32xf32> -> vector<128x32xf32>
    %40 = vector.extract_strided_slice %7 {offsets = [0, 32], sizes = [128, 32], strides = [1, 1]} : vector<128x128xf32> to vector<128x32xf32>
    %41 = arith.truncf %40 : vector<128x32xf32> to vector<128x32xbf16>
    %42 = vector.extract_strided_slice %9 {offsets = [0, 32], sizes = [256, 32], strides = [1, 1]} : vector<256x128xf32> to vector<256x32xf32>
    %43 = arith.truncf %42 : vector<256x32xf32> to vector<256x32xbf16>
    %44 = vector.extract_strided_slice %11 {offsets = [0, 32], sizes = [256, 32], strides = [1, 1]} : vector<256x128xf32> to vector<256x32xf32>
    %45 = arith.truncf %44 : vector<256x32xf32> to vector<256x32xbf16>
    %cst_22 = arith.constant dense<0.000000e+00> : vector<128x256xf32>
    %46 = tpu.matmul %41, %43, %cst_22 {dimension_numbers = #tpu.dot_dimension_numbers<[1], [1], [0], [0], [0, 0, 1, 0], [], []>} : vector<128x32xbf16>, vector<256x32xbf16>, vector<128x256xf32> -> vector<128x256xf32>
    %cst_23 = arith.constant -1.000000e+30 : f32
    %47 = vector.broadcast %cst_23 : f32 to vector<128x256xf32>
    %48 = arith.select %16, %47, %46 : vector<128x256xi1>, vector<128x256xf32>
    %cst_24 = arith.constant dense<0xFF800000> : vector<128xf32>
    %49 = vector.multi_reduction <maximumf>, %48, %cst_24 [1] : vector<128x256xf32> to vector<128xf32>
    %50 = vector.shape_cast %49 : vector<128xf32> to vector<128x1xf32>
    %51 = vector.broadcast %50 : vector<128x1xf32> to vector<128x256xf32>
    %52 = arith.subf %48, %51 : vector<128x256xf32>
    %53 = math.exp %52 : vector<128x256xf32>
    %cst_25 = arith.constant dense<0.000000e+00> : vector<128xf32>
    %54 = vector.multi_reduction <add>, %53, %cst_25 [1] : vector<128x256xf32> to vector<128xf32>
    %55 = vector.shape_cast %54 : vector<128xf32> to vector<128x1xf32>
    %56 = tpu.reciprocal %55 {approx = true} : vector<128x1xf32> -> vector<128x1xf32>
    %57 = vector.broadcast %56 : vector<128x1xf32> to vector<128x256xf32>
    %58 = arith.mulf %53, %57 : vector<128x256xf32>
    %59 = arith.addf %37, %58 : vector<128x256xf32>
    %60 = arith.truncf %58 : vector<128x256xf32> to vector<128x256xbf16>
    %cst_26 = arith.constant dense<0.000000e+00> : vector<128x32xf32>
    %61 = tpu.matmul %60, %45, %cst_26 {dimension_numbers = #tpu.dot_dimension_numbers<[1], [0], [0], [1], [0, 0, 1, 1], [], []>} : vector<128x256xbf16>, vector<256x32xbf16>, vector<128x32xf32> -> vector<128x32xf32>
    %62 = vector.extract_strided_slice %7 {offsets = [0, 64], sizes = [128, 32], strides = [1, 1]} : vector<128x128xf32> to vector<128x32xf32>
    %63 = arith.truncf %62 : vector<128x32xf32> to vector<128x32xbf16>
    %64 = vector.extract_strided_slice %9 {offsets = [0, 64], sizes = [256, 32], strides = [1, 1]} : vector<256x128xf32> to vector<256x32xf32>
    %65 = arith.truncf %64 : vector<256x32xf32> to vector<256x32xbf16>
    %66 = vector.extract_strided_slice %11 {offsets = [0, 64], sizes = [256, 32], strides = [1, 1]} : vector<256x128xf32> to vector<256x32xf32>
    %67 = arith.truncf %66 : vector<256x32xf32> to vector<256x32xbf16>
    %cst_27 = arith.constant dense<0.000000e+00> : vector<128x256xf32>
    %68 = tpu.matmul %63, %65, %cst_27 {dimension_numbers = #tpu.dot_dimension_numbers<[1], [1], [0], [0], [0, 0, 1, 0], [], []>} : vector<128x32xbf16>, vector<256x32xbf16>, vector<128x256xf32> -> vector<128x256xf32>
    %cst_28 = arith.constant -1.000000e+30 : f32
    %69 = vector.broadcast %cst_28 : f32 to vector<128x256xf32>
    %70 = arith.select %16, %69, %68 : vector<128x256xi1>, vector<128x256xf32>
    %cst_29 = arith.constant dense<0xFF800000> : vector<128xf32>
    %71 = vector.multi_reduction <maximumf>, %70, %cst_29 [1] : vector<128x256xf32> to vector<128xf32>
    %72 = vector.shape_cast %71 : vector<128xf32> to vector<128x1xf32>
    %73 = vector.broadcast %72 : vector<128x1xf32> to vector<128x256xf32>
    %74 = arith.subf %70, %73 : vector<128x256xf32>
    %75 = math.exp %74 : vector<128x256xf32>
    %cst_30 = arith.constant dense<0.000000e+00> : vector<128xf32>
    %76 = vector.multi_reduction <add>, %75, %cst_30 [1] : vector<128x256xf32> to vector<128xf32>
    %77 = vector.shape_cast %76 : vector<128xf32> to vector<128x1xf32>
    %78 = tpu.reciprocal %77 {approx = true} : vector<128x1xf32> -> vector<128x1xf32>
    %79 = vector.broadcast %78 : vector<128x1xf32> to vector<128x256xf32>
    %80 = arith.mulf %75, %79 : vector<128x256xf32>
    %81 = arith.addf %59, %80 : vector<128x256xf32>
    %82 = arith.truncf %80 : vector<128x256xf32> to vector<128x256xbf16>
    %cst_31 = arith.constant dense<0.000000e+00> : vector<128x32xf32>
    %83 = tpu.matmul %82, %67, %cst_31 {dimension_numbers = #tpu.dot_dimension_numbers<[1], [0], [0], [1], [0, 0, 1, 1], [], []>} : vector<128x256xbf16>, vector<256x32xbf16>, vector<128x32xf32> -> vector<128x32xf32>
    %84 = vector.extract_strided_slice %7 {offsets = [0, 96], sizes = [128, 32], strides = [1, 1]} : vector<128x128xf32> to vector<128x32xf32>
    %85 = arith.truncf %84 : vector<128x32xf32> to vector<128x32xbf16>
    %86 = vector.extract_strided_slice %9 {offsets = [0, 96], sizes = [256, 32], strides = [1, 1]} : vector<256x128xf32> to vector<256x32xf32>
    %87 = arith.truncf %86 : vector<256x32xf32> to vector<256x32xbf16>
    %88 = vector.extract_strided_slice %11 {offsets = [0, 96], sizes = [256, 32], strides = [1, 1]} : vector<256x128xf32> to vector<256x32xf32>
    %89 = arith.truncf %88 : vector<256x32xf32> to vector<256x32xbf16>
    %cst_32 = arith.constant dense<0.000000e+00> : vector<128x256xf32>
    %90 = tpu.matmul %85, %87, %cst_32 {dimension_numbers = #tpu.dot_dimension_numbers<[1], [1], [0], [0], [0, 0, 1, 0], [], []>} : vector<128x32xbf16>, vector<256x32xbf16>, vector<128x256xf32> -> vector<128x256xf32>
    %cst_33 = arith.constant -1.000000e+30 : f32
    %91 = vector.broadcast %cst_33 : f32 to vector<128x256xf32>
    %92 = arith.select %16, %91, %90 : vector<128x256xi1>, vector<128x256xf32>
    %cst_34 = arith.constant dense<0xFF800000> : vector<128xf32>
    %93 = vector.multi_reduction <maximumf>, %92, %cst_34 [1] : vector<128x256xf32> to vector<128xf32>
    %94 = vector.shape_cast %93 : vector<128xf32> to vector<128x1xf32>
    %95 = vector.broadcast %94 : vector<128x1xf32> to vector<128x256xf32>
    %96 = arith.subf %92, %95 : vector<128x256xf32>
    %97 = math.exp %96 : vector<128x256xf32>
    %cst_35 = arith.constant dense<0.000000e+00> : vector<128xf32>
    %98 = vector.multi_reduction <add>, %97, %cst_35 [1] : vector<128x256xf32> to vector<128xf32>
    %99 = vector.shape_cast %98 : vector<128xf32> to vector<128x1xf32>
    %100 = tpu.reciprocal %99 {approx = true} : vector<128x1xf32> -> vector<128x1xf32>
    %101 = vector.broadcast %100 : vector<128x1xf32> to vector<128x256xf32>
    %102 = arith.mulf %97, %101 : vector<128x256xf32>
    %103 = arith.addf %81, %102 : vector<128x256xf32>
    %104 = arith.truncf %102 : vector<128x256xf32> to vector<128x256xbf16>
    %cst_36 = arith.constant dense<0.000000e+00> : vector<128x32xf32>
    %105 = tpu.matmul %104, %89, %cst_36 {dimension_numbers = #tpu.dot_dimension_numbers<[1], [0], [0], [1], [0, 0, 1, 1], [], []>} : vector<128x256xbf16>, vector<256x32xbf16>, vector<128x32xf32> -> vector<128x32xf32>
    %106 = tpu.concatenate %39, %61, %83, %105 in 1 : vector<128x32xf32>, vector<128x32xf32>, vector<128x32xf32>, vector<128x32xf32> -> vector<128x128xf32>
    %107 = arith.truncf %106 : vector<128x128xf32> to vector<128x128xbf16>
    %c0_37 = arith.constant 0 : index
    %c0_38 = arith.constant 0 : index
    %108 = vector.load %arg9[%c0_37, %c0_38] : memref<128x128xbf16, #tpu.memory_space<vmem>>, vector<128x128xbf16>
    %cst_39 = arith.constant dense<0.000000e+00> : vector<128x128xf32>
    %109 = tpu.matmul %107, %108, %cst_39 {dimension_numbers = #tpu.dot_dimension_numbers<[1], [1], [0], [0], [0, 0, 1, 0], [], []>} : vector<128x128xbf16>, vector<128x128xbf16>, vector<128x128xf32> -> vector<128x128xf32>
    %c0_40 = arith.constant 0 : index
    %c0_41 = arith.constant 0 : index
    %110 = vector.load %arg10[%c0_40, %c0_41] : memref<128x128xf32, #tpu.memory_space<vmem>>, vector<128x128xf32>
    tpu.vector_store %arg10[%c0_40, %c0_41], %109 {strides = array<i32>} : memref<128x128xf32, #tpu.memory_space<vmem>>, vector<128x128xf32>,
    %cst_42 = arith.constant 2.500000e-01 : f32
    %111 = vector.broadcast %cst_42 : f32 to vector<128x256xf32>
    %112 = arith.mulf %103, %111 : vector<128x256xf32>
    %c0_43 = arith.constant 0 : index
    %c0_44 = arith.constant 0 : index
    %c0_45 = arith.constant 0 : index
    %113 = vector.load %arg11[%c0_43, %c0_44, %c0_45] : memref<1x128x256xf32, #tpu.memory_space<vmem>>, vector<1x128x256xf32>
    %114 = vector.shape_cast %113 : vector<1x128x256xf32> to vector<128x256xf32>
    %115 = vector.shape_cast %112 : vector<128x256xf32> to vector<1x128x256xf32>
    tpu.vector_store %arg11[%c0_43, %c0_44, %c0_45], %115 {strides = array<i32>} : memref<1x128x256xf32, #tpu.memory_space<vmem>>, vector<1x128x256xf32>,
    return
  }
  func.func @transform_0(%arg0: i32, %arg1: i32) -> (i32, i32) {
    %c0_i32 = arith.constant 0 : i32
    return %arg1, %arg0 : i32, i32
  }
  func.func @transform_1(%arg0: i32, %arg1: i32) -> (i32, i32) {
    %c0_i32 = arith.constant 0 : i32
    %c0_i32_0 = arith.constant 0 : i32
    return %c0_i32, %arg0 : i32, i32
  }
  func.func @transform_2(%arg0: i32, %arg1: i32) -> (i32, i32) {
    %c0_i32 = arith.constant 0 : i32
    %c0_i32_0 = arith.constant 0 : i32
    return %c0_i32, %arg0 : i32, i32
  }
  func.func @transform_3(%arg0: i32, %arg1: i32) -> (i32, i32, i32) {
    %c0_i32 = arith.constant 0 : i32
    %c0_i32_0 = arith.constant 0 : i32
    return %arg0, %arg1, %c0_i32 : i32, i32, i32
  }
  func.func @transform_4(%arg0: i32, %arg1: i32) -> (i32, i32) {
    %c0_i32 = arith.constant 0 : i32
    %c0_i32_0 = arith.constant 0 : i32
    %c0_i32_1 = arith.constant 0 : i32
    return %c0_i32, %c0_i32_0 : i32, i32
  }
  func.func @transform_5(%arg0: i32, %arg1: i32) -> (i32, i32) {
    %c0_i32 = arith.constant 0 : i32
    %c0_i32_0 = arith.constant 0 : i32
    %c0_i32_1 = arith.constant 0 : i32
    return %c0_i32, %c0_i32_0 : i32, i32
  }
  func.func @transform_6(%arg0: i32, %arg1: i32) -> (i32, i32) {
    %c0_i32 = arith.constant 0 : i32
    %c0_i32_0 = arith.constant 0 : i32
    %c0_i32_1 = arith.constant 0 : i32
    return %c0_i32, %c0_i32_0 : i32, i32
  }
  func.func @transform_7(%arg0: i32, %arg1: i32) -> (i32, i32) {
    %c0_i32 = arith.constant 0 : i32
    %c0_i32_0 = arith.constant 0 : i32
    %c0_i32_1 = arith.constant 0 : i32
    return %c0_i32, %c0_i32_0 : i32, i32
  }
  func.func @transform_8(%arg0: i32, %arg1: i32) -> (i32, i32) {
    %c0_i32 = arith.constant 0 : i32
    return %arg1, %arg0 : i32, i32
  }
  func.func @transform_9(%arg0: i32, %arg1: i32) -> (i32, i32, i32) {
    %c0_i32 = arith.constant 0 : i32
    %c0_i32_0 = arith.constant 0 : i32
    return %arg0, %arg1, %c0_i32 : i32, i32, i32
  }
}

</mosaic_0001>

<bundles_post_ra>
// kernel: tpu_custom_call.1
= control target key start
LH: loop header
LB: loop body
LE: loop exit
PB: predicated region body
PF: predicated region fallthrough
CT: control target
= control target key end

     0   :  { %s9558_s0 = inlined_call_operand.hbm [shape: f32[256,256], index: 0, kind: input, shape index: {}]   ;;  %s9559_s1 = inlined_call_operand.hbm [shape: f32[256,256], index: 1, kind: input, shape index: {}]   ;;  %s9560_s2 = inlined_call_operand.hbm [shape: f32[256,256], index: 2, kind: input, shape index: {}]   ;;  %s9561_s3 = inlined_call_operand.hbm [shape: s8[2,256,256], index: 3, kind: input, shape index: {}]   ;;  %s9562_s4 = inlined_call_operand.hbm [shape: bf16[128,128], index: 4, kind: input, shape index: {}]   ;;  %s9563_s5 = inlined_call_operand.hbm [shape: bf16[128,128], index: 5, kind: input, shape index: {}]   ;;  %s9564_s6 = inlined_call_operand.hbm [shape: bf16[128,128], index: 6, kind: input, shape index: {}]   ;;  %s9565_s7 = inlined_call_operand.hbm [shape: bf16[128,128], index: 7, kind: input, shape index: {}]   ;;  %s9566_s8 = inlined_call_operand.hbm [shape: f32[256,256], index: 8, kind: output, shape index: {0}]   ;;  %s9567_s9 = inlined_call_operand.hbm [shape: f32[2,256,256], index: 9, kind: output, shape index: {1}]  }
   0x1   :  { %9827 = sst [smem:[#allocation172_spill]] %s9558_s0 }
   0x2   :  { %9828 = sst [smem:[#allocation173_spill]] %s9559_s1 }
   0x3   :  { %9829 = sst [smem:[#allocation174_spill]] %s9560_s2 }
   0x4   :  { %9830 = sst [smem:[#allocation175_spill]] %s9562_s4 }
   0x5   :  { %9831 = sst [smem:[#allocation176_spill]] %s9563_s5 }
   0x6   :  { %9832 = sst [smem:[#allocation177_spill]] %s9564_s6 }
   0x7   :  { %9833 = sst [smem:[#allocation178_spill]] %s9565_s7 }
   0x8   :  { %9834 = sst [smem:[#allocation179_spill]] %s9566_s8 }
   0x9   :  { %9835 = sst [smem:[#allocation180_spill]] %s9567_s9 }
   0xa   :  { %15 = vsyncpa [#allocation3], 0 }
   0xb   :  { %17 = vsyncpa [#allocation3 + $0x1], 0 }
   0xc   :  { %18 = vsyncpa [#allocation6], 0 }
   0xd   :  { %20 = vsyncpa [#allocation6 + $0x1], 0 }
   0xe   :  { %21 = vsyncpa [#allocation9], 0 }
   0xf   :  { %23 = vsyncpa [#allocation9 + $0x1], 0 }
  0x10   :  { %24 = vsyncpa [#allocation12], 0 }
  0x11   :  { %25 = vsyncpa [#allocation15], 0 }
  0x12   :  { %26 = vsyncpa [#allocation4], 0 }
  0x13   :  { %28 = vsyncpa [#allocation4 + $0x1], 0 }
  0x14   :  { %29 = vsyncpa [#allocation18], 0 }
  0x15   :  { %31 = vsyncpa [#allocation18 + $0x1], 0  ;;  %s6079_s30 = smov 0   ;;  %s6081_s10 = smov 0  }
  0x16   :  { %s6083_s11 = smov 0   ;;  %s6085_s12 = smov 0  }
  0x17   :  { %s6087_s13 = smov 0   ;;  %s6089_s14 = smov 0  }
  0x18   :  { %s6091_s15 = smov 0   ;;  %s6093_s16 = smov 0  }
  0x19   :  { %s6095_s17 = smov 0   ;;  %s6097_s18 = smov 0  }
  0x1a   :  { %s6099_s19 = smov 0  }
  0x1b LB: > { %9836 = sst [smem:[#allocation27_spill]] %s5974_s10  ;;  %s6133_s20 = sadd.s32 4294967295, %s6010_s19   ;;  %s6010_s19 = sphi %s6099_s19, %s37_s19   ;;  %s6006_s18 = sphi %s6097_s18, %s10530_s18   ;;  %s6002_s17 = sphi %s6095_s17, %s10529_s17   ;;  %s5998_s16 = sphi %s6093_s16, %s10528_s16   ;;  %s5994_s15 = sphi %s6091_s15, %s10527_s15   ;;  %s5990_s14 = sphi %s6089_s14, %s10520_s14   ;;  %s5986_s13 = sphi %s6087_s13, %s10526_s13   ;;  %s5982_s12 = sphi %s6085_s12, %s10525_s12   ;;  %s5978_s11 = sphi %s6083_s11, %s10524_s11   ;;  %s5974_s10 = sphi %s6081_s10, %s10523_s10   ;;  %s5970_s30 = sphi %s6079_s30, %s10518_s30  }
  0x1c   : > { %9837 = sst [smem:[#allocation28_spill]] %s5982_s12  ;;  %s4630_s21 = sadd.s32 4294967294, %s6010_s19  }
  0x1d   : > { %9838 = sst [smem:[#allocation29_spill]] %s5990_s14  ;;  %p71_p0 = scmp.ne.s32.totalorder %s5986_s13, %s5982_s12 }
  0x1e   : > { %9839 = sst [smem:[#allocation30_spill]] %s5994_s15  ;;  %p72_p1 = scmp.eq.s32.totalorder %s6133_s20, 0 }
  0x1f   : > { %9840 = sst [smem:[#allocation31_spill]] %s5998_s16  ;;  %p97_p2 = scmp.ne.s32.totalorder %s5974_s10, %s5970_s30 }
  0x20   : > { %9841 = sst [smem:[#allocation32_spill]] %s6133_s20  ;;  %p6142_p3 = por %p72_p1, %p71_p0 }
  0x21   : > { %p267_p4 = scmp.eq.s32.totalorder %s4630_s21, 3  ;;  %p6148_p5 = por %p97_p2, %p72_p1 }
  0x22   : > { %s9842_s22 = scalar_select %p6142_p3, 1, 0 }
  0x23   : > { %s9844_s23 = scalar_select %p6148_p5, 1, 0 }
  0x24   : > { %9843 = sst [smem:[#allocation33_spill]] %s9842_s22  ;;  %p4631_p6 = scmp.ge.s32.totalorder %s6010_s19, 1 }
  0x25   : > { %9845 = sst [smem:[#allocation34_spill]] %s9844_s23  ;;  %p6153_p7 = por %p267_p4, %p71_p0 }
  0x26   : > { %p302_p8 = scmp.lt.s32.totalorder %s6010_s19, 5  ;;  %s9848_s4 = sld [smem:[#allocation175_spill]] }
  0x27   : > { %s9846_s24 = scalar_select %p6153_p7, 1, 0 }
  0x28   : > { %p6161_p9 = pnand %p4631_p6, %p302_p8  ;;  %s6012_s29 = smov [#allocation10]  }
  0x29   : > { %9847 = sst [smem:[#allocation35_spill]] %s9846_s24  ;;  %s315_s30 = sshll.u32 %s6012_s29, 4  ;;  %s316_s30 = int_to_ptr.vmem [resolvable:$true] %s315_s30 }
  0x2a   : > { %p4944_p10 = pneg %p6161_p9  ;;  %s9851_s5 = sld [smem:[#allocation176_spill]] }
  0x2b   : > { %s9574_s24 = smov 64   ;;  %s9576_s12 = smov 4  }
  0x2c   : > { %s313_s27 = sshll.u32 %s9848_s4, 4  ;;  %p6169_p11 = pnand %p4944_p10, %p72_p1  ;;  %s314_s27 = int_to_ptr.hbm [resolvable:$true] %s313_s27 }
  0x2d   : > { %s6015_s29 = smov [#allocation11]   ;;  %p261_p12 = scmp.eq.s32.totalorder %s6133_s20, 3 }
  0x2e   : > { %4947 = dma.hbm_to_vmem [thread:$0]  (!%p6169_p11), %s314_s27, 1024, %s316_s30, [#allocation9], %s9574_s24, %s9574_s24, %s9576_s12  }
  0x2f   : > { %s329_s8 = sshll.u32 %s6015_s29, 4  ;;  %p66_p13 = scmp.eq.s32.totalorder %s6010_s19, 0  ;;  %s330_s8 = int_to_ptr.vmem [resolvable:$true] %s329_s8 }
  0x30   : > { %s327_s4 = sshll.u32 %s9851_s5, 4  ;;  %p91_p0 = scmp.ne.s32.totalorder %s5978_s11, %s5974_s10  ;;  %s328_s4 = int_to_ptr.hbm [resolvable:$true] %s327_s4 }
  0x31   : > { %4950 = dma.hbm_to_vmem [thread:$0]  (!%p6169_p11), %s328_s4, 1024, %s330_s8, [#allocation12], %s9574_s24, %s9574_s24, %s9576_s12  }
  0x32   : > { %p4981_p2 = scmp.lt.s32.totalorder %s6010_s19, 4  ;;  %p93_p4 = por %p91_p0, %p66_p13 }
  0x33   : > { %s397_s26 = sand.u32 1, %s5978_s11   ;;  %s4642_s27 = sshll.u32 %s6006_s18, 3 }
  0x34   : > { %s4641_s5 = sshll.u32 %s397_s26, 8  ;;  %s9852_s1 = sld [smem:[#allocation173_spill]] }
  0x35   : > { %s399_s16 = scalar_lea.vmem [#allocation5], %s4641_s5  ;;  %p6201_p6 = pnand %p4981_p2, %p93_p4 }
  0x36   : > { %s406_s15 = sshll.u32 %s399_s16, 4  ;;  %s9854_s2 = sld [smem:[#allocation174_spill]]  ;;  %s407_s15 = int_to_ptr.vmem [resolvable:$true] %s406_s15 }
  0x37   : > { %s9855_s23 = sand.u32 1, %s6010_s19   ;;  %s9581_s16 = smov 256  }
  0x38   : > { %s6210_s10 = scalar_lea.sflag [#allocation6], %s9855_s23  ;;  %s9585_s30 = smov 8  }
  0x39   : > { %s84_s29 = sadd.s32 1, %s5978_s11  ;;  %s420_s12 = scalar_lea.vmem [#allocation7], %s4641_s5 }
  0x3a   : > { %s403_s9 = scalar_lea.hbm %s9852_s1, %s4642_s27  ;;  %s6221_s24 = sshll.u32 %s420_s12, 4  ;;  %s428_s24 = int_to_ptr.vmem [resolvable:$true] %s6221_s24 }
  0x3b   : > { %s404_s4 = sshll.u32 %s403_s9, 4  ;;  %s9583_s9 = smov 128   ;;  %s405_s4 = int_to_ptr.hbm [resolvable:$true] %s404_s4 }
  0x3c   : > { %s424_s26 = scalar_lea.hbm %s9854_s2, %s4642_s27  ;;  %s9856_s6 = sld [smem:[#allocation177_spill]] }
  0x3d   : > { %s425_s25 = sshll.u32 %s424_s26, 4  ;;  %s6019_s1 = smov [#allocation13]   ;;  %s6219_s25 = int_to_ptr.hbm [resolvable:$true] %s425_s25 }
  0x3e   : > { %4963 = dma.hbm_to_vmem [thread:$0]  (!%p6201_p6), %s405_s4, 4096, %s407_s15, %s6210_s10, %s9581_s16, %s9583_s9, %s9585_s30  }
  0x3f   : > { %s343_s15 = sshll.u32 %s6019_s1, 4  ;;  %s9857_s7 = sld [smem:[#allocation178_spill]]  ;;  %s344_s15 = int_to_ptr.vmem [resolvable:$true] %s343_s15 }
  0x40   : > { %s9858_s5 = smov 4   ;;  %s9859_s12 = smov 64  }
  0x41   : > { %s6020_s23 = smov [#allocation14]   ;;  %s46_s1 = sadd.s32 1, %s6002_s17 }
  0x42   : > { %s341_s26 = sshll.u32 %s9856_s6, 4  ;;  %s357_s27 = sshll.u32 %s6020_s23, 4  ;;  %s342_s26 = int_to_ptr.hbm [resolvable:$true] %s341_s26  ;;  %s358_s27 = int_to_ptr.vmem [resolvable:$true] %s357_s27 }
  0x43   : > { %4953 = dma.hbm_to_vmem [thread:$0]  (!%p6169_p11), %s342_s26, 1024, %s344_s15, [#allocation12], %s9859_s12, %s9859_s12, %s9858_s5  }
  0x44   : > { %p47_p8 = scmp.ge.s32.totalorder %s46_s1, 2  ;;  %s49_s16 = sadd.s32 1, %s6006_s18 }
  0x45   : > { %s355_s9 = sshll.u32 %s9857_s7, 4  ;;  %s58_s4 = sadd.s32 1, %s5990_s14  ;;  %s356_s9 = int_to_ptr.hbm [resolvable:$true] %s355_s9 }
  0x46   : > { %4956 = dma.hbm_to_vmem [thread:$0]  (!%p6169_p11), %s356_s9, 1024, %s358_s27, [#allocation15], %s9859_s12, %s9859_s12, %s9858_s5  }
  0x47   : > { %p65_p10 = scmp.ne.s32.totalorder %s5990_s14, %s5986_s13  ;;  %s10532_s1 = smov (%p47_p8, %s46_s1), 0 }
  0x48   : > { %9860 = sst [smem:[#allocation36_spill]] %s10532_s1  ;;  %s10534_s16 = smov (!%p47_p8, %s49_s16), %s6006_s18 }
  0x49   : > { %s53_s26 = ssub.s32 %s6002_s17, %s10532_s1  ;;  %p6251_p0 = por %p66_p13, %p65_p10 }
  0x4a   : > { %p51_p11 = scmp.ge.s32.totalorder %s10534_s16, 2  ;;  %p6257_p4 = por %p261_p12, %p65_p10 }
  0x4b   : > { %s371_s15 = sand.u32 1, %s5990_s14   ;;  %s4864_s5 = sshll.u32 %s6002_s17, 5 }
  0x4c   : > { %s9862_s9 = scalar_select %p6257_p4, 1, 0 }
  0x4d   : > { %s10536_s16 = smov (%p51_p11, %s10534_s16), 0  ;;  %s4637_s12 = sshll.u32 %s371_s15, 7 }
  0x4e   : > { %9863 = sst [smem:[#allocation37_spill]] %s9862_s9  ;;  %s54_s23 = ssub.s32 %s6006_s18, %s10536_s16 }
  0x4f   : > { %9864 = sst [smem:[#allocation38_spill]] %s10536_s16  ;;  %s55_s27 = sor.u32 %s54_s23, %s53_s26 }
  0x50   : > { %p82_p13 = scmp.eq.s32.totalorder %s54_s23, 0  ;;  %p56_p8 = scmp.eq.s32.totalorder %s55_s27, 0 }
  0x51   : > { %s380_s30 = sadd.s32 %s6006_s18, %s4864_s5  ;;  %s375_s1 = scalar_lea.vmem [#allocation2], %s4637_s12 }
  0x52   : > { %s6271_s2 = scalar_select %p82_p13, %s5978_s11, %s84_s29  }
  0x53   : > { %s6274_s6 = scalar_select %p56_p8, %s5990_s14, %s58_s4  }
  0x54   : > { %s4640_s7 = sshll.u32 %s380_s30, 3  ;;  %s385_s9 = sshll.u32 %s375_s1, 4  ;;  %s386_s9 = int_to_ptr.vmem [resolvable:$true] %s385_s9 }
  0x55   : > { %9865 = sst [smem:[#allocation39_spill]] %s6274_s6  ;;  %p6283_p12 = pnand %p4981_p2, %p6251_p0 }
  0x56   : > { %s9866_s0 = sld [smem:[#allocation172_spill]]  ;;  %s4645_s29 = sshll.u32 %s371_s15, 6 }
  0x57   : > { %s372_s30 = scalar_lea.sflag [#allocation3], %s371_s15  ;;  %s9868_s1 = smov 8  }
  0x58   : > { %s9869_s4 = smov 128   ;;  %s9870_s20 = smov 256  }
  0x59   : > { %4966 = dma.hbm_to_vmem [thread:$0]  (!%p6201_p6), %s6219_s25, 4096, %s428_s24, %s6210_s10, %s9870_s20, %s9869_s4, %s9868_s1  }
  0x5a   : > { %s4648_s22 = sshll.u32 %s6006_s18, 4  ;;  %s441_s21 = scalar_lea.vmem [#allocation8], %s4645_s29 }
  0x5b   : > { %s452_s12 = sshll.u32 %s441_s21, 4  ;;  %s9871_s14 = sand.u32 1, %s6010_s19   ;;  %s453_s12 = int_to_ptr.vmem [resolvable:$true] %s452_s12 }
  0x5c   : > { %s382_s26 = scalar_lea.hbm %s9866_s0, %s4640_s7  ;;  %s4865_s7 = sshll.u32 %s6002_s17, 3 }
  0x5d   : > { %s383_s23 = sshll.u32 %s382_s26, 4  ;;  %s447_s27 = sadd.s32 %s4865_s7, %s4648_s22  ;;  %s384_s23 = int_to_ptr.hbm [resolvable:$true] %s383_s23 }
  0x5e   : > { %4960 = dma.hbm_to_vmem [thread:$0]  (!%p6283_p12), %s384_s23, 2048, %s386_s9, %s372_s30, %s9870_s20, %s9869_s4, %s9868_s1  }
  0x5f   : > { %s4649_s26 = sshll.u32 %s447_s27, 3  ;;  %s438_s9 = scalar_lea.sflag [#allocation9], %s9871_s14 }
  0x60   : > { %s449_s15 = scalar_lea.hbm %s9561_s3, %s4649_s26  ;;  %s6021_s8 = smov 16  }
  0x61   : > { %s450_s6 = sshll.u32 %s449_s15, 4  ;;  %464 = sbr.rel (%p6161_p9) target bundleno = 2307 (0x903), region = 52  ;;  %s451_s6 = int_to_ptr.hbm [resolvable:$true] %s450_s6 }
  0x62   : > { %4969 = dma.hbm_to_vmem [thread:$0]  (!%p6283_p12), %s451_s6, 1024, %s453_s12, %s438_s9, %s9870_s20, %s9870_s20, %s6021_s8  }
  0x66   : > { %s6314_s25 = sand.u32 1, %s5986_s13  }
  0x67   : > { %s4651_s0 = sshll.u32 %s6314_s25, 7  ;;  %s467_s24 = scalar_lea.sflag [#allocation3], %s6314_s25 }
  0x68   : > { %s6320_s16 = scalar_lea.vmem [#allocation2], %s4651_s0 }
  0x69   : > { %5937 = dma.done.wait (%p6142_p3), %s467_s24, 2048  }
  0x6a   : > { %5939 = vsyncadd (%p6142_p3), %s467_s24, 4294965248  ;;  %s9873_s6 = sld [smem:[#allocation32_spill]] }
  0x6b   : > { %s9874_s14 = sld [smem:[#allocation27_spill]] }
  0x70   : > { %s476_s23 = sand.u32 1, %s9873_s6  }
  0x71   : > { %s478_s5 = sand.u32 1, %s9874_s14   ;;  %s477_s30 = scalar_lea.sflag [#allocation6], %s476_s23 }
  0x72   : > { %s4652_s29 = sshll.u32 %s478_s5, 8 }
  0x73   : > { %s6328_s1 = scalar_lea.vmem [#allocation5], %s4652_s29 }
  0x74   : > { %5941 = dma.done.wait (%p6148_p5), %s477_s30, 8192  }
  0x75   : > { %5943 = vsyncadd (%p6148_p5), %s477_s30, 4294959104  ;;  %s4654_s4 = sshll.u32 %s6314_s25, 6  ;;  %s6335_s20 = scalar_lea.vmem [#allocation7], %s4652_s29 }
  0x76   : > { %s497_s7 = scalar_lea.sflag [#allocation9], %s476_s23  ;;  %s6337_s22 = scalar_lea.vmem [#allocation8], %s4654_s4 }
  0x77   : > { %5945 = dma.done.wait (%p6142_p3), %s497_s7, 1024  }
  0x78   : > { %5947 = vsyncadd (%p6142_p3), %s497_s7, 4294966272 }
  0x79   : > { %5949 = dma.done.wait (%p72_p1), [#allocation9], 1024  }
  0x7a   : > { %5951 = vsyncadd (%p72_p1), [#allocation9], 4294966272 }
  0x7b   : > { %5953 = dma.done.wait (%p72_p1), [#allocation12], 2048  }
  0x7c   : > { %5955 = vsyncadd (%p72_p1), [#allocation12], 4294965248 }
  0x7d   : > { %5957 = dma.done.wait (%p72_p1), [#allocation15], 1024  }
  0x7e   : > { %5959 = vsyncadd (%p72_p1), [#allocation15], 4294966272  ;;  %v4873_v0 = vld [vmem:[#allocation10 + $0x38] sm:$0xff]  ;;  %v4872_v2 = vld [vmem:[#allocation10 + $0x30] sm:$0xff]  ;;  %s6022_s21 = smov 32   ;;  %s6023_s12 = smov 96  }
  0x7f   : > { %v4881_v1 = vld [vmem:[#allocation11 + $0x38] sm:$0xff]  ;;  %764 = vmatpush.bf16.xpose.msra.mxu0 %v4873_v0  ;;  %4900 = vmatpush.bf16.xpose.msra.mxu2 %v4873_v0  ;;  %v4880_v3 = vld [vmem:[#allocation11 + $0x30] sm:$0xff]  ;;  %v4871_v4 = vld [vmem:[#allocation10 + $0x28] sm:$0xff]  ;;  %s6024_s27 = smov 64   ;;  %vm9647_vm0 = vcmask 261120   ;;  %s4660_s26 = sshll.u32 %s6314_s25, 8 }
  0x80   : > { %877 = vmatpush.bf16.xpose.msra.mxu1 %v4881_v1  ;;  %4908 = vmatpush.bf16.xpose.msra.mxu3 %v4881_v1  ;;  %v4879_v5 = vld [vmem:[#allocation11 + $0x28] sm:$0xff]  ;;  %v4870_v6 = vld [vmem:[#allocation10 + $0x20] sm:$0xff]  ;;  %v4869_v8 = vld [vmem:[#allocation10 + $0x18] sm:$0xff]  ;;  %s9049_s15 = scalar_lea.vmem [#allocation17], %s4660_s26  ;;  %s9427_s9 = scalar_lea.vmem [#allocation16], %s4651_s0 }
  0x81   : > { %v4878_v7 = vld [vmem:[#allocation11 + $0x20] sm:$0xff]  ;;  %v4877_v9 = vld [vmem:[#allocation11 + $0x18] sm:$0xff]  ;;  %v4868_v10 = vld [vmem:[#allocation10 + $0x10] sm:$0xff]  ;;  %s10509_s8 = sld [smem:[#allocation30_spill]]  ;;  %s4361_s4 = scalar_lea.sflag [#allocation18], %s6314_s25 }
  0x82   : > { %v4876_v11 = vld [vmem:[#allocation11 + $0x10] sm:$0xff]  ;;  %v4867_v12 = vld [vmem:[#allocation10 + $0x8] sm:$0xff]  ;;  %v4866_v14 = vld [vmem:[#allocation10] sm:$0xff]  ;;  %s10512_s10 = sld [smem:[#allocation31_spill]] }
  0x83   : > { %v4875_v13 = vld [vmem:[#allocation11 + $0x8] sm:$0xff]  ;;  %v4874_v15 = vld [vmem:[#allocation11] sm:$0xff]  ;;  %v4889_v16 = vld [vmem:[#allocation13 + $0x38] sm:$0xff]  ;;  %s10514_s5 = sld [smem:[#allocation180_spill]] }
  0x84   : > { %v580_v17 = vld [vmem:[%s6320_s16] sm:$0xff]  ;;  %v581_v18 = vld [vmem:[%s6320_s16 + $0x8] sm:$0xff]  ;;  %v4888_v29 = vld [vmem:[#allocation13 + $0x30] sm:$0xff] }
  0x85   : > { %v588_v19 = vld [vmem:[%s6320_s16 + $0x40] sm:$0xff]  ;;  %v589_v20 = vld [vmem:[%s6320_s16 + $0x48] sm:$0xff]  ;;  %v596_v25 = vpack.c.bf16 %v581_v18, %v580_v17  ;;  %v582_v31 = vld [vmem:[%s6320_s16 + $0x10] sm:$0xff] }
  0x86   : > { %v604_v21 = vld [vmem:[%s6328_s1] sm:$0xff]  ;;  %v605_v22 = vld [vmem:[%s6328_s1 + $0x8] sm:$0xff]  ;;  %v600_v26 = vpack.c.bf16 %v589_v20, %v588_v19  ;;  %v583_v32 = vld [vmem:[%s6320_s16 + $0x18] sm:$0xff] }
  0x87   : > { %765 = vmatpush.bf16.xpose.msra.mxu0 %v4872_v2  ;;  %4901 = vmatpush.bf16.xpose.msra.mxu2 %v4872_v2  ;;  %v628_v23 = vld [vmem:[%s6328_s1 + $0xc0] sm:$0xff]  ;;  %v629_v24 = vld [vmem:[%s6328_s1 + $0xc8] sm:$0xff]  ;;  %v636_v27 = vpack.c.bf16 %v605_v22, %v604_v21  ;;  %v590_v33 = vld [vmem:[%s6320_s16 + $0x50] sm:$0xff]  ;;  %v597_v39 = vpack.c.bf16 %v583_v32, %v582_v31  ;;  %s4898_s24 = sshll.u32 %s10509_s8, 5 }
  0x88   : > { %878 = vmatpush.bf16.xpose.msra.mxu1 %v4880_v3  ;;  %4909 = vmatpush.bf16.xpose.msra.mxu3 %v4880_v3  ;;  %v648_v28 = vpack.c.bf16 %v629_v24, %v628_v23  ;;  %v4887_v30 = vld [vmem:[#allocation13 + $0x28] sm:$0xff]  ;;  %v591_v34 = vld [vmem:[%s6320_s16 + $0x58] sm:$0xff]  ;;  %v606_v35 = vld [vmem:[%s6328_s1 + $0x10] sm:$0xff] }
  0x89   : > { %v607_v36 = vld [vmem:[%s6328_s1 + $0x18] sm:$0xff]  ;;  %v630_v37 = vld [vmem:[%s6328_s1 + $0xd0] sm:$0xff]  ;;  %v601_v40 = vpack.c.bf16 %v591_v34, %v590_v33  ;;  %v4886_v43 = vld [vmem:[#allocation13 + $0x20] sm:$0xff] }
  0x8a   : > { %v631_v38 = vld [vmem:[%s6328_s1 + $0xd8] sm:$0xff]  ;;  %v637_v41 = vpack.c.bf16 %v607_v36, %v606_v35  ;;  %v592_v45 = vld [vmem:[%s6320_s16 + $0x60] sm:$0xff]  ;;  %v593_v46 = vld [vmem:[%s6320_s16 + $0x68] sm:$0xff] }
  0x8b   : > { %v649_v42 = vpack.c.bf16 %v631_v38, %v630_v37  ;;  %v4885_v44 = vld [vmem:[#allocation13 + $0x18] sm:$0xff]  ;;  %v608_v47 = vld [vmem:[%s6328_s1 + $0x20] sm:$0xff]  ;;  %v585_v49 = vld [vmem:[%s6320_s16 + $0x28] sm:$0xff]  ;;  %v602_v53 = vpack.c.bf16 %v593_v46, %v592_v45 }
  0x8c   : > { %v584_v48 = vld [vmem:[%s6320_s16 + $0x20] sm:$0xff]  ;;  %v609_v50 = vld [vmem:[%s6328_s1 + $0x28] sm:$0xff]  ;;  %v4884_v57 = vld [vmem:[#allocation13 + $0x10] sm:$0xff] }
  0x8d   : > { %v632_v51 = vld [vmem:[%s6328_s1 + $0xe0] sm:$0xff]  ;;  %v633_v52 = vld [vmem:[%s6328_s1 + $0xe8] sm:$0xff]  ;;  %v598_v54 = vpack.c.bf16 %v585_v49, %v584_v48  ;;  %v638_v55 = vpack.c.bf16 %v609_v50, %v608_v47  ;;  %v594_v59 = vld [vmem:[%s6320_s16 + $0x70] sm:$0xff] }
  0x8e   : > { %v650_v56 = vpack.c.bf16 %v633_v52, %v632_v51  ;;  %v4883_v58 = vld [vmem:[#allocation13 + $0x8] sm:$0xff]  ;;  %v595_v60 = vld [vmem:[%s6320_s16 + $0x78] sm:$0xff]  ;;  %v610_v61 = vld [vmem:[%s6328_s1 + $0x30] sm:$0xff] }
  0x8f   : > { %766 = vmatpush.bf16.xpose.msra.mxu0 %v4871_v4  ;;  %4902 = vmatpush.bf16.xpose.msra.mxu2 %v4871_v4  ;;  %v611_v62 = vld [vmem:[%s6328_s1 + $0x38] sm:$0xff]  ;;  %v634_v63 = vld [vmem:[%s6328_s1 + $0xf0] sm:$0xff]  ;;  %v603_v1 = vpack.c.bf16 %v595_v60, %v594_v59  ;;  %v4882_v4 = vld [vmem:[#allocation13] sm:$0xff] }
  0x90   : > { %879 = vmatpush.bf16.xpose.msra.mxu1 %v4879_v5  ;;  %4910 = vmatpush.bf16.xpose.msra.mxu3 %v4879_v5  ;;  %v635_v0 = vld [vmem:[%s6328_s1 + $0xf8] sm:$0xff]  ;;  %v639_v2 = vpack.c.bf16 %v611_v62, %v610_v61  ;;  %v586_v5 = vld [vmem:[%s6320_s16 + $0x30] sm:$0xff]  ;;  %v656_v20 = vld [vmem:[%s6335_s20 + $0x20] sm:$0xff] }
  0x91   : > { %v651_v3 = vpack.c.bf16 %v635_v0, %v634_v63  ;;  %v615_v17 = vld [vmem:[%s6328_s1 + $0x58] sm:$0xff]  ;;  %v657_v21 = vld [vmem:[%s6335_s20 + $0x28] sm:$0xff]  ;;  %v616_v22 = vld [vmem:[%s6328_s1 + $0x60] sm:$0xff] }
  0x92   : > { %v617_v23 = vld [vmem:[%s6328_s1 + $0x68] sm:$0xff]  ;;  %v686_v24 = vpack.c.bf16 %v657_v21, %v656_v20  ;;  %v660_v32 = vld [vmem:[%s6335_s20 + $0x40] sm:$0xff]  ;;  %v662_v46 = vld [vmem:[%s6335_s20 + $0x50] sm:$0xff] }
  0x93   : > { %v661_v33 = vld [vmem:[%s6335_s20 + $0x48] sm:$0xff]  ;;  %v620_v34 = vld [vmem:[%s6328_s1 + $0x80] sm:$0xff]  ;;  %v663_v47 = vld [vmem:[%s6335_s20 + $0x58] sm:$0xff] }
  0x94   : > { %v621_v35 = vld [vmem:[%s6328_s1 + $0x88] sm:$0xff]  ;;  %v688_v36 = vpack.c.bf16 %v661_v33, %v660_v32  ;;  %v622_v48 = vld [vmem:[%s6328_s1 + $0x90] sm:$0xff]  ;;  %v623_v49 = vld [vmem:[%s6328_s1 + $0x98] sm:$0xff]  ;;  %v689_v52 = vpack.c.bf16 %v663_v47, %v662_v46 }
  0x95   : > { %v644_v38 = vpack.c.bf16 %v621_v35, %v620_v34  ;;  %v664_v62 = vld [vmem:[%s6335_s20 + $0x60] sm:$0xff]  ;;  %v665_v63 = vld [vmem:[%s6335_s20 + $0x68] sm:$0xff] }
  0x96   : > { %v624_v0 = vld [vmem:[%s6328_s1 + $0xa0] sm:$0xff] }
  0x97   : > { %767 = vmatpush.bf16.xpose.msra.mxu0 %v4870_v6  ;;  %4903 = vmatpush.bf16.xpose.msra.mxu2 %v4870_v6  ;;  %v587_v6 = vld [vmem:[%s6320_s16 + $0x38] sm:$0xff]  ;;  %s4860_s16 = sshll.u32 %s10512_s10, 6 }
  0x98   : > { %880 = vmatpush.bf16.xpose.msra.mxu1 %v4878_v7  ;;  %4911 = vmatpush.bf16.xpose.msra.mxu3 %v4878_v7  ;;  %v599_v7 = vpack.c.bf16 %v587_v6, %v586_v5  ;;  %s4392_s6 = sadd.s32 %s4898_s24, %s4860_s16 }
  0x99   : > { %s4861_s14 = sshll.u32 %s4392_s6, 3 }
  0x9a   : > { %s4394_s29 = scalar_lea.hbm %s10514_s5, %s4861_s14 }
  0x9b   : > { %s4397_s30 = sshll.u32 %s4394_s29, 4  ;;  %s4398_s30 = int_to_ptr.hbm [resolvable:$true] %s4397_s30 }
  0x9f   : > { %768 = vmatpush.bf16.xpose.msra.mxu0 %v4869_v8  ;;  %4904 = vmatpush.bf16.xpose.msra.mxu2 %v4869_v8  ;;  %v652_v8 = vld [vmem:[%s6335_s20] sm:$0xff] }
  0xa0   : > { %881 = vmatpush.bf16.xpose.msra.mxu1 %v4877_v9  ;;  %4912 = vmatpush.bf16.xpose.msra.mxu3 %v4877_v9  ;;  %v653_v9 = vld [vmem:[%s6335_s20 + $0x8] sm:$0xff] }
  0xa7   : > { %769 = vmatpush.bf16.xpose.msra.mxu0 %v4868_v10  ;;  %4905 = vmatpush.bf16.xpose.msra.mxu2 %v4868_v10  ;;  %v612_v10 = vld [vmem:[%s6328_s1 + $0x40] sm:$0xff] }
  0xa8   : > { %882 = vmatpush.bf16.xpose.msra.mxu1 %v4876_v11  ;;  %4913 = vmatpush.bf16.xpose.msra.mxu3 %v4876_v11  ;;  %v613_v11 = vld [vmem:[%s6328_s1 + $0x48] sm:$0xff] }
  0xaf   : > { %770 = vmatpush.bf16.xpose.msra.mxu0 %v4867_v12  ;;  %4906 = vmatpush.bf16.xpose.msra.mxu2 %v4867_v12  ;;  %v684_v12 = vpack.c.bf16 %v653_v9, %v652_v8 }
  0xb0   : > { %883 = vmatpush.bf16.xpose.msra.mxu1 %v4875_v13  ;;  %4914 = vmatpush.bf16.xpose.msra.mxu3 %v4875_v13  ;;  %v640_v13 = vpack.c.bf16 %v613_v11, %v612_v10 }
  0xb7   : > { %771 = vmatpush.bf16.xpose.msra.mxu0 %v4866_v14  ;;  %4907 = vmatpush.bf16.xpose.msra.mxu2 %v4866_v14  ;;  %v654_v14 = vld [vmem:[%s6335_s20 + $0x10] sm:$0xff] }
  0xb8   : > { %884 = vmatpush.bf16.xpose.msra.mxu1 %v4874_v15  ;;  %4915 = vmatpush.bf16.xpose.msra.mxu3 %v4874_v15  ;;  %v655_v15 = vld [vmem:[%s6335_s20 + $0x18] sm:$0xff] }
  0xb9   : > { %v685_v18 = vpack.c.bf16 %v655_v15, %v654_v14  ;;  %v626_v14 = vld [vmem:[%s6328_s1 + $0xb0] sm:$0xff]  ;;  %v627_v15 = vld [vmem:[%s6328_s1 + $0xb8] sm:$0xff] }
  0xba   : > { %v647_v20 = vpack.c.bf16 %v627_v15, %v626_v14 }
  0xbe   : > { %772 = vmatmul.bf16.vlgmr.msra.gmra.mxu0 %v596_v25  ;;  %792 = vmatmul.bf16.vlgmr.msra.gmra.mxu2 %v600_v26  ;;  %v642_v25 = vpack.c.bf16 %v617_v23, %v616_v22  ;;  %v658_v26 = vld [vmem:[%s6335_s20 + $0x30] sm:$0xff] }
  0xbf   : > { %1030 = vmatpush.bf16.xpose.msrb.mxu2 %v4889_v16  ;;  %885 = vmatmul.bf16.vlgmr.msra.gmra.mxu1 %v636_v27  ;;  %v614_v16 = vld [vmem:[%s6328_s1 + $0x50] sm:$0xff]  ;;  %v659_v27 = vld [vmem:[%s6335_s20 + $0x38] sm:$0xff] }
  0xc0   : > { %945 = vmatmul.bf16.vlgmr.msra.gmra.mxu3 %v648_v28  ;;  %v641_v19 = vpack.c.bf16 %v615_v17, %v614_v16  ;;  %v618_v28 = vld [vmem:[%s6328_s1 + $0x70] sm:$0xff] }
  0xc7   : > { %1031 = vmatpush.bf16.xpose.msrb.mxu2 %v4888_v29  ;;  %v619_v29 = vld [vmem:[%s6328_s1 + $0x78] sm:$0xff] }
  0xc8   : > { %v643_v31 = vpack.c.bf16 %v619_v29, %v618_v28  ;;  %v669_v28 = vld [vmem:[%s6335_s20 + $0x88] sm:$0xff] }
  0xce   : > { %777 = vmatmul.bf16.gmra.mxu0 %v597_v39  ;;  %797 = vmatmul.bf16.gmra.mxu2 %v601_v40 }
  0xcf   : > { %1032 = vmatpush.bf16.xpose.msrb.mxu2 %v4887_v30  ;;  %890 = vmatmul.bf16.gmra.mxu1 %v637_v41  ;;  %v687_v30 = vpack.c.bf16 %v659_v27, %v658_v26  ;;  %v668_v27 = vld [vmem:[%s6335_s20 + $0x80] sm:$0xff] }
  0xd0   : > { %950 = vmatmul.bf16.gmra.mxu3 %v649_v42  ;;  %v692_v32 = vpack.c.bf16 %v669_v28, %v668_v27 }
  0xd7   : > { %1033 = vmatpush.bf16.xpose.msrb.mxu2 %v4886_v43 }
  0xde   : > { %802 = vmatmul.bf16.gmra.mxu2 %v602_v53  ;;  %782 = vmatmul.bf16.gmra.mxu0 %v598_v54  ;;  %v645_v54 = vpack.c.bf16 %v623_v49, %v622_v48 }
  0xdf   : > { %1034 = vmatpush.bf16.xpose.msrb.mxu2 %v4885_v44  ;;  %895 = vmatmul.bf16.gmra.mxu1 %v638_v55 }
  0xe0   : > { %955 = vmatmul.bf16.gmra.mxu3 %v650_v56 }
  0xe7   : > { %1035 = vmatpush.bf16.xpose.msrb.mxu2 %v4884_v57 }
  0xee   : > { %807 = vmatmul.bf16.gmra.mxu2 %v603_v1  ;;  %787 = vmatmul.bf16.gmra.mxu0 %v599_v7  ;;  %v625_v1 = vld [vmem:[%s6328_s1 + $0xa8] sm:$0xff]  ;;  %s4395_s1 = sshll.u32 %s9049_s15, 4  ;;  %s4396_s1 = int_to_ptr.vmem [resolvable:$true] %s4395_s1 }
  0xef   : > { %1036 = vmatpush.bf16.xpose.msrb.mxu2 %v4883_v58  ;;  %900 = vmatmul.bf16.gmra.mxu1 %v639_v2  ;;  %v646_v5 = vpack.c.bf16 %v625_v1, %v624_v0 }
  0xf0   : > { %960 = vmatmul.bf16.gmra.mxu3 %v651_v3 }
  0xf7   : > { %1037 = vmatpush.bf16.xpose.msrb.mxu2 %v4882_v4  ;;  %v690_v4 = vpack.c.bf16 %v665_v63, %v664_v62 }
  0xfe   : > { %1038 = vmatmul.bf16.vlgmr.msrb.gmra.mxu2 %v684_v12  ;;  %v666_v12 = vld [vmem:[%s6335_s20 + $0x70] sm:$0xff] }
  0xff   : > { %905 = vmatmul.bf16.gmra.mxu1 %v640_v13  ;;  %v667_v13 = vld [vmem:[%s6335_s20 + $0x78] sm:$0xff] }
 0x10e   : > { %1043 = vmatmul.bf16.gmra.mxu2 %v685_v18  ;;  %v691_v18 = vpack.c.bf16 %v667_v13, %v666_v12 }
 0x10f   : > { %910 = vmatmul.bf16.gmra.mxu1 %v641_v19 }
 0x11e   : > { %1048 = vmatmul.bf16.gmra.mxu2 %v686_v24 }
 0x11f   : > { %915 = vmatmul.bf16.gmra.mxu1 %v642_v25 }
 0x12e   : > { %1053 = vmatmul.bf16.gmra.mxu2 %v687_v30 }
 0x12f   : > { %920 = vmatmul.bf16.gmra.mxu1 %v643_v31 }
 0x13b   : > { %v773_v37 = vpop.f32.mrf.mxu0 }
 0x13c   : > { %v886_v39 = vpop.f32.mrf.mxu1 }
 0x13e   : > { %1058 = vmatmul.bf16.gmra.mxu2 %v688_v36 }
 0x13f   : > { %925 = vmatmul.bf16.gmra.mxu1 %v644_v38 }
 0x141   : > { %v793_v40 = vpop.f32.mrf.mxu2 }
 0x143   : > { %v946_v41 = vpop.f32.mrf.mxu3  ;;  %v775_v42 = vpop.f32.mrf.mxu0 }
 0x144   : > { %v6407_v43 = vpack.c.bf16 %v775_v42, %v773_v37  ;;  %v888_v44 = vpop.f32.mrf.mxu1  ;;  %v670_v42 = vld [vmem:[%s6335_s20 + $0x90] sm:$0xff] }
 0x145   : > { %v6409_v45 = vpack.c.bf16 %v888_v44, %v886_v39  ;;  %v671_v44 = vld [vmem:[%s6335_s20 + $0x98] sm:$0xff] }
 0x146   : > { %3228 = vrot.lane.b32.xlu2 %v6407_v43, %s6022_s21  ;;  %1828 = vrot.lane.b32.xlu1 %v6407_v43, %s6023_s12  ;;  %v693_v47 = vpack.c.bf16 %v671_v44, %v670_v42 }
 0x147   : > { %1860 = vrot.lane.b32.xlu0 %v6409_v45, %s6023_s12 }
 0x149   : > { %v795_v50 = vpop.f32.mrf.mxu2 }
 0x14a   : > { %v6439_v6 = vpack.c.bf16 %v795_v50, %v793_v40 }
 0x14b   : > { %v948_v51 = vpop.f32.mrf.mxu3  ;;  %v778_v53 = vpop.f32.mrf.mxu0 }
 0x14c   : > { %v891_v55 = vpop.f32.mrf.mxu1  ;;  %v6425_v58 = vpack.c.bf16 %v948_v51, %v946_v41  ;;  %9876 = vst [vmem:[#allocation40_spill] sm:$0xff] %v6439_v6 }
 0x14e   : > { %1063 = vmatmul.bf16.gmra.mxu2 %v689_v52  ;;  %2560 = vrot.lane.b32.xlu1 %v6409_v45, %s6024_s27 }
 0x14f   : > { %930 = vmatmul.bf16.gmra.mxu1 %v645_v54  ;;  %2544 = vrot.lane.b32.xlu0 %v6407_v43, %s6024_s27  ;;  %v1293_v54 = vsel %vm9647_vm0, %v6425_v58, 0 }
 0x151   : > { %v798_v56 = vpop.f32.mrf.mxu2 }
 0x153   : > { %v951_v57 = vpop.f32.mrf.mxu3  ;;  %v780_v59 = vpop.f32.mrf.mxu0 }
 0x154   : > { %v6427_v60 = vpack.c.bf16 %v780_v59, %v778_v53  ;;  %v893_v61 = vpop.f32.mrf.mxu1 }
 0x155   : > { %v6441_v7 = vpack.c.bf16 %v893_v61, %v891_v55  ;;  %v672_v55 = vld [vmem:[%s6335_s20 + $0xa0] sm:$0xff] }
 0x156   : > { %3244 = vrot.lane.b32.xlu1 %v6409_v45, %s6022_s21  ;;  %1830 = vrot.lane.b32.xlu2 %v6427_v60, %s6023_s12 }
 0x157   : > { %1884 = vrot.lane.b32.xlu0 %v6425_v58, %s6023_s12 }
 0x159   : > { %v800_v2 = vpop.f32.mrf.mxu2 }
 0x15a   : > { %v6461_v19 = vpack.c.bf16 %v800_v2, %v798_v56  ;;  %v673_v56 = vld [vmem:[%s6335_s20 + $0xa8] sm:$0xff] }
 0x15b   : > { %v953_v3 = vpop.f32.mrf.mxu3  ;;  %v783_v22 = vpop.f32.mrf.mxu0  ;;  %v694_v61 = vpack.c.bf16 %v673_v56, %v672_v55 }
 0x15c   : > { %v896_v8 = vpop.f32.mrf.mxu1  ;;  %9877 = vst [vmem:[#allocation41_spill] sm:$0xff] %v6461_v19  ;;  %v1212_v25 = vpack.c.bf16 %v953_v3, %v951_v57  ;;  %v674_v3 = vld [vmem:[%s6335_s20 + $0xb0] sm:$0xff] }
 0x15e   : > { %1068 = vmatmul.bf16.gmra.mxu2 %v690_v4  ;;  %1836 = vrot.lane.b32.xlu1 %v6439_v6, %s6023_s12  ;;  %v1296_v49 = vsel %vm9647_vm0, %v1212_v25, 0  ;;  %v675_v4 = vld [vmem:[%s6335_s20 + $0xb8] sm:$0xff] }
 0x15f   : > { %935 = vmatmul.bf16.gmra.mxu1 %v646_v5  ;;  %2552 = vrot.lane.b32.xlu0 %v6439_v6, %s6024_s27 }
 0x160   : > { %2562 = vrot.lane.b32.xlu2 %v6441_v7, %s6024_s27 }
 0x161   : > { %v6449_v9 = vpop.f32.mrf.mxu2 }
 0x163   : > { %v956_v10 = vpop.f32.mrf.mxu3  ;;  %v785_v29 = vpop.f32.mrf.mxu0 }
 0x164   : > { %v898_v11 = vpop.f32.mrf.mxu1  ;;  %v6478_v33 = vpack.c.bf16 %v785_v29, %v783_v22 }
 0x165   : > { %v6484_v36 = vpack.c.bf16 %v898_v11, %v896_v8 }
 0x166   : > { %2584 = vrot.lane.b32.xlu1 %v6425_v58, %s6024_s27  ;;  %9878 = vst [vmem:[#allocation42_spill] sm:$0xff] %v6478_v33 }
 0x167   : > { %3268 = vrot.lane.b32.xlu0 %v6425_v58, %s6022_s21 }
 0x168   : > { %2546 = vrot.lane.b32.xlu2 %v6427_v60, %s6024_s27 }
 0x169   : > { %v805_v16 = vpop.f32.mrf.mxu2 }
 0x16a   : > { %v6511_v52 = vpack.c.bf16 %v805_v16, %v6449_v9  ;;  %v695_v9 = vpack.c.bf16 %v675_v4, %v674_v3 }
 0x16b   : > { %v958_v17 = vpop.f32.mrf.mxu3  ;;  %v788_v57 = vpop.f32.mrf.mxu0 }
 0x16c   : > { %v901_v21 = vpop.f32.mrf.mxu1  ;;  %v1213_v38 = vpack.c.bf16 %v958_v17, %v956_v10  ;;  %9879 = vst [vmem:[#allocation43_spill] sm:$0xff] %v6511_v52 }
 0x16e   : > { %1073 = vmatmul.bf16.gmra.mxu2 %v691_v18  ;;  %1862 = vrot.lane.b32.xlu1 %v6441_v7, %s6023_s12  ;;  %v1299_v40 = vsel %vm9647_vm0, %v1213_v38, 0 }
 0x16f   : > { %940 = vmatmul.bf16.gmra.mxu1 %v647_v20  ;;  %1838 = vrot.lane.b32.xlu0 %v6461_v19, %s6023_s12  ;;  %v676_v20 = vld [vmem:[%s6335_s20 + $0xc0] sm:$0xff] }
 0x170   : > { %3230 = vrot.lane.b32.xlu2 %v6427_v60, %s6022_s21 }
 0x171   : > { %v6469_v23 = vpop.f32.mrf.mxu2 }
 0x173   : > { %v961_v24 = vpop.f32.mrf.mxu3  ;;  %v790_v63 = vpop.f32.mrf.mxu0 }
 0x174   : > { %v903_v26 = vpop.f32.mrf.mxu1  ;;  %v6535_v2 = vpack.c.bf16 %v790_v63, %v788_v57  ;;  %v680_v63 = vld [vmem:[%s6335_s20 + $0xe0] sm:$0xff] }
 0x175   : > { %v6513_v53 = vpack.c.bf16 %v903_v26, %v901_v21  ;;  %v677_v21 = vld [vmem:[%s6335_s20 + $0xc8] sm:$0xff] }
 0x176   : > { %3246 = vrot.lane.b32.xlu1 %v6441_v7, %s6022_s21  ;;  %9881 = vst [vmem:[#allocation45_spill] sm:$0xff] %v6535_v2  ;;  %v696_v26 = vpack.c.bf16 %v677_v21, %v676_v20 }
 0x177   : > { %2554 = vrot.lane.b32.xlu0 %v6461_v19, %s6024_s27 }
 0x178   : > { %1886 = vrot.lane.b32.xlu2 %v1212_v25, %s6023_s12 }
 0x179   : > { %v810_v30 = vpop.f32.mrf.mxu2 }
 0x17a   : > { %v6533_v0 = vpack.c.bf16 %v810_v30, %v6469_v23 }
 0x17b   : > { %v963_v31 = vpop.f32.mrf.mxu3 }
 0x17c   : > { %v6480_v34 = vpack.c.bf16 %v963_v31, %v961_v24  ;;  %v6482_v35 = vpop.f32.mrf.mxu1  ;;  %9880 = vst [vmem:[#allocation44_spill] sm:$0xff] %v6533_v0 }
 0x17e   : > { %v1302_v37 = vsel %vm9647_vm0, %v6480_v34, 0  ;;  %1078 = vmatmul.bf16.gmra.mxu2 %v692_v32  ;;  %2564 = vrot.lane.b32.xlu1 %v6484_v36, %s6024_s27 }
 0x17f   : > { %1353 = vmatpush.bf16.xpose.msrb.mxu0 %v1302_v37  ;;  %1832 = vrot.lane.b32.xlu0 %v6478_v33, %s6023_s12 }
 0x180   : > { %2586 = vrot.lane.b32.xlu2 %v1212_v25, %s6024_s27 }
 0x181   : > { %v6493_v39 = vpop.f32.mrf.mxu2 }
 0x184   : > { %v908_v41 = vpop.f32.mrf.mxu1 }
 0x185   : > { %v1203_v17 = vpack.c.bf16 %v908_v41, %v6482_v35  ;;  %v679_v41 = vld [vmem:[%s6335_s20 + $0xd8] sm:$0xff] }
 0x186   : > { %2548 = vrot.lane.b32.xlu1 %v6478_v33, %s6024_s27 }
 0x187   : > { %1354 = vmatpush.bf16.xpose.msrb.mxu0 %v1299_v40  ;;  %3248 = vrot.lane.b32.xlu0 %v6484_v36, %s6022_s21  ;;  %v678_v40 = vld [vmem:[%s6335_s20 + $0xd0] sm:$0xff] }
 0x188   : > { %3270 = vrot.lane.b32.xlu2 %v1212_v25, %s6022_s21 }
 0x189   : > { %v6503_v46 = vpop.f32.mrf.mxu2 }
 0x18a   : > { %v6587_v29 = vpack.c.bf16 %v6503_v46, %v6493_v39 }
 0x18c   : > { %v911_v48 = vpop.f32.mrf.mxu1  ;;  %9884 = vst [vmem:[#allocation48_spill] sm:$0xff] %v6587_v29 }
 0x18e   : > { %1083 = vmatmul.bf16.gmra.mxu2 %v693_v47  ;;  %1888 = vrot.lane.b32.xlu1 %v1213_v38, %s6023_s12 }
 0x18f   : > { %1355 = vmatpush.bf16.xpose.msrb.mxu0 %v1296_v49  ;;  %2588 = vrot.lane.b32.xlu0 %v1213_v38, %s6024_s27 }
 0x190   : > { %1864 = vrot.lane.b32.xlu2 %v6484_v36, %s6023_s12 }
 0x191   : > { %v1044_v50 = vpop.f32.mrf.mxu2 }
 0x194   : > { %v913_v51 = vpop.f32.mrf.mxu1 }
 0x195   : > { %v6549_v11 = vpack.c.bf16 %v913_v51, %v911_v48  ;;  %v697_v48 = vpack.c.bf16 %v679_v41, %v678_v40 }
 0x196   : > { %1840 = vrot.lane.b32.xlu1 %v6511_v52, %s6023_s12 }
 0x197   : > { %1356 = vmatpush.bf16.xpose.msrb.mxu0 %v1293_v54  ;;  %1866 = vrot.lane.b32.xlu0 %v6513_v53, %s6023_s12  ;;  %v1272_v39 = vsel %vm9647_vm0, %v6549_v11, 0 }
 0x198   : > { %3272 = vrot.lane.b32.xlu2 %v1213_v38, %s6022_s21 }
 0x199   : > { %v1046_v59 = vpop.f32.mrf.mxu2 }
 0x19a   : > { %v6561_v14 = vpack.c.bf16 %v1046_v59, %v1044_v50  ;;  %v1269_v50 = vsel %vm9647_vm0, %v1203_v17, 0 }
 0x19c   : > { %v916_v62 = vpop.f32.mrf.mxu1  ;;  %9883 = vst [vmem:[#allocation47_spill] sm:$0xff] %v6561_v14 }
 0x19e   : > { %1088 = vmatmul.bf16.gmra.mxu2 %v694_v61  ;;  %2556 = vrot.lane.b32.xlu1 %v6511_v52, %s6024_s27 }
 0x19f   : > { %1890 = vrot.lane.b32.xlu0 %v6480_v34, %s6023_s12 }
 0x1a0   : > { %2566 = vrot.lane.b32.xlu2 %v6513_v53, %s6024_s27  ;;  %v6543_v5 = vpop.permute.xlu2 %3228 }
 0x1a1   : > { %v6530_v58 = vpop.f32.mrf.mxu2  ;;  %9882 = vst [vmem:[#allocation46_spill] sm:$0xff] %v6543_v5 }
 0x1a4   : > { %v918_v1 = vpop.f32.mrf.mxu1 }
 0x1a5   : > { %v6583_v27 = vpack.c.bf16 %v918_v1, %v916_v62  ;;  %v1266_v62 = vsel %vm9647_vm0, %v6513_v53, 0  ;;  %v681_v1 = vld [vmem:[%s6335_s20 + $0xe8] sm:$0xff] }
 0x1a6   : > { %1834 = vrot.lane.b32.xlu1 %v6535_v2, %s6023_s12 }
 0x1a7   : > { %1842 = vrot.lane.b32.xlu0 %v6533_v0, %s6023_s12  ;;  %v1275_v30 = vsel %vm9647_vm0, %v6583_v27, 0 }
 0x1a8   : > { %2550 = vrot.lane.b32.xlu2 %v6535_v2, %s6024_s27 }
 0x1a9   : > { %v6547_v8 = vpop.f32.mrf.mxu2 }
 0x1aa   : > { %v6634_v57 = vpack.c.bf16 %v6547_v8, %v6530_v58 }
 0x1ac   : > { %v921_v10 = vpop.f32.mrf.mxu1  ;;  %9887 = vst [vmem:[#allocation51_spill] sm:$0xff] %v6634_v57 }
 0x1ae   : > { %1093 = vmatmul.bf16.gmra.mxu2 %v695_v9  ;;  %3250 = vrot.lane.b32.xlu1 %v6513_v53, %s6022_s21  ;;  %v698_v9 = vpack.c.bf16 %v681_v1, %v680_v63 }
 0x1af   : > { %3254 = vrot.lane.b32.xlu0 %v6549_v11, %s6022_s21 }
 0x1b0   : > { %2558 = vrot.lane.b32.xlu2 %v6533_v0, %s6024_s27  ;;  %v6557_v12 = vpop.permute.xlu2 %1830 }
 0x1b1   : > { %v6559_v13 = vpop.f32.mrf.mxu2 }
 0x1b4   : > { %v923_v15 = vpop.f32.mrf.mxu1 }
 0x1b5   : > { %v6563_v16 = vpack.c.bf16 %v923_v15, %v921_v10  ;;  %v1263_v10 = vsel %vm9647_vm0, %v6484_v36, 0  ;;  %v1260_v36 = vsel %vm9647_vm0, %v6441_v7, 0 }
 0x1b6   : > { %2590 = vrot.lane.b32.xlu1 %v6480_v34, %s6024_s27 }
 0x1b7   : > { %v1278_v18 = vsel %vm9647_vm0, %v6563_v16, 0  ;;  %2400 = vrot.lane.b32.xlu0 %v6561_v14, %s6023_s12 }
 0x1b8   : > { %3252 = vrot.lane.b32.xlu2 %v1203_v17, %s6022_s21  ;;  %1304 = vmatpush.bf16.xpose.msrb.mxu3 %v1278_v18  ;;  %v6575_v22 = vpop.permute.xlu1 %1828 }
 0x1b9   : > { %v6577_v23 = vpop.permute.xlu0 %1860  ;;  %v6579_v24 = vpop.f32.mrf.mxu2 }
 0x1ba   : > { %v6581_v25 = vpop.permute.xlu2 %2562 }
 0x1bc   : > { %v926_v28 = vpop.f32.mrf.mxu1 }
 0x1be   : > { %1098 = vmatmul.bf16.gmra.mxu2 %v696_v26  ;;  %3274 = vrot.lane.b32.xlu1 %v6480_v34, %s6022_s21  ;;  %v682_v26 = vld [vmem:[%s6335_s20 + $0xf0] sm:$0xff] }
 0x1bf   : > { %1874 = vrot.lane.b32.xlu0 %v6563_v16, %s6023_s12 }
 0x1c0   : > { %2398 = vrot.lane.b32.xlu2 %v6587_v29, %s6023_s12  ;;  %1305 = vmatpush.bf16.xpose.msrb.mxu3 %v1275_v30  ;;  %v6597_v31 = vpop.permute.xlu1 %2560 }
 0x1c1   : > { %v6599_v32 = vpop.permute.xlu0 %2544  ;;  %v6601_v35 = vpop.f32.mrf.mxu2 }
 0x1c2   : > { %v6603_v37 = vpop.permute.xlu2 %2546 }
 0x1c4   : > { %v928_v38 = vpop.f32.mrf.mxu1 }
 0x1c5   : > { %v6605_v34 = vpack.c.bf16 %v928_v38, %v926_v28  ;;  %v683_v28 = vld [vmem:[%s6335_s20 + $0xf8] sm:$0xff]  ;;  %s5850_s20 = sshra.s32 %s4398_s30, 4  ;;  %s5851_s20 = int_to_ptr.hbm [resolvable:$true] %s5850_s20 }
 0x1c6   : > { %1868 = vrot.lane.b32.xlu1 %v1203_v17, %s6023_s12  ;;  %s5852_s7 = scalar_lea.hbm %s5851_s20, 256  ;;  %p5857_p9 = scmp.lt.s32.totalorder %s5851_s20, %s10514_s5 }
 0x1c7   : > { %2576 = vrot.lane.b32.xlu0 %v6605_v34, %s6024_s27  ;;  %p5853_p1 = scmp.ne.s32.totalorder %s5851_s20, %s5852_s7 }
 0x1c8   : > { %1870 = vrot.lane.b32.xlu2 %v6549_v11, %s6023_s12  ;;  %1306 = vmatpush.bf16.xpose.msrb.mxu3 %v1272_v39  ;;  %v6616_v42 = vpop.permute.xlu1 %3244 }
 0x1c9   : > { %v6618_v44 = vpop.permute.xlu0 %1884  ;;  %v1061_v46 = vpop.f32.mrf.mxu2  ;;  %p5854_p3 = pnand %p5853_p1, %p6257_p4 }
 0x1ca   : > { %v6620_v47 = vpop.permute.xlu2 %3230  ;;  %v6685_v41 = vpack.c.bf16 %v1061_v46, %v6601_v35 }
 0x1cb   : > { %9885 = vst [vmem:[#allocation49_spill] sm:$0xff] %v6620_v47  ;;  %p5855_p5 = pneg %p5854_p3 }
 0x1cc   : > { %v931_v49 = vpop.f32.mrf.mxu1  ;;  %9889 = vst [vmem:[#allocation53_spill] sm:$0xff] %v6685_v41 }
 0x1ce   : > { %1103 = vmatmul.bf16.gmra.mxu2 %v697_v48  ;;  %2568 = vrot.lane.b32.xlu1 %v1203_v17, %s6024_s27  ;;  %v1257_v48 = vsel %vm9647_vm0, %v6409_v45, 0 }
 0x1d0   : > { %3256 = vrot.lane.b32.xlu2 %v6583_v27, %s6022_s21  ;;  %1307 = vmatpush.bf16.xpose.msrb.mxu3 %v1269_v50  ;;  %v6626_v51 = vpop.permute.xlu1 %1836 }
 0x1d1   : > { %v6628_v54 = vpop.permute.xlu0 %2552  ;;  %v1064_v55 = vpop.f32.mrf.mxu2 }
 0x1d2   : > { %9886 = vst [vmem:[#allocation50_spill] sm:$0xff] %v6628_v54  ;;  %v6630_v56 = vpop.permute.xlu2 %1886 }
 0x1d4   : > { %v933_v59 = vpop.f32.mrf.mxu1 }
 0x1d5   : > { %v6636_v61 = vpack.c.bf16 %v933_v59, %v931_v49 }
 0x1d6   : > { %2570 = vrot.lane.b32.xlu1 %v6549_v11, %s6024_s27 }
 0x1d7   : > { %1878 = vrot.lane.b32.xlu0 %v6636_v61, %s6023_s12 }
 0x1d8   : > { %2402 = vrot.lane.b32.xlu2 %v6634_v57, %s6023_s12  ;;  %1308 = vmatpush.bf16.xpose.msrb.mxu3 %v1266_v62  ;;  %v6648_v58 = vpop.permute.xlu1 %2584 }
 0x1d9   : > { %v6650_v3 = vpop.permute.xlu0 %3268  ;;  %v1066_v4 = vpop.f32.mrf.mxu2 }
 0x1da   : > { %v6652_v8 = vpop.permute.xlu2 %2586  ;;  %v6699_v46 = vpack.c.bf16 %v1066_v4, %v1064_v55 }
 0x1dc   : > { %v936_v53 = vpop.f32.mrf.mxu1  ;;  %9890 = vst [vmem:[#allocation54_spill] sm:$0xff] %v6699_v46 }
 0x1de   : > { %1108 = vmatmul.bf16.gmra.mxu2 %v698_v9  ;;  %1872 = vrot.lane.b32.xlu1 %v6583_v27, %s6023_s12 }
 0x1e0   : > { %2574 = vrot.lane.b32.xlu2 %v6563_v16, %s6024_s27  ;;  %1309 = vmatpush.bf16.xpose.msrb.mxu3 %v1263_v10  ;;  %v6660_v11 = vpop.permute.xlu1 %1862 }
 0x1e1   : > { %v6662_v15 = vpop.permute.xlu0 %1838  ;;  %v1069_v17 = vpop.f32.mrf.mxu2 }
 0x1e2   : > { %v6664_v18 = vpop.permute.xlu2 %3270 }
 0x1e4   : > { %v938_v20 = vpop.f32.mrf.mxu1 }
 0x1e5   : > { %v6666_v21 = vpack.c.bf16 %v938_v20, %v936_v53 }
 0x1e6   : > { %2572 = vrot.lane.b32.xlu1 %v6583_v27, %s6024_s27  ;;  %v699_v27 = vpack.c.bf16 %v683_v28, %v682_v26  ;;  %v1284_v26 = vsel %vm9647_vm0, %v6636_v61, 0 }
 0x1e7   : > { %2580 = vrot.lane.b32.xlu0 %v6666_v21, %s6024_s27  ;;  %v1287_v53 = vsel %vm9647_vm0, %v6666_v21, 0 }
 0x1e8   : > { %1310 = vmatpush.bf16.xpose.msrb.mxu3 %v1260_v36  ;;  %v6676_v30 = vpop.permute.xlu1 %3246  ;;  %1876 = vrot.lane.b32.xlu2 %v6605_v34, %s6023_s12 }
 0x1e9   : > { %v6680_v38 = vpop.permute.xlu0 %2554  ;;  %v1071_v39 = vpop.f32.mrf.mxu2 }
 0x1ea   : > { %9888 = vst [vmem:[#allocation52_spill] sm:$0xff] %v6680_v38  ;;  %v6682_v40 = vpop.permute.xlu2 %1864  ;;  %v6721_v9 = vpack.c.bf16 %v1071_v39, %v1069_v17 }
 0x1ec   : > { %v941_v7 = vpop.f32.mrf.mxu1  ;;  %9893 = vst [vmem:[#allocation57_spill] sm:$0xff] %v6721_v9 }
 0x1ee   : > { %1113 = vmatmul.bf16.gmra.mxu2 %v699_v27  ;;  %3258 = vrot.lane.b32.xlu1 %v6563_v16, %s6022_s21  ;;  %v6703_v16 = vpack.c.bf16 %v6579_v24, %v6559_v13 }
 0x1f0   : > { %1311 = vmatpush.bf16.xpose.msrb.mxu3 %v1257_v48  ;;  %2406 = vrot.lane.b32.xlu2 %v6685_v41, %s6023_s12  ;;  %v6693_v49 = vpop.permute.xlu1 %2564  ;;  %9891 = vst [vmem:[#allocation55_spill] sm:$0xff] %v6703_v16  ;;  %v1281_v48 = vsel %vm9647_vm0, %v6605_v34, 0 }
 0x1f1   : > { %v6695_v50 = vpop.permute.xlu0 %1832  ;;  %v1074_v35 = vpop.f32.mrf.mxu2 }
 0x1f2   : > { %v6697_v59 = vpop.permute.xlu2 %3272 }
 0x1f4   : > { %v943_v62 = vpop.f32.mrf.mxu1 }
 0x1f5   : > { %v1210_v63 = vpack.c.bf16 %v943_v62, %v941_v7 }
 0x1f6   : > { %2404 = vrot.lane.b32.xlu1 %v6703_v16, %s6023_s12 }
 0x1f7   : > { %4757 = vmatmul.msk.bf16.vlgmr.msrb.gmra.mxu3 %vm9647_vm0, %v6407_v43  ;;  %v1290_v45 = vsel %vm9647_vm0, %v1210_v63, 0  ;;  %2582 = vrot.lane.b32.xlu0 %v1210_v63, %s6024_s27 }
 0x1f8   : > { %1357 = vmatpush.bf16.xpose.msrb.mxu0 %v1290_v45  ;;  %2408 = vrot.lane.b32.xlu2 %v6699_v46, %s6023_s12  ;;  %v6712_v55 = vpop.permute.xlu1 %2548 }
 0x1f9   : > { %v6714_v1 = vpop.permute.xlu0 %3248  ;;  %v1076_v24 = vpop.f32.mrf.mxu2 }
 0x1fa   : > { %v6717_v13 = vpop.permute.xlu2 %2566  ;;  %v6719_v4 = vpack.c.bf16 %v1076_v24, %v1074_v35 }
 0x1fc   : > { %9892 = vst [vmem:[#allocation56_spill] sm:$0xff] %v6719_v4  ;;  %1722 = vmatpush.bf16.msra.mxu3 %v6719_v4 }
 0x1fe   : > { %3260 = vrot.lane.b32.xlu1 %v6605_v34, %s6022_s21 }
 0x200   : > { %1358 = vmatpush.bf16.xpose.msrb.mxu0 %v1287_v53  ;;  %2410 = vrot.lane.b32.xlu2 %v6721_v9, %s6023_s12  ;;  %v1889_v10 = vpop.permute.xlu1 %1888 }
 0x201   : > { %1723 = vmatpush.bf16.msra.mxu3 %v6721_v9  ;;  %v6731_v20 = vpop.permute.xlu0 %2588  ;;  %v1079_v17 = vpop.f32.mrf.mxu2 }
 0x202   : > { %v6733_v36 = vpop.permute.xlu2 %2550 }
 0x203   : > { %9894 = vst [vmem:[#allocation58_spill] sm:$0xff] %v6733_v36 }
 0x205   : > { %1724 = vmatpush.bf16.msra.mxu3 %v6699_v46 }
 0x206   : > { %2578 = vrot.lane.b32.xlu1 %v6636_v61, %s6024_s27 }
 0x207   : > { %4758 = vmatmul.msk.bf16.gmra.mxu3 %vm9647_vm0, %v6427_v60 }
 0x208   : > { %1359 = vmatpush.bf16.xpose.msrb.mxu0 %v1284_v26  ;;  %1882 = vrot.lane.b32.xlu2 %v1210_v63, %s6023_s12  ;;  %v6744_v28 = vpop.permute.xlu1 %1840 }
 0x209   : > { %1725 = vmatpush.bf16.msra.mxu3 %v6685_v41  ;;  %v6746_v39 = vpop.permute.xlu0 %1866  ;;  %v1081_v7 = vpop.f32.mrf.mxu2 }
 0x20a   : > { %v6748_v27 = vpop.permute.xlu2 %2558 }
 0x20b   : > { %9895 = vst [vmem:[#allocation59_spill] sm:$0xff] %v6748_v27 }
 0x20d   : > { %1726 = vmatpush.bf16.msra.mxu3 %v6703_v16 }
 0x20e   : > { %3262 = vrot.lane.b32.xlu1 %v6636_v61, %s6022_s21 }
 0x210   : > { %1360 = vmatpush.bf16.xpose.msrb.mxu0 %v1281_v48  ;;  %3266 = vrot.lane.b32.xlu2 %v1210_v63, %s6022_s21  ;;  %v6757_v35 = vpop.permute.xlu1 %2556  ;;  %v1959_v48 = vsel %vm9647_vm0, %v1889_v10, 0 }
 0x211   : > { %1727 = vmatpush.bf16.msra.mxu3 %v6634_v57  ;;  %9896 = vst [vmem:[#allocation60_spill] sm:$0xff] %v6757_v35  ;;  %v1891_v62 = vpop.permute.xlu0 %1890  ;;  %v1084_v53 = vpop.f32.mrf.mxu2 }
 0x212   : > { %v1962_v45 = vsel %vm9647_vm0, %v1891_v62, 0  ;;  %v6760_v24 = vpop.permute.xlu2 %3252 }
 0x213   : > { %2013 = vmatpush.bf16.xpose.msra.mxu2 %v1962_v45 }
 0x215   : > { %1728 = vmatpush.bf16.msra.mxu3 %v6561_v14 }
 0x216   : > { %1880 = vrot.lane.b32.xlu1 %v6666_v21, %s6023_s12 }
 0x217   : > { %4759 = vmatmul.msk.bf16.gmra.mxu3 %vm9647_vm0, %v6478_v33  ;;  %4765 = vmatmul.msk.bf16.vlgmr.msrb.gmra.mxu0 %vm9647_vm0, %v6407_v43 }
 0x218   : > { %v6770_v34 = vpop.permute.xlu1 %1834 }
 0x219   : > { %1729 = vmatpush.bf16.msra.mxu3 %v6587_v29  ;;  %v6772_v61 = vpop.permute.xlu0 %1842  ;;  %v1086_v26 = vpop.f32.mrf.mxu2  ;;  %v1956_v29 = vsel %vm9647_vm0, %v6630_v56, 0  ;;  %v1953_v56 = vsel %vm9647_vm0, %v6618_v44, 0 }
 0x21a   : > { %v6774_v63 = vpop.permute.xlu2 %2398 }
 0x21b   : > { %2014 = vmatpush.bf16.xpose.msra.mxu2 %v1959_v48 }
 0x21e   : > { %3264 = vrot.lane.b32.xlu1 %v6666_v21, %s6022_s21 }
 0x220   : > { %v6779_v62 = vpop.permute.xlu1 %3250 }
 0x221   : > { %v6781_v43 = vpop.permute.xlu0 %3254  ;;  %v1089_v14 = vpop.f32.mrf.mxu2 }
 0x222   : > { %v1871_v45 = vpop.permute.xlu2 %1870 }
 0x223   : > { %2015 = vmatpush.bf16.xpose.msra.mxu2 %v1956_v29 }
 0x226   : > { %2412 = vrot.lane.b32.xlu1 %v6719_v4, %s6023_s12 }
 0x227   : > { %4766 = vmatmul.msk.bf16.gmra.mxu0 %vm9647_vm0, %v6427_v60  ;;  %4760 = vmatmul.msk.bf16.gmra.mxu3 %vm9647_vm0, %v6535_v2  ;;  %v6801_v60 = vpack.c.bf16 %v1081_v7, %v1079_v17 }
 0x228   : > { %v6791_v21 = vpop.permute.xlu1 %2590 }
 0x229   : > { %v6793_v10 = vpop.permute.xlu0 %2400  ;;  %v1091_v57 = vpop.f32.mrf.mxu2  ;;  %9898 = vst [vmem:[#allocation62_spill] sm:$0xff] %v6801_v60 }
 0x22a   : > { %v6795_v48 = vpop.permute.xlu2 %3256  ;;  %v6799_v29 = vpack.c.bf16 %v1091_v57, %v1089_v14  ;;  %v6812_v14 = vpack.c.bf16 %v1086_v26, %v1084_v53 }
 0x22b   : > { %2016 = vmatpush.bf16.xpose.msra.mxu2 %v1953_v56 }
 0x22c   : > { %9897 = vst [vmem:[#allocation61_spill] sm:$0xff] %v6799_v29  ;;  %2418 = vrot.lane.b32.xlu0 %v6799_v29, %s6023_s12 }
 0x22d   : > { %9899 = vst [vmem:[#allocation63_spill] sm:$0xff] %v6812_v14 }
 0x22e   : > { %2414 = vrot.lane.b32.xlu1 %v6801_v60, %s6023_s12 }
 0x230   : > { %v6807_v16 = vpop.permute.xlu1 %3274 }
 0x231   : > { %v1875_v46 = vpop.permute.xlu0 %1874  ;;  %v1094_v9 = vpop.f32.mrf.mxu2 }
 0x232   : > { %v6809_v41 = vpop.permute.xlu2 %2402  ;;  %v1938_v4 = vsel %vm9647_vm0, %v1875_v46, 0 }
 0x233   : > { %1964 = vmatpush.bf16.xpose.msrb.mxu1 %v1938_v4 }
 0x236   : > { %2416 = vrot.lane.b32.xlu1 %v6812_v14, %s6023_s12 }
 0x237   : > { %4761 = vmatmul.msk.bf16.gmra.mxu3 %vm9647_vm0, %v6439_v6  ;;  %4767 = vmatmul.msk.bf16.gmra.mxu0 %vm9647_vm0, %v6478_v33 }
 0x238   : > { %v1869_v44 = vpop.permute.xlu1 %1868 }
 0x239   : > { %v1096_v17 = vpop.f32.mrf.mxu2  ;;  %v1929_v54 = vsel %vm9647_vm0, %v1869_v44, 0 }
 0x23a   : > { %v2575_v57 = vpop.permute.xlu2 %2574  ;;  %v6820_v7 = vpack.c.bf16 %v1096_v17, %v1094_v9 }
 0x23c   : > { %9900 = vst [vmem:[#allocation64_spill] sm:$0xff] %v6820_v7  ;;  %2420 = vrot.lane.b32.xlu0 %v6820_v7, %s6023_s12 }
 0x240   : > { %v6824_v46 = vpop.permute.xlu1 %2568 }
 0x241   : > { %v1099_v4 = vpop.f32.mrf.mxu2 }
 0x242   : > { %v6826_v53 = vpop.permute.xlu2 %1876 }
 0x247   : > { %4762 = vmatmul.msk.bf16.gmra.mxu3 %vm9647_vm0, %v6461_v19  ;;  %4768 = vmatmul.msk.bf16.gmra.mxu0 %vm9647_vm0, %v6535_v2 }
 0x248   : > { %v6832_v26 = vpop.permute.xlu1 %2570 }
 0x249   : > { %v1101_v56 = vpop.f32.mrf.mxu2 }
 0x24a   : > { %v6834_v33 = vpop.permute.xlu2 %2406  ;;  %v6836_v9 = vpack.c.bf16 %v1101_v56, %v1099_v4  ;;  %v1932_v4 = vsel %vm9647_vm0, %v1871_v45, 0  ;;  %v1926_v45 = vsel %vm9647_vm0, %v6746_v39, 0 }
 0x24c   : > { %9901 = vst [vmem:[#allocation65_spill] sm:$0xff] %v6836_v9  ;;  %2422 = vrot.lane.b32.xlu0 %v6836_v9, %s6023_s12 }
 0x250   : > { %v1873_v17 = vpop.permute.xlu1 %1872 }
 0x251   : > { %v1104_v47 = vpop.f32.mrf.mxu2  ;;  %v1935_v5 = vsel %vm9647_vm0, %v1873_v17, 0 }
 0x252   : > { %v6841_v27 = vpop.permute.xlu2 %2408  ;;  %1965 = vmatpush.bf16.xpose.msrb.mxu1 %v1935_v5 }
 0x257   : > { %4763 = vmatmul.msk.bf16.gmra.mxu3 %vm9647_vm0, %v6511_v52  ;;  %4769 = vmatmul.msk.bf16.gmra.mxu0 %vm9647_vm0, %v6439_v6 }
 0x258   : > { %v2573_v2 = vpop.permute.xlu1 %2572 }
 0x259   : > { %v1106_v35 = vpop.f32.mrf.mxu2 }
 0x25a   : > { %v6848_v56 = vpop.permute.xlu2 %2410  ;;  %v6850_v38 = vpack.c.bf16 %v1106_v35, %v1104_v47  ;;  %1966 = vmatpush.bf16.xpose.msrb.mxu1 %v1932_v4 }
 0x25c   : > { %9902 = vst [vmem:[#allocation66_spill] sm:$0xff] %v6850_v38  ;;  %2424 = vrot.lane.b32.xlu1 %v6850_v38, %s6023_s12 }
 0x260   : > { %v6854_v17 = vpop.permute.xlu1 %3258 }
 0x261   : > { %v1109_v5 = vpop.f32.mrf.mxu2 }
 0x262   : > { %v1883_v36 = vpop.permute.xlu2 %1882  ;;  %1967 = vmatpush.bf16.xpose.msrb.mxu1 %v1929_v54 }
 0x263   : > { %v1950_v6 = vsel %vm9647_vm0, %v1883_v36, 0  ;;  %v1923_v36 = vsel %vm9647_vm0, %v6682_v40, 0 }
 0x264   : > { %2017 = vmatpush.bf16.xpose.msra.mxu2 %v1950_v6 }
 0x267   : > { %4764 = vmatmul.msk.bf16.gmra.mxu3 %vm9647_vm0, %v6533_v0  ;;  %4770 = vmatmul.msk.bf16.gmra.mxu0 %vm9647_vm0, %v6461_v19 }
 0x268   : > { %v6862_v47 = vpop.permute.xlu1 %2404 }
 0x269   : > { %v1111_v35 = vpop.f32.mrf.mxu2 }
 0x26a   : > { %v6866_v4 = vpack.c.bf16 %v1111_v35, %v1109_v5  ;;  %1968 = vmatpush.bf16.xpose.msrb.mxu1 %v1926_v45  ;;  %v1920_v5 = vsel %vm9647_vm0, %v6660_v11, 0  ;;  %v2638_v11 = vsel %vm9647_vm0, %v2575_v57, 0  ;;  %v2635_v57 = vsel %vm9647_vm0, %v2573_v2, 0 }
 0x26c   : > { %9903 = vst [vmem:[#allocation67_spill] sm:$0xff] %v6866_v4  ;;  %2426 = vrot.lane.b32.xlu0 %v6866_v4, %s6023_s12 }
 0x270   : > { %v6870_v54 = vpop.permute.xlu1 %3260 }
 0x271   : > { %v1114_v6 = vpop.f32.mrf.mxu2 }
 0x272   : > { %1969 = vmatpush.bf16.xpose.msrb.mxu1 %v1923_v36  ;;  %v1917_v36 = vsel %vm9647_vm0, %v6577_v23, 0 }
 0x277   : > { %4771 = vmatmul.msk.bf16.gmra.mxu0 %vm9647_vm0, %v6511_v52  ;;  %v6900_v52 = vld [vmem:[%s6337_s22] sm:$0xff] }
 0x278   : > { %v6876_v44 = vpop.permute.xlu1 %2578 }
 0x279   : > { %v1116_v19 = vpop.f32.mrf.mxu2 }
 0x27a   : > { %v1313_v39 = vpop.f32.mrf.mxu3  ;;  %v6880_v35 = vpack.c.bf16 %v1116_v19, %v1114_v6  ;;  %1970 = vmatpush.bf16.xpose.msrb.mxu1 %v1920_v5  ;;  %v6894_v19 = vpop.permute.xlu0 %2576 }
 0x27c   : > { %9904 = vst [vmem:[#allocation68_spill] sm:$0xff] %v6880_v35  ;;  %2428 = vrot.lane.b32.xlu0 %v6880_v35, %s6023_s12  ;;  %1771 = vmatpush.bf16.msra.mxu0 %v6880_v35  ;;  %v9908_v35 = vmov 0 }
 0x280   : > { %v6885_v40 = vpop.permute.xlu1 %3262  ;;  %1772 = vmatpush.bf16.msra.mxu0 %v6866_v4 }
 0x282   : > { %v1315_v45 = vpop.f32.mrf.mxu3  ;;  %1971 = vmatpush.bf16.xpose.msrb.mxu1 %v1917_v36  ;;  %v6905_v36 = vld [vmem:[%s6337_s22 + $0x8] sm:$0xff] }
 0x284   : > { %1773 = vmatpush.bf16.msra.mxu0 %v6850_v38  ;;  %v9905_v38 = vmov 0 }
 0x287   : > { %4772 = vmatmul.msk.bf16.gmra.mxu0 %vm9647_vm0, %v6533_v0  ;;  %v1128_v0 = vunpack.c.0.s8 %v6905_v36 }
 0x288   : > { %1774 = vmatpush.bf16.msra.mxu0 %v6836_v9  ;;  %v1881_v6 = vpop.permute.xlu1 %1880  ;;  %v1879_v9 = vpop.permute.xlu0 %1878 }
 0x289   : > { %4773 = vmatmul.msk.bf16.vlgmr.msrb.gmra.mxu1 %vm9647_vm0, %v6575_v22  ;;  %v1947_v23 = vsel %vm9647_vm0, %v1881_v6, 0  ;;  %vm6917_vm2 = vcmp.ne.s32.totalorder %v1128_v0, 0 }
 0x28a   : > { %2664 = vmatpush.bf16.xpose.msra.mxu1 %v2638_v11  ;;  %v1318_v5 = vpop.f32.mrf.mxu3  ;;  %2018 = vmatpush.bf16.xpose.msra.mxu2 %v1947_v23  ;;  %v1127_v11 = vunpack.c.0.s8 %v6900_v52  ;;  %v9909_v35 = vsel %vm6917_vm2, 4294967295, %v9908_v35  ;;  %v1944_v23 = vsel %vm9647_vm0, %v1879_v9, 0  ;;  %v1941_v9 = vsel %vm9647_vm0, %v6826_v53, 0 }
 0x28b   : > { %9910 = vst [vmem:[#allocation70_spill] sm:$0xff] %v9909_v35  ;;  %v9911_v53 = vmov 0 }
 0x28c   : > { %1775 = vmatpush.bf16.msra.mxu0 %v6820_v7  ;;  %vm6911_vm1 = vcmp.ne.s32.totalorder %v1127_v11, 0 }
 0x28d   : > { %v9906_v38 = vsel %vm6911_vm1, 4294967295, %v9905_v38  ;;  %v6926_v11 = vsel %vm6911_vm1, -1e+30, %v1313_v39  ;;  %v1130_v39 = vunpack.c.1.s8 %v6905_v36 }
 0x28e   : > { %9907 = vst [vmem:[#allocation69_spill] sm:$0xff] %v9906_v38 }
 0x28f   : > { %vm6948_vm3 = vcmp.ne.s32.totalorder %v1130_v39, 0 }
 0x290   : > { %1776 = vmatpush.bf16.msra.mxu0 %v6799_v29  ;;  %v6915_v6 = vpop.permute.xlu1 %3264  ;;  %v9912_v53 = vsel %vm6948_vm3, 4294967295, %v9911_v53 }
 0x291   : > { %9913 = vst [vmem:[#allocation71_spill] sm:$0xff] %v9912_v53 }
 0x292   : > { %2665 = vmatpush.bf16.xpose.msra.mxu1 %v2635_v57  ;;  %v1320_v2 = vpop.f32.mrf.mxu3  ;;  %v2632_v57 = vsel %vm9647_vm0, %v6832_v26, 0  ;;  %2019 = vmatpush.bf16.xpose.msra.mxu2 %v1944_v23  ;;  %v2662_v23 = vsel %vm9647_vm0, %v6791_v21, 0  ;;  %v9917_v21 = vmov 0 }
 0x294   : > { %v1362_v7 = vpop.f32.mrf.mxu0  ;;  %1777 = vmatpush.bf16.msra.mxu0 %v6812_v14  ;;  %v1129_v14 = vunpack.c.1.s8 %v6900_v52 }
 0x295   : > { %v6930_v29 = vsel %vm6917_vm2, -1e+30, %v1362_v7  ;;  %v2629_v7 = vsel %vm9647_vm0, %v6824_v46, 0  ;;  %v9914_v46 = vmov 0 }
 0x296   : > { %v1434_v0 = vmax.f32 %v6926_v11, %v6930_v29  ;;  %vm6953_vm4 = vcmp.ne.s32.totalorder %v1129_v14, 0  ;;  %v2626_v14 = vsel %vm9647_vm0, %v6717_v13, 0 }
 0x297   : > { %v9915_v46 = vsel %vm6953_vm4, 4294967295, %v9914_v46 }
 0x298   : > { %1435 = vmax.xlane.f32.xlu2 %v1434_v0  ;;  %1778 = vmatpush.bf16.msra.mxu0 %v6801_v60  ;;  %v2413_v26 = vpop.permute.xlu1 %2412  ;;  %v1132_v60 = vunpack.c.2.s8 %v6905_v36  ;;  %9916 = vst [vmem:[#allocation72_spill] sm:$0xff] %v9915_v46 }
 0x299   : > { %4774 = vmatmul.msk.bf16.gmra.mxu1 %vm9647_vm0, %v6557_v12  ;;  %2446 = vmatpush.bf16.msrb.mxu3 %v2413_v26  ;;  %v1131_v26 = vunpack.c.2.s8 %v6900_v52 }
 0x29a   : > { %2666 = vmatpush.bf16.xpose.msra.mxu1 %v2632_v57  ;;  %v1323_v57 = vpop.f32.mrf.mxu3  ;;  %2020 = vmatpush.bf16.xpose.msra.mxu2 %v1941_v9  ;;  %vm6965_vm6 = vcmp.ne.s32.totalorder %v1132_v60, 0  ;;  %v2659_v60 = vsel %vm9647_vm0, %v6731_v20, 0  ;;  %v1134_v20 = vunpack.c.3.s8 %v6905_v36  ;;  %v7012_v36 = vld [vmem:[%s6337_s22 + $0x18] sm:$0xff] }
 0x29b   : > { %vm6957_vm5 = vcmp.ne.s32.totalorder %v1131_v26, 0  ;;  %v9926_v26 = vmov 0 }
 0x29c   : > { %v1364_v0 = vpop.f32.mrf.mxu0  ;;  %v9918_v21 = vsel %vm6957_vm5, 4294967295, %v9917_v21  ;;  %vm7001_vm8 = vcmp.ne.s32.totalorder %v1134_v20, 0  ;;  %v9932_v20 = vmov 0 }
 0x29d   : > { %2447 = vmatpush.bf16.msrb.mxu3 %v6848_v56  ;;  %9919 = vst [vmem:[#allocation73_spill] sm:$0xff] %v9918_v21  ;;  %v6963_v9 = vsel %vm6948_vm3, -1e+30, %v1364_v0  ;;  %v6976_v56 = vsel %vm6953_vm4, -1e+30, %v1315_v45  ;;  %v9927_v26 = vsel %vm7001_vm8, 4294967295, %v9926_v26 }
 0x29e   : > { %v1437_v13 = vmax.f32 %v6976_v56, %v6963_v9  ;;  %9928 = vst [vmem:[#allocation76_spill] sm:$0xff] %v9927_v26 }
 0x2a1   : > { %4781 = vmatmul.msk.bf16.vlgmr.msra.gmra.mxu2 %vm9647_vm0, %v6575_v22  ;;  %2448 = vmatpush.bf16.msrb.mxu3 %v6841_v27  ;;  %v1133_v27 = vunpack.c.3.s8 %v6900_v52  ;;  %v7006_v52 = vld [vmem:[%s6337_s22 + $0x10] sm:$0xff] }
 0x2a2   : > { %2667 = vmatpush.bf16.xpose.msra.mxu1 %v2629_v7  ;;  %2713 = vmatpush.bf16.xpose.msrb.mxu2 %v2662_v23  ;;  %v9920_v7 = vmov 0  ;;  %v6982_v23 = vsel %vm6957_vm5, -1e+30, %v1318_v5  ;;  %v1325_v45 = vpop.f32.mrf.mxu3  ;;  %v9923_v5 = vmov 0 }
 0x2a3   : > { %v9921_v7 = vsel %vm6965_vm6, 4294967295, %v9920_v7  ;;  %vm6995_vm7 = vcmp.ne.s32.totalorder %v1133_v27, 0  ;;  %v1136_v27 = vunpack.c.0.s8 %v7012_v36 }
 0x2a4   : > { %9922 = vst [vmem:[#allocation74_spill] sm:$0xff] %v9921_v7  ;;  %v1367_v39 = vpop.f32.mrf.mxu0  ;;  %v9924_v5 = vsel %vm6995_vm7, 4294967295, %v9923_v5 }
 0x2a5   : > { %v6986_v22 = vsel %vm6965_vm6, -1e+30, %v1367_v39  ;;  %2449 = vmatpush.bf16.msrb.mxu3 %v6834_v33  ;;  %9925 = vst [vmem:[#allocation75_spill] sm:$0xff] %v9924_v5  ;;  %v2623_v33 = vsel %vm9647_vm0, %v6693_v49, 0  ;;  %v2656_v39 = vsel %vm9647_vm0, %v6652_v8, 0  ;;  %v2581_v8 = vpop.permute.xlu0 %2580  ;;  %vm7033_vm10 = vcmp.ne.s32.totalorder %v1136_v27, 0 }
 0x2a6   : > { %v1440_v0 = vmax.f32 %v6982_v23, %v6986_v22  ;;  %1438 = vmax.xlane.f32.xlu0 %v1437_v13  ;;  %v9933_v20 = vsel %vm7033_vm10, 4294967295, %v9932_v20  ;;  %v9938_v27 = vmov 0 }
 0x2a7   : > { %9934 = vst [vmem:[#allocation78_spill] sm:$0xff] %v9933_v20 }
 0x2a8   : > { %1441 = vmax.xlane.f32.xlu1 %v1440_v0 }
 0x2a9   : > { %4775 = vmatmul.msk.bf16.gmra.mxu1 %vm9647_vm0, %v6695_v50  ;;  %2450 = vmatpush.bf16.msrb.mxu3 %v6862_v47  ;;  %v1135_v47 = vunpack.c.0.s8 %v7006_v52 }
 0x2aa   : > { %2668 = vmatpush.bf16.xpose.msra.mxu1 %v2626_v14  ;;  %2714 = vmatpush.bf16.xpose.msrb.mxu2 %v2659_v60  ;;  %v7018_v60 = vsel %vm6995_vm7, -1e+30, %v1320_v2  ;;  %v1328_v0 = vpop.f32.mrf.mxu3  ;;  %v9929_v2 = vmov 0 }
 0x2ab   : > { %vm7029_vm9 = vcmp.ne.s32.totalorder %v1135_v47, 0 }
 0x2ac   : > { %v1369_v14 = vpop.f32.mrf.mxu0  ;;  %v9930_v2 = vsel %vm7029_vm9, 4294967295, %v9929_v2 }
 0x2ad   : > { %v7022_v13 = vsel %vm7001_vm8, -1e+30, %v1369_v14  ;;  %2451 = vmatpush.bf16.msrb.mxu3 %v6809_v41  ;;  %9931 = vst [vmem:[#allocation77_spill] sm:$0xff] %v9930_v2  ;;  %v2653_v14 = vsel %vm9647_vm0, %v6648_v58, 0  ;;  %v2583_v58 = vpop.permute.xlu0 %2582 }
 0x2ae   : > { %v1443_v49 = vmax.f32 %v7018_v60, %v7022_v13 }
 0x2b0   : > { %1444 = vmax.xlane.f32.xlu2 %v1443_v49  ;;  %v9935_v49 = vmov 0 }
 0x2b1   : > { %4782 = vmatmul.msk.bf16.gmra.mxu2 %vm9647_vm0, %v6557_v12  ;;  %2452 = vmatpush.bf16.msrb.mxu3 %v6793_v10  ;;  %v1137_v12 = vunpack.c.1.s8 %v7006_v52 }
 0x2b2   : > { %2669 = vmatpush.bf16.xpose.msra.mxu1 %v2623_v33  ;;  %2715 = vmatpush.bf16.xpose.msrb.mxu2 %v2656_v39  ;;  %v2620_v33 = vsel %vm9647_vm0, %v6581_v25, 0  ;;  %v7046_v39 = vsel %vm7029_vm9, -1e+30, %v1323_v57  ;;  %v1138_v25 = vunpack.c.1.s8 %v7012_v36  ;;  %v1330_v57 = vpop.f32.mrf.mxu3 }
 0x2b3   : > { %vm7057_vm11 = vcmp.ne.s32.totalorder %v1137_v12, 0 }
 0x2b4   : > { %v1372_v41 = vpop.f32.mrf.mxu0  ;;  %v9936_v49 = vsel %vm7057_vm11, 4294967295, %v9935_v49  ;;  %vm7063_vm12 = vcmp.ne.s32.totalorder %v1138_v25, 0  ;;  %v7074_v12 = vsel %vm7057_vm11, -1e+30, %v1325_v45  ;;  %v1139_v25 = vunpack.c.2.s8 %v7006_v52 }
 0x2b5   : > { %v7050_v47 = vsel %vm7033_vm10, -1e+30, %v1372_v41  ;;  %2453 = vmatpush.bf16.msrb.mxu3 %v6774_v63  ;;  %9937 = vst [vmem:[#allocation79_spill] sm:$0xff] %v9936_v49  ;;  %v9939_v27 = vsel %vm7063_vm12, 4294967295, %v9938_v27  ;;  %v3322_v63 = vsel %vm9647_vm0, %v6854_v17, 0  ;;  %v1140_v17 = vunpack.c.2.s8 %v7012_v36  ;;  %v7109_v4 = vpop.permute.xlu0 %2418 }
 0x2b6   : > { %v1446_v10 = vmax.f32 %v7046_v39, %v7050_v47  ;;  %9940 = vst [vmem:[#allocation80_spill] sm:$0xff] %v9939_v27  ;;  %vm7084_vm13 = vcmp.ne.s32.totalorder %v1139_v25, 0  ;;  %v9944_v45 = vmov 0 }
 0x2b7   : > { %vm7088_vm14 = vcmp.ne.s32.totalorder %v1140_v17, 0  ;;  %v7099_v25 = vsel %vm7084_vm13, -1e+30, %v1328_v0  ;;  %v9950_v0 = vmov 0 }
 0x2b8   : > { %1447 = vmax.xlane.f32.xlu0 %v1446_v10  ;;  %v9945_v45 = vsel %vm7088_vm14, 4294967295, %v9944_v45 }
 0x2b9   : > { %4776 = vmatmul.msk.bf16.gmra.mxu1 %vm9647_vm0, %v6770_v34  ;;  %9946 = vst [vmem:[#allocation82_spill] sm:$0xff] %v9945_v45 }
 0x2ba   : > { %2670 = vmatpush.bf16.xpose.msra.mxu1 %v2620_v33  ;;  %2716 = vmatpush.bf16.xpose.msrb.mxu2 %v2653_v14  ;;  %v2617_v33 = vsel %vm9647_vm0, %v6597_v31, 0  ;;  %v2650_v14 = vsel %vm9647_vm0, %v2583_v58, 0  ;;  %v9941_v58 = vmov 0 }
 0x2bb   : > { %v9942_v58 = vsel %vm7084_vm13, 4294967295, %v9941_v58 }
 0x2bc   : > { %v1374_v41 = vpop.f32.mrf.mxu0  ;;  %9943 = vst [vmem:[#allocation81_spill] sm:$0xff] %v9942_v58 }
 0x2bd   : > { %v7078_v10 = vsel %vm7063_vm12, -1e+30, %v1374_v41  ;;  %v2647_v41 = vsel %vm9647_vm0, %v2581_v8, 0  ;;  %v1142_v8 = vunpack.c.3.s8 %v7012_v36  ;;  %v2644_v36 = vsel %vm9647_vm0, %v6876_v44, 0 }
 0x2be   : > { %v1449_v31 = vmax.f32 %v7074_v12, %v7078_v10 }
 0x2c0   : > { %1450 = vmax.xlane.f32.xlu2 %v1449_v31 }
 0x2c1   : > { %4783 = vmatmul.msk.bf16.gmra.mxu2 %vm9647_vm0, %v6695_v50  ;;  %v1141_v50 = vunpack.c.3.s8 %v7006_v52  ;;  %v7122_v52 = vld [vmem:[%s6337_s22 + $0x20] sm:$0xff] }
 0x2c2   : > { %2671 = vmatpush.bf16.xpose.msra.mxu1 %v2617_v33  ;;  %2717 = vmatpush.bf16.xpose.msrb.mxu2 %v2650_v14  ;;  %v1333_v33 = vpop.f32.mrf.mxu3  ;;  %v3319_v14 = vsel %vm9647_vm0, %v6795_v48, 0  ;;  %v9947_v48 = vmov 0 }
 0x2c3   : > { %vm7111_vm15 = vcmp.ne.s32.totalorder %v1141_v50, 0 }
 0x2c4   : > { %v9948_v48 = vsel %vm7111_vm15, 4294967295, %v9947_v48  ;;  %v7133_v50 = vsel %vm7111_vm15, -1e+30, %v1330_v57  ;;  %v9953_v57 = vmov 0 }
 0x2c5   : > { %9949 = vst [vmem:[#allocation83_spill] sm:$0xff] %v9948_v48 }
 0x2c9   : > { %4777 = vmatmul.msk.bf16.gmra.mxu1 %vm9647_vm0, %v6626_v51 }
 0x2ca   : > { %3348 = vmatpush.bf16.xpose.msrb.mxu1 %v3322_v63  ;;  %v1377_v63 = vpop.f32.mrf.mxu0  ;;  %2718 = vmatpush.bf16.xpose.msrb.mxu2 %v2647_v41  ;;  %v1335_v45 = vpop.f32.mrf.mxu3 }
 0x2cb   : > { %v7103_v31 = vsel %vm7088_vm14, -1e+30, %v1377_v63  ;;  %vm7117_vm14 = vcmp.ne.s32.totalorder %v1142_v8, 0  ;;  %v7125_v63 = vld [vmem:[%s6337_s22 + $0x28] sm:$0xff]  ;;  %v1143_v8 = vunpack.c.0.s8 %v7122_v52 }
 0x2cc   : > { %v1452_v17 = vmax.f32 %v7099_v25, %v7103_v31  ;;  %v9951_v0 = vsel %vm7117_vm14, 4294967295, %v9950_v0  ;;  %v1144_v44 = vunpack.c.0.s8 %v7125_v63 }
 0x2cd   : > { %9952 = vst [vmem:[#allocation84_spill] sm:$0xff] %v9951_v0 }
 0x2ce   : > { %1453 = vmax.xlane.f32.xlu2 %v1452_v17  ;;  %vm7149_vm15 = vcmp.ne.s32.totalorder %v1144_v44, 0 }
 0x2d2   : > { %3349 = vmatpush.bf16.xpose.msrb.mxu1 %v3319_v14  ;;  %v1379_v41 = vpop.f32.mrf.mxu0  ;;  %v3316_v14 = vsel %vm9647_vm0, %v6781_v43, 0  ;;  %2719 = vmatpush.bf16.xpose.msrb.mxu2 %v2644_v36  ;;  %v7143_v43 = vpop.permute.xlu0 %2420  ;;  %vm7145_vm0 = vcmp.ne.s32.totalorder %v1143_v8, 0 }
 0x2d3   : > { %v7137_v17 = vsel %vm7117_vm14, -1e+30, %v1379_v41  ;;  %v9954_v57 = vsel %vm7145_vm0, 4294967295, %v9953_v57  ;;  %v9956_v41 = vmov 0  ;;  %vm9959_vm14 = vcmask 261120   ;;  %v1338_v48 = vpop.f32.mrf.mxu3 }
 0x2d4   : > { %v1455_v58 = vmax.f32 %v7133_v50, %v7137_v17  ;;  %9955 = vst [vmem:[#allocation85_spill] sm:$0xff] %v9954_v57  ;;  %v9957_v41 = vsel %vm7149_vm15, 4294967295, %v9956_v41  ;;  %4784 = vmatmul.msk.bf16.gmra.mxu2 %vm9959_vm14, %v6770_v34  ;;  %vm9960_vm13 = vmmov %vm9959_vm14  ;;  %v7163_v0 = vsel %vm7145_vm0, -1e+30, %v1333_v33  ;;  %v1145_v34 = vunpack.c.1.s8 %v7122_v52 }
 0x2d5   : > { %9958 = vst [vmem:[#allocation86_spill] sm:$0xff] %v9957_v41  ;;  %vm9961_vm12 = vmmov %vm9960_vm13  ;;  %v9966_v33 = vmov 0 }
 0x2d6   : > { %1456 = vmax.xlane.f32.xlu1 %v1455_v58  ;;  %v3313_v58 = vsel %vm9961_vm12, %v6760_v24, 0  ;;  %vm9962_vm11 = vmmov %vm9961_vm12  ;;  %v1146_v24 = vunpack.c.1.s8 %v7125_v63 }
 0x2d7   : > { %v3346_v8 = vsel %vm9962_vm11, %v6807_v16, 0  ;;  %vm7173_vm11 = vcmp.ne.s32.totalorder %v1145_v34, 0  ;;  %v9963_v16 = vmov 0  ;;  %vm9969_vm14 = vmmov %vm9961_vm12 }
 0x2d8   : > { %v9964_v16 = vsel %vm7173_vm11, 4294967295, %v9963_v16 }
 0x2d9   : > { %9965 = vst [vmem:[#allocation87_spill] sm:$0xff] %v9964_v16  ;;  %4778 = vmatmul.msk.bf16.gmra.mxu1 %vm9961_vm12, %v6662_v15  ;;  %v1149_v16 = vunpack.c.3.s8 %v7122_v52 }
 0x2da   : > { %3350 = vmatpush.bf16.xpose.msrb.mxu1 %v3316_v14  ;;  %v1382_v36 = vpop.f32.mrf.mxu0  ;;  %v2641_v14 = vsel %vm9960_vm13, %v6894_v19, 0  ;;  %vm7179_vm13 = vcmp.ne.s32.totalorder %v1146_v24, 0  ;;  %v1147_v24 = vunpack.c.2.s8 %v7122_v52  ;;  %v7243_v52 = vld [vmem:[%s6337_s22 + $0x38] sm:$0xff] }
 0x2db   : > { %v7167_v44 = vsel %vm7149_vm15, -1e+30, %v1382_v36  ;;  %2720 = vmatpush.bf16.xpose.msrb.mxu2 %v2641_v14  ;;  %v9967_v33 = vsel %vm7179_vm13, 4294967295, %v9966_v33  ;;  %v7183_v36 = vpop.permute.xlu0 %2422 }
 0x2dc   : > { %v1458_v19 = vmax.f32 %v7163_v0, %v7167_v44  ;;  %9968 = vst [vmem:[#allocation88_spill] sm:$0xff] %v9967_v33  ;;  %v1340_v33 = vpop.f32.mrf.mxu3 }
 0x2de   : > { %1459 = vmax.xlane.f32.xlu2 %v1458_v19  ;;  %v3343_v19 = vsel %vm9961_vm12, %v6697_v59, 0 }
 0x2e2   : > { %3351 = vmatpush.bf16.xpose.msrb.mxu1 %v3313_v58  ;;  %v1384_v14 = vpop.f32.mrf.mxu0  ;;  %v3310_v58 = vsel %vm9969_vm14, %v6779_v62, 0  ;;  %v1148_v62 = vunpack.c.2.s8 %v7125_v63  ;;  %vm7201_vm14 = vcmp.ne.s32.totalorder %v1147_v24, 0 }
 0x2e3   : > { %3397 = vmatpush.bf16.xpose.msra.mxu2 %v3346_v8  ;;  %v7189_v8 = vsel %vm7173_vm11, -1e+30, %v1335_v45  ;;  %v7193_v34 = vsel %vm7179_vm13, -1e+30, %v1384_v14  ;;  %v9970_v45 = vmov 0  ;;  %v9973_v14 = vmov 0  ;;  %vm9976_vm11 = vmmov %vm9961_vm12 }
 0x2e4   : > { %v1461_v41 = vmax.f32 %v7189_v8, %v7193_v34  ;;  %v9971_v45 = vsel %vm7201_vm14, 4294967295, %v9970_v45  ;;  %vm7205_vm13 = vcmp.ne.s32.totalorder %v1148_v62, 0  ;;  %4785 = vmatmul.msk.bf16.gmra.mxu2 %vm9961_vm12, %v6626_v51  ;;  %vm9979_vm15 = vmmov %vm9976_vm11  ;;  %v7223_v62 = vpop.permute.xlu1 %2414  ;;  %v2427_v51 = vpop.permute.xlu0 %2426 }
 0x2e5   : > { %9972 = vst [vmem:[#allocation89_spill] sm:$0xff] %v9971_v45  ;;  %v9974_v14 = vsel %vm7205_vm13, 4294967295, %v9973_v14  ;;  %v3340_v24 = vsel %vm9979_vm15, %v6664_v18, 0  ;;  %v9983_v18 = vmov 0 }
 0x2e6   : > { %1462 = vmax.xlane.f32.xlu1 %v1461_v41  ;;  %9975 = vst [vmem:[#allocation90_spill] sm:$0xff] %v9974_v14  ;;  %v7215_v41 = vsel %vm7201_vm14, -1e+30, %v1338_v48  ;;  %v1150_v48 = vunpack.c.3.s8 %v7125_v63  ;;  %v9980_v14 = vmov 0 }
 0x2e7   : > { %9977 = vst [vmem:[#allocation91_spill] sm:$0xff] %v7215_v41 }
 0x2e8   : > { %vm7235_vm15 = vcmp.ne.s32.totalorder %v1150_v48, 0  ;;  %v3337_v48 = vsel %vm9961_vm12, %v6650_v3, 0 }
 0x2e9   : > { %4779 = vmatmul.msk.bf16.gmra.mxu1 %vm9961_vm12, %v6744_v28  ;;  %v9984_v18 = vsel %vm7235_vm15, 4294967295, %v9983_v18 }
 0x2ea   : > { %3352 = vmatpush.bf16.xpose.msrb.mxu1 %v3310_v58  ;;  %v1387_v59 = vpop.f32.mrf.mxu0  ;;  %v3307_v58 = vsel %vm9976_vm11, %v6714_v1, 0  ;;  %vm7229_vm11 = vcmp.ne.s32.totalorder %v1149_v16, 0  ;;  %9985 = vst [vmem:[#allocation94_spill] sm:$0xff] %v9984_v18 }
 0x2eb   : > { %3398 = vmatpush.bf16.xpose.msra.mxu2 %v3343_v19  ;;  %v7219_v19 = vsel %vm7205_vm13, -1e+30, %v1387_v59  ;;  %v9981_v14 = vsel %vm7229_vm11, 4294967295, %v9980_v14  ;;  %v7240_v59 = vld [vmem:[%s6337_s22 + $0x30] sm:$0xff]  ;;  %vm9986_vm13 = vmmov %vm9961_vm12  ;;  %v7249_v16 = vsel %vm7229_vm11, -1e+30, %v1340_v33  ;;  %v3267_v33 = vpop.permute.xlu2 %3266 }
 0x2ec   : > { %9978 = vst [vmem:[#allocation92_spill] sm:$0xff] %v7219_v19  ;;  %v1464_v1 = vmax.f32 %v7215_v41, %v7219_v19  ;;  %v3304_v63 = vsel %vm9986_vm13, %v6676_v30, 0  ;;  %v2417_v45 = vpop.permute.xlu1 %2416  ;;  %v1151_v19 = vunpack.c.0.s8 %v7240_v59  ;;  %v1152_v30 = vunpack.c.0.s8 %v7243_v52  ;;  %vm9993_vm11 = vmmov %vm9961_vm12 }
 0x2ed   : > { %9982 = vst [vmem:[#allocation93_spill] sm:$0xff] %v9981_v14  ;;  %vm9994_vm14 = vmmov %vm9993_vm11  ;;  %v1153_v18 = vunpack.c.1.s8 %v7240_v59 }
 0x2ee   : > { %1465 = vmax.xlane.f32.xlu1 %v1464_v1  ;;  %v2429_v14 = vpop.permute.xlu0 %2428  ;;  %vm7261_vm13 = vcmp.ne.s32.totalorder %v1151_v19, 0  ;;  %v3334_v19 = vsel %vm9994_vm14, %v3267_v33, 0  ;;  %v9998_v33 = vmov 0 }
 0x2ef   : > { %2495 = vmatpush.bf16.msrb.mxu0 %v2429_v14 }
 0x2f2   : > { %3353 = vmatpush.bf16.xpose.msrb.mxu1 %v3307_v58  ;;  %v1343_v58 = vpop.f32.mrf.mxu3 }
 0x2f3   : > { %3399 = vmatpush.bf16.xpose.msra.mxu2 %v3340_v24  ;;  %v1389_v24 = vpop.f32.mrf.mxu0  ;;  %2496 = vmatpush.bf16.msrb.mxu0 %v2427_v51  ;;  %v7275_v14 = vsel %vm7261_vm13, -1e+30, %v1343_v58  ;;  %v1154_v51 = vunpack.c.1.s8 %v7243_v52  ;;  %v9995_v58 = vmov 0 }
 0x2f4   : > { %v7253_v1 = vsel %vm7235_vm15, -1e+30, %v1389_v24  ;;  %v9987_v24 = vmov 0  ;;  %vm7265_vm15 = vcmp.ne.s32.totalorder %v1152_v30, 0  ;;  %4786 = vmatmul.msk.bf16.gmra.mxu2 %vm9961_vm12, %v6662_v15  ;;  %v2425_v30 = vpop.permute.xlu1 %2424 }
 0x2f5   : > { %v1467_v41 = vmax.f32 %v7249_v16, %v7253_v1  ;;  %v9988_v24 = vsel %vm7261_vm13, 4294967295, %v9987_v24  ;;  %vm7292_vm14 = vcmp.ne.s32.totalorder %v1154_v51, 0  ;;  %v1156_v51 = vunpack.c.2.s8 %v7243_v52 }
 0x2f6   : > { %9989 = vst [vmem:[#allocation95_spill] sm:$0xff] %v9988_v24  ;;  %v9999_v33 = vsel %vm7292_vm14, 4294967295, %v9998_v33 }
 0x2f7   : > { %1468 = vmax.xlane.f32.xlu2 %v1467_v41  ;;  %2497 = vmatpush.bf16.msrb.mxu0 %v2425_v30  ;;  %10000 = vst [vmem:[#allocation98_spill] sm:$0xff] %v9999_v33  ;;  %v1155_v30 = vunpack.c.2.s8 %v7240_v59 }
 0x2f9   : > { %4780 = vmatmul.msk.bf16.gmra.mxu1 %vm9961_vm12, %v6772_v61 }
 0x2fa   : > { %3354 = vmatpush.bf16.xpose.msrb.mxu1 %v3304_v63  ;;  %v9990_v63 = vmov 0  ;;  %v1345_v15 = vpop.f32.mrf.mxu3 }
 0x2fb   : > { %3400 = vmatpush.bf16.xpose.msra.mxu2 %v3337_v48  ;;  %v9991_v63 = vsel %vm7265_vm15, 4294967295, %v9990_v63  ;;  %v1392_v3 = vpop.f32.mrf.mxu0  ;;  %v3301_v48 = vsel %vm9993_vm11, %v6616_v42, 0  ;;  %vm7286_vm11 = vcmp.ne.s32.totalorder %v1153_v18, 0  ;;  %2498 = vmatpush.bf16.msrb.mxu0 %v7183_v36 }
 0x2fc   : > { %9992 = vst [vmem:[#allocation96_spill] sm:$0xff] %v9991_v63  ;;  %v7279_v41 = vsel %vm7265_vm15, -1e+30, %v1392_v3  ;;  %v9996_v58 = vsel %vm7286_vm11, 4294967295, %v9995_v58  ;;  %vm10003_vm15 = vmmov %vm9961_vm12  ;;  %vm7312_vm12 = vcmp.ne.s32.totalorder %v1155_v30, 0 }
 0x2fd   : > { %v1470_v42 = vmax.f32 %v7275_v14, %v7279_v41  ;;  %9997 = vst [vmem:[#allocation97_spill] sm:$0xff] %v9996_v58 }
 0x2ff   : > { %1471 = vmax.xlane.f32.xlu1 %v1470_v42  ;;  %2499 = vmatpush.bf16.msrb.mxu0 %v7143_v43 }
 0x302   : > { %3355 = vmatpush.bf16.xpose.msrb.mxu1 %v3301_v48  ;;  %v7299_v48 = vsel %vm7286_vm11, -1e+30, %v1345_v15  ;;  %v1348_v36 = vpop.f32.mrf.mxu3  ;;  %v10004_v15 = vmov 0  ;;  %vm10012_vm11 = vmmov %vm10003_vm15 }
 0x303   : > { %3401 = vmatpush.bf16.xpose.msra.mxu2 %v3334_v19  ;;  %v1394_v3 = vpop.f32.mrf.mxu0  ;;  %10001 = vst [vmem:[#allocation99_spill] sm:$0xff] %v7299_v48  ;;  %v3331_v19 = vsel %vm10003_vm15, %v6915_v6, 0  ;;  %v10005_v15 = vsel %vm7312_vm12, 4294967295, %v10004_v15  ;;  %2500 = vmatpush.bf16.msrb.mxu0 %v7109_v4  ;;  %v3328_v30 = vsel %vm10012_vm11, %v6885_v40, 0  ;;  %v10017_v40 = vmov 0 }
 0x304   : > { %v7303_v18 = vsel %vm7292_vm14, -1e+30, %v1394_v3  ;;  %10006 = vst [vmem:[#allocation101_spill] sm:$0xff] %v10005_v15  ;;  %vm7316_vm14 = vcmp.ne.s32.totalorder %v1156_v51, 0  ;;  %v10007_v3 = vmov 0  ;;  %4787 = vmatmul.msk.bf16.gmra.mxu2 %vm10003_vm15, %v6744_v28  ;;  %v1158_v51 = vunpack.c.3.s8 %v7243_v52 }
 0x305   : > { %10002 = vst [vmem:[#allocation100_spill] sm:$0xff] %v7303_v18  ;;  %v1473_v42 = vmax.f32 %v7299_v48, %v7303_v18  ;;  %v10008_v3 = vsel %vm7316_vm14, 4294967295, %v10007_v3 }
 0x306   : > { %10009 = vst [vmem:[#allocation102_spill] sm:$0xff] %v10008_v3  ;;  %v1973_v4 = vpop.f32.mrf.mxu1 }
 0x307   : > { %1474 = vmax.xlane.f32.xlu2 %v1473_v42  ;;  %v1157_v42 = vunpack.c.3.s8 %v7240_v59  ;;  %2501 = vmatpush.bf16.msrb.mxu0 %v2417_v45 }
 0x309   : > { %vm7337_vm15 = vcmp.ne.s32.totalorder %v1157_v42, 0 }
 0x30b   : > { %3402 = vmatpush.bf16.xpose.msra.mxu2 %v3331_v19  ;;  %v1397_v6 = vpop.f32.mrf.mxu0  ;;  %v7325_v19 = vsel %vm7312_vm12, -1e+30, %v1348_v36  ;;  %v10013_v36 = vmov 0  ;;  %2502 = vmatpush.bf16.msrb.mxu0 %v7223_v62 }
 0x30c   : > { %10010 = vst [vmem:[#allocation103_spill] sm:$0xff] %v7325_v19  ;;  %v7329_v43 = vsel %vm7316_vm14, -1e+30, %v1397_v6  ;;  %v10014_v36 = vsel %vm7337_vm15, 4294967295, %v10013_v36  ;;  %v1350_v6 = vpop.f32.mrf.mxu3  ;;  %vm10016_vm14 = vmmov %vm10012_vm11  ;;  %vm7343_vm11 = vcmp.ne.s32.totalorder %v1158_v51, 0  ;;  %v1436_v51 = vpop.xlane.xlu2 %1435 }
 0x30d   : > { %10011 = vst [vmem:[#allocation104_spill] sm:$0xff] %v7329_v43  ;;  %v1476_v28 = vmax.f32 %v7325_v19, %v7329_v43  ;;  %4789 = vmatmul.msk.bf16.vlgmr.msra.gmra.mxu1 %vm10016_vm14, %v6599_v32  ;;  %v10018_v40 = vsel %vm7343_vm11, 4294967295, %v10017_v40  ;;  %v7350_v52 = vsel %vm7337_vm15, -1e+30, %v1350_v6  ;;  %vm10020_vm12 = vmmov %vm10016_vm14  ;;  %v1482_v19 = vsub.f32 %v6926_v11, %v1436_v51 }
 0x30e   : > { %10015 = vst [vmem:[#allocation105_spill] sm:$0xff] %v10014_v36  ;;  %vm10021_vm14 = vmmov %vm10020_vm12 }
 0x30f   : > { %1477 = vmax.xlane.f32.xlu0 %v1476_v28  ;;  %10019 = vst [vmem:[#allocation106_spill] sm:$0xff] %v10018_v40  ;;  %v1975_v28 = vpop.f32.mrf.mxu1  ;;  %vm10022_vm15 = vmmov %vm10020_vm12  ;;  %v1514_v18 = vmul.f32 1.442695, %v1482_v19 }
 0x313   : > { %3403 = vmatpush.bf16.xpose.msra.mxu2 %v3328_v30  ;;  %v1399_v59 = vpop.f32.mrf.mxu0  ;;  %v3325_v30 = vsel %vm10020_vm12, %v6870_v54, 0 }
 0x314   : > { %v7354_v45 = vsel %vm7343_vm11, -1e+30, %v1399_v59  ;;  %4788 = vmatmul.msk.bf16.gmra.mxu2 %vm10021_vm14, %v6772_v61  ;;  %vm10024_vm14 = vmmov %vm10020_vm12 }
 0x315   : > { %v1479_v42 = vmax.f32 %v7350_v52, %v7354_v45 }
 0x317   : > { %1480 = vmax.xlane.f32.xlu0 %v1479_v42  ;;  %v1978_v43 = vpop.f32.mrf.mxu1  ;;  %v1483_v42 = vsub.f32 %v6930_v29, %v1436_v51 }
 0x319   : > { %v1439_v62 = vpop.xlane.xlu0 %1438  ;;  %v1516_v61 = vmul.f32 1.442695, %v1483_v42 }
 0x31a   : > { %v1484_v6 = vsub.f32 %v6976_v56, %v1439_v62  ;;  %v1485_v59 = vsub.f32 %v6963_v9, %v1439_v62  ;;  %v7376_v62 = vsel %vm6911_vm1, -1e+30, %v1973_v4 }
 0x31b   : > { %3404 = vmatpush.bf16.xpose.msra.mxu2 %v3325_v30 }
 0x31c   : > { %v1518_v54 = vmul.f32 1.442695, %v1484_v6  ;;  %v1520_v30 = vmul.f32 1.442695, %v1485_v59  ;;  %v1442_v59 = vpop.xlane.xlu1 %1441 }
 0x31d   : > { %4790 = vmatmul.msk.bf16.gmra.mxu1 %vm10022_vm15, %v6603_v37  ;;  %vm10023_vm15 = vmmov %vm10020_vm12  ;;  %v1487_v42 = vsub.f32 %v6986_v22, %v1442_v59 }
 0x31e   : > { %5212 = vpow2.f32 %v1518_v54 }
 0x31f   : > { %5214 = vpow2.f32 %v1520_v30  ;;  %v1980_v9 = vpop.f32.mrf.mxu1  ;;  %v1486_v30 = vsub.f32 %v6982_v23, %v1442_v59  ;;  %v1524_v23 = vmul.f32 1.442695, %v1487_v42 }
 0x320   : > { %5216 = vpow2.f32 %v1514_v18 }
 0x321   : > { %5218 = vpow2.f32 %v1516_v61  ;;  %v1522_v38 = vmul.f32 1.442695, %v1486_v30  ;;  %v7424_v30 = vsel %vm6995_vm7, -1e+30, %v1980_v9 }
 0x323   : > { %v1445_v54 = vpop.xlane.xlu2 %1444  ;;  %5220 = vpow2.f32 %v1522_v38 }
 0x324   : > { %4797 = vmatmul.msk.bf16.vlgmr.msrb.gmra.mxu2 %vm10020_vm12, %v6599_v32  ;;  %v7370_v48 = vpop.eup %5212  ;;  %v2022_v56 = vpop.f32.mrf.mxu2  ;;  %5222 = vpow2.f32 %v1524_v23 }
 0x325   : > { %v7372_v36 = vpop.eup %5214  ;;  %v7380_v29 = vsel %vm6917_vm2, -1e+30, %v2022_v56  ;;  %v1488_v56 = vsub.f32 %v7018_v60, %v1445_v54 }
 0x326   : > { %v1581_v11 = vadd.f32 %v7372_v36, %v7370_v48  ;;  %v2094_v32 = vmax.f32 %v7376_v62, %v7380_v29  ;;  %v7388_v18 = vpop.eup %5216 }
 0x327   : > { %v7390_v19 = vpop.eup %5218  ;;  %v7392_v51 = vpop.f32.mrf.mxu1  ;;  %v1526_v22 = vmul.f32 1.442695, %v1488_v56 }
 0x328   : > { %1582 = vadd.xlane.f32.xlu2 %v1581_v11  ;;  %2095 = vmax.xlane.f32.xlu0 %v2094_v32  ;;  %v1578_v6 = vadd.f32 %v7390_v19, %v7388_v18  ;;  %v7407_v32 = vsel %vm6953_vm4, -1e+30, %v1975_v28 }
 0x329   : > { %5224 = vpow2.f32 %v1526_v22 }
 0x32c   : > { %v2024_v4 = vpop.f32.mrf.mxu2 }
 0x32d   : > { %4791 = vmatmul.msk.bf16.gmra.mxu1 %vm10023_vm15, %v6712_v55  ;;  %v7402_v61 = vsel %vm6948_vm3, -1e+30, %v2024_v4  ;;  %v10025_v4 = vld [vmem:[#allocation58_spill] sm:$0xff]  ;;  %vm10026_vm15 = vmmov %vm10020_vm12 }
 0x32f   : > { %v1985_v59 = vpop.f32.mrf.mxu1 }
 0x330   : > { %1579 = vadd.xlane.f32.xlu0 %v1578_v6  ;;  %v1489_v6 = vsub.f32 %v7022_v13, %v1445_v54  ;;  %v7420_v13 = vsel %vm6957_vm5, -1e+30, %v1978_v43 }
 0x332   : > { %v1528_v60 = vmul.f32 1.442695, %v1489_v6  ;;  %v1448_v6 = vpop.xlane.xlu0 %1447 }
 0x333   : > { %v1451_v35 = vpop.xlane.xlu2 %1450  ;;  %v1491_v5 = vsub.f32 %v7050_v47, %v1448_v6 }
 0x334   : > { %4798 = vmatmul.msk.bf16.gmra.mxu2 %vm10024_vm14, %v6603_v37  ;;  %v2027_v11 = vpop.f32.mrf.mxu2  ;;  %v2097_v37 = vmax.f32 %v7407_v32, %v7402_v61  ;;  %5226 = vpow2.f32 %v1528_v60  ;;  %v1492_v42 = vsub.f32 %v7074_v12, %v1451_v35  ;;  %v1493_v56 = vsub.f32 %v7078_v10, %v1451_v35  ;;  %vm10028_vm14 = vmmov %vm10020_vm12 }
 0x335   : > { %v7416_v28 = vsel %vm6965_vm6, -1e+30, %v2027_v11  ;;  %v1490_v35 = vsub.f32 %v7046_v39, %v1448_v6  ;;  %v10027_v6 = vld [vmem:[#allocation50_spill] sm:$0xff] }
 0x336   : > { %v2100_v43 = vmax.f32 %v7420_v13, %v7416_v28  ;;  %v1534_v12 = vmul.f32 1.442695, %v1492_v42  ;;  %v1536_v10 = vmul.f32 1.442695, %v1493_v56  ;;  %v1532_v56 = vmul.f32 1.442695, %v1491_v5 }
 0x337   : > { %v1988_v60 = vpop.f32.mrf.mxu1  ;;  %v1530_v26 = vmul.f32 1.442695, %v1490_v35  ;;  %v7467_v5 = vsel %vm7029_vm9, -1e+30, %v7392_v51 }
 0x338   : > { %2098 = vmax.xlane.f32.xlu0 %v2097_v37  ;;  %v7436_v37 = vpop.eup %5220  ;;  %5228 = vpow2.f32 %v1534_v12 }
 0x339   : > { %v7438_v9 = vpop.eup %5222  ;;  %5230 = vpow2.f32 %v1536_v10 }
 0x33a   : > { %v7442_v22 = vpop.eup %5224  ;;  %v1584_v39 = vadd.f32 %v7438_v9, %v7436_v37  ;;  %5232 = vpow2.f32 %v1530_v26 }
 0x33b   : > { %5234 = vpow2.f32 %v1532_v56 }
 0x33c   : > { %v2029_v54 = vpop.f32.mrf.mxu2 }
 0x33d   : > { %4792 = vmatmul.msk.bf16.gmra.mxu1 %vm10020_vm12, %v10025_v4  ;;  %v7429_v38 = vsel %vm7001_vm8, -1e+30, %v2029_v54  ;;  %v7445_v54 = vpop.eup %5226  ;;  %vm10029_vm12 = vnez %v9936_v49  ;;  %v10033_v49 = vld [vmem:[#allocation81_spill] sm:$0xff] }
 0x33e   : > { %v2103_v11 = vmax.f32 %v7424_v30, %v7429_v38  ;;  %v7472_v26 = vsel %vm10029_vm12, -1e+30, %v1985_v59  ;;  %vm10034_vm7 = vnez %v10033_v49  ;;  %v10041_v49 = vld [vmem:[#allocation83_spill] sm:$0xff] }
 0x340   : > { %2104 = vmax.xlane.f32.xlu2 %v2103_v11  ;;  %2101 = vmax.xlane.f32.xlu0 %v2100_v43 }
 0x341   : > { %v1454_v23 = vpop.xlane.xlu2 %1453 }
 0x342   : > { %v1494_v11 = vsub.f32 %v7099_v25, %v1454_v23  ;;  %v1495_v42 = vsub.f32 %v7103_v31, %v1454_v23  ;;  %v7456_v25 = vpop.eup %5228  ;;  %v1990_v23 = vpop.f32.mrf.mxu1 }
 0x343   : > { %v7462_v12 = vpop.eup %5230 }
 0x344   : > { %4799 = vmatmul.msk.bf16.gmra.mxu2 %vm10026_vm15, %v6712_v55  ;;  %v2032_v43 = vpop.f32.mrf.mxu2  ;;  %v1587_v55 = vadd.f32 %v7445_v54, %v7442_v22  ;;  %v1538_v21 = vmul.f32 1.442695, %v1494_v11  ;;  %v1540_v7 = vmul.f32 1.442695, %v1495_v42  ;;  %vm10030_vm15 = vnez %v9939_v27  ;;  %v7485_v42 = vpop.eup %5232 }
 0x345   : > { %v7460_v31 = vsel %vm7033_vm10, -1e+30, %v2032_v43 }
 0x346   : > { %5236 = vpow2.f32 %v1538_v21  ;;  %v2106_v21 = vmax.f32 %v7467_v5, %v7460_v31 }
 0x347   : > { %5238 = vpow2.f32 %v1540_v7  ;;  %v7487_v7 = vpop.eup %5234 }
 0x348   : > { %1588 = vadd.xlane.f32.xlu2 %v1587_v55  ;;  %1585 = vadd.xlane.f32.xlu0 %v1584_v39 }
 0x349   : > { %v1457_v47 = vpop.xlane.xlu1 %1456 }
 0x34a   : > { %v1496_v35 = vsub.f32 %v7133_v50, %v1457_v47  ;;  %v1497_v11 = vsub.f32 %v7137_v17, %v1457_v47  ;;  %v1593_v50 = vadd.f32 %v7462_v12, %v7456_v25  ;;  %v1993_v27 = vpop.f32.mrf.mxu1 }
 0x34c   : > { %v2034_v10 = vpop.f32.mrf.mxu2  ;;  %v1542_v59 = vmul.f32 1.442695, %v1496_v35  ;;  %v1544_v17 = vmul.f32 1.442695, %v1497_v11  ;;  %v7491_v39 = vpop.eup %5236  ;;  %v7499_v11 = vsel %vm10034_vm7, -1e+30, %v1988_v60 }
 0x34d   : > { %4793 = vmatmul.msk.bf16.gmra.mxu1 %vm10028_vm14, %v10027_v6  ;;  %v7477_v43 = vsel %vm10030_vm15, -1e+30, %v2034_v10  ;;  %10031 = vst [vmem:[#allocation58_spill] sm:$0xff] %v7491_v39  ;;  %v7495_v10 = vpop.eup %5238  ;;  %vm10038_vm7 = vcmask 261120  }
 0x34e   : > { %v2109_v51 = vmax.f32 %v7472_v26, %v7477_v43  ;;  %10032 = vst [vmem:[#allocation50_spill] sm:$0xff] %v7495_v10  ;;  %5240 = vpow2.f32 %v1542_v59 }
 0x34f   : > { %5242 = vpow2.f32 %v1544_v17  ;;  %v10037_v17 = vld [vmem:[#allocation52_spill] sm:$0xff] }
 0x350   : > { %2110 = vmax.xlane.f32.xlu1 %v2109_v51  ;;  %2107 = vmax.xlane.f32.xlu2 %v2106_v21 }
 0x351   : > { %1594 = vadd.xlane.f32.xlu0 %v1593_v50  ;;  %v10035_v50 = vld [vmem:[#allocation82_spill] sm:$0xff]  ;;  %v1460_v60 = vpop.xlane.xlu2 %1459 }
 0x354   : > { %4800 = vmatmul.msk.bf16.gmra.mxu2 %vm10028_vm14, %v10025_v4  ;;  %vm10036_vm14 = vnez %v10035_v50  ;;  %v10112_v20 = vld [vmem:[#allocation58_spill] sm:$0xff] }
 0x357   : > { %v2037_v21 = vpop.f32.mrf.mxu2 }
 0x358   : > { %v7503_v4 = vsel %vm10036_vm14, -1e+30, %v2037_v21  ;;  %vm10042_vm14 = vnez %v10041_v49  ;;  %v1995_v49 = vpop.f32.mrf.mxu1 }
 0x359   : > { %v1463_v55 = vpop.xlane.xlu1 %1462  ;;  %v2112_v59 = vmax.f32 %v7499_v11, %v7503_v4  ;;  %v7523_v50 = vsel %vm10042_vm14, -1e+30, %v1990_v23 }
 0x35a   : > { %v1500_v56 = vsub.f32 %v7189_v8, %v1463_v55  ;;  %v1501_v47 = vsub.f32 %v7193_v34, %v1463_v55  ;;  %v1596_v8 = vadd.f32 %v7495_v10, %v7491_v39  ;;  %v1590_v34 = vadd.f32 %v7487_v7, %v7485_v42  ;;  %v7513_v55 = vpop.eup %5240 }
 0x35b   : > { %2113 = vmax.xlane.f32.xlu0 %v2112_v59  ;;  %v1499_v59 = vsub.f32 %v7167_v44, %v1460_v60 }
 0x35c   : > { %v1550_v35 = vmul.f32 1.442695, %v1500_v56  ;;  %v1552_v51 = vmul.f32 1.442695, %v1501_v47  ;;  %1597 = vadd.xlane.f32.xlu1 %v1596_v8  ;;  %1591 = vadd.xlane.f32.xlu2 %v1590_v34  ;;  %v7515_v56 = vpop.eup %5242  ;;  %v10043_v8 = vld [vmem:[#allocation84_spill] sm:$0xff] }
 0x35d   : > { %4794 = vmatmul.msk.bf16.gmra.mxu1 %vm10038_vm7, %v10037_v17  ;;  %vm10044_vm8 = vnez %v10043_v8  ;;  %v1599_v2 = vadd.f32 %v7515_v56, %v7513_v55  ;;  %v7542_v8 = vsel %vm7145_vm0, -1e+30, %v1993_v27 }
 0x35e   : > { %5244 = vpow2.f32 %v1550_v35  ;;  %10045 = vst [vmem:[#allocation108_spill] sm:$0xff] %v7542_v8 }
 0x35f   : > { %5246 = vpow2.f32 %v1552_v51  ;;  %v2039_v35 = vpop.f32.mrf.mxu2  ;;  %v1498_v51 = vsub.f32 %v7163_v0, %v1460_v60 }
 0x360   : > { %v7528_v34 = vsel %vm10044_vm8, -1e+30, %v2039_v35  ;;  %v1548_v35 = vmul.f32 1.442695, %v1499_v59  ;;  %v1998_v27 = vpop.f32.mrf.mxu1 }
 0x361   : > { %v2115_v39 = vmax.f32 %v7523_v50, %v7528_v34  ;;  %v1546_v23 = vmul.f32 1.442695, %v1498_v51 }
 0x363   : > { %1600 = vadd.xlane.f32.xlu0 %v1599_v2  ;;  %5248 = vpow2.f32 %v1546_v23 }
 0x364   : > { %v7517_v47 = vpop.eup %5244  ;;  %2116 = vmax.xlane.f32.xlu2 %v2115_v39  ;;  %4801 = vmatmul.msk.bf16.gmra.mxu2 %vm10038_vm7, %v10027_v6  ;;  %5250 = vpow2.f32 %v1548_v35 }
 0x365   : > { %10039 = vst [vmem:[#allocation52_spill] sm:$0xff] %v7517_v47  ;;  %v7519_v21 = vpop.eup %5246 }
 0x366   : > { %10040 = vst [vmem:[#allocation107_spill] sm:$0xff] %v7519_v21  ;;  %v1605_v10 = vadd.f32 %v7519_v21, %v7517_v47  ;;  %v10046_v47 = vld [vmem:[#allocation86_spill] sm:$0xff] }
 0x367   : > { %v2042_v60 = vpop.f32.mrf.mxu2  ;;  %vm10047_vm14 = vnez %v10046_v47 }
 0x368   : > { %1606 = vadd.xlane.f32.xlu1 %v1605_v10  ;;  %v7547_v39 = vsel %vm10047_vm14, -1e+30, %v2042_v60  ;;  %v1466_v10 = vpop.xlane.xlu1 %1465  ;;  %v10053_v60 = vld [vmem:[#allocation91_spill] sm:$0xff] }
 0x369   : > { %10048 = vst [vmem:[#allocation109_spill] sm:$0xff] %v7547_v39  ;;  %v2118_v2 = vmax.f32 %v7542_v8, %v7547_v39  ;;  %v7553_v59 = vpop.eup %5248  ;;  %v1502_v57 = vsub.f32 %v10053_v60, %v1466_v10  ;;  %v2000_v60 = vpop.f32.mrf.mxu1 }
 0x36a   : > { %v1469_v0 = vpop.xlane.xlu2 %1468  ;;  %v7555_v23 = vpop.eup %5250 }
 0x36b   : > { %v1504_v44 = vsub.f32 %v7249_v16, %v1469_v0  ;;  %v1505_v21 = vsub.f32 %v7253_v1, %v1469_v0  ;;  %2119 = vmax.xlane.f32.xlu0 %v2118_v2  ;;  %v10049_v16 = vld [vmem:[#allocation60_spill] sm:$0xff]  ;;  %v10050_v0 = vld [vmem:[#allocation87_spill] sm:$0xff]  ;;  %v1554_v8 = vmul.f32 1.442695, %v1502_v57 }
 0x36c   : > { %vm10051_vm0 = vnez %v10050_v0  ;;  %v10057_v2 = vld [vmem:[#allocation92_spill] sm:$0xff] }
 0x36d   : > { %v1558_v6 = vmul.f32 1.442695, %v1504_v44  ;;  %v1560_v51 = vmul.f32 1.442695, %v1505_v21  ;;  %4795 = vmatmul.msk.bf16.gmra.mxu1 %vm10038_vm7, %v10049_v16  ;;  %v7559_v35 = vsel %vm10051_vm0, -1e+30, %v1995_v49  ;;  %v1503_v47 = vsub.f32 %v10057_v2, %v1466_v10 }
 0x36e   : > { %10052 = vst [vmem:[#allocation60_spill] sm:$0xff] %v7559_v35  ;;  %v10054_v44 = vld [vmem:[#allocation88_spill] sm:$0xff] }
 0x36f   : > { %5252 = vpow2.f32 %v1558_v6  ;;  %v2044_v1 = vpop.f32.mrf.mxu2  ;;  %vm10055_vm14 = vnez %v10054_v44  ;;  %v1602_v6 = vadd.f32 %v7555_v23, %v7553_v59  ;;  %v10059_v44 = vld [vmem:[#allocation89_spill] sm:$0xff] }
 0x370   : > { %5254 = vpow2.f32 %v1560_v51  ;;  %v7564_v21 = vsel %vm10055_vm14, -1e+30, %v2044_v1  ;;  %v1556_v51 = vmul.f32 1.442695, %v1503_v47  ;;  %vm10060_vm0 = vnez %v10059_v44  ;;  %v10066_v44 = vld [vmem:[#allocation94_spill] sm:$0xff] }
 0x371   : > { %10056 = vst [vmem:[#allocation91_spill] sm:$0xff] %v7564_v21  ;;  %v2121_v39 = vmax.f32 %v7559_v35, %v7564_v21  ;;  %v7580_v21 = vsel %vm10060_vm0, -1e+30, %v1998_v27  ;;  %5256 = vpow2.f32 %v1554_v8  ;;  %v10063_v27 = vld [vmem:[#allocation59_spill] sm:$0xff] }
 0x372   : > { %v1472_v0 = vpop.xlane.xlu1 %1471  ;;  %5258 = vpow2.f32 %v1556_v51  ;;  %v10064_v51 = vld [vmem:[#allocation93_spill] sm:$0xff] }
 0x373   : > { %2122 = vmax.xlane.f32.xlu2 %v2121_v39  ;;  %1603 = vadd.xlane.f32.xlu0 %v1602_v6  ;;  %v1506_v10 = vsub.f32 %v7275_v14, %v1472_v0  ;;  %v1507_v57 = vsub.f32 %v7279_v41, %v1472_v0  ;;  %v10061_v39 = vld [vmem:[#allocation90_spill] sm:$0xff]  ;;  %vm10065_vm0 = vnez %v10064_v51 }
 0x374   : > { %4802 = vmatmul.msk.bf16.gmra.mxu2 %vm10038_vm7, %v10037_v17  ;;  %vm10062_vm14 = vnez %v10061_v39 }
 0x375   : > { %v7573_v49 = vpop.eup %5252  ;;  %v1562_v14 = vmul.f32 1.442695, %v1506_v10  ;;  %v1564_v35 = vmul.f32 1.442695, %v1507_v57  ;;  %v2003_v57 = vpop.f32.mrf.mxu1 }
 0x376   : > { %v7575_v1 = vpop.eup %5254 }
 0x377   : > { %10058 = vst [vmem:[#allocation92_spill] sm:$0xff] %v7575_v1  ;;  %v2047_v2 = vpop.f32.mrf.mxu2  ;;  %v1611_v17 = vadd.f32 %v7575_v1, %v7573_v49  ;;  %v7593_v8 = vpop.eup %5256  ;;  %5260 = vpow2.f32 %v1562_v14  ;;  %v10071_v1 = vld [vmem:[#allocation46_spill] sm:$0xff] }
 0x378   : > { %v7585_v6 = vsel %vm10062_vm14, -1e+30, %v2047_v2  ;;  %v7595_v41 = vpop.eup %5258  ;;  %v7599_v2 = vsel %vm10065_vm0, -1e+30, %v2000_v60  ;;  %5262 = vpow2.f32 %v1564_v35  ;;  %vm10067_vm14 = vnez %v10066_v44 }
 0x379   : > { %v2124_v47 = vmax.f32 %v7580_v21, %v7585_v6  ;;  %v1608_v39 = vadd.f32 %v7595_v41, %v7593_v8  ;;  %vm10070_vm0 = vnez %v9991_v63 }
 0x37b   : > { %1612 = vadd.xlane.f32.xlu2 %v1611_v17  ;;  %2125 = vmax.xlane.f32.xlu0 %v2124_v47 }
 0x37d   : > { %4796 = vmatmul.msk.bf16.gmra.mxu1 %vm10038_vm7, %v10063_v27  ;;  %v7613_v60 = vpop.eup %5260 }
 0x37e   : > { %10068 = vst [vmem:[#allocation59_spill] sm:$0xff] %v7613_v60  ;;  %v7615_v35 = vpop.eup %5262 }
 0x37f   : > { %v2049_v0 = vpop.f32.mrf.mxu2  ;;  %10069 = vst [vmem:[#allocation110_spill] sm:$0xff] %v7615_v35 }
 0x380   : > { %v7603_v10 = vsel %vm10067_vm14, -1e+30, %v2049_v0  ;;  %v7619_v0 = vsel %vm7261_vm13, -1e+30, %v2003_v57  ;;  %vm10072_vm13 = vnez %v9996_v58  ;;  %vm10077_vm14 = vmmov %vm10038_vm7 }
 0x381   : > { %v2127_v17 = vmax.f32 %v7599_v2, %v7603_v10 }
 0x382   : > { %v7607_v47 = vpop.xlane.xlu0 %1477 }
 0x383   : > { %2128 = vmax.xlane.f32.xlu1 %v2127_v17  ;;  %1609 = vadd.xlane.f32.xlu0 %v1608_v39  ;;  %v1614_v17 = vadd.f32 %v7615_v35, %v7613_v60 }
 0x384   : > { %4803 = vmatmul.msk.bf16.gmra.mxu2 %vm10038_vm7, %v10049_v16  ;;  %v2005_v16 = vpop.f32.mrf.mxu1 }
 0x387   : > { %v2052_v14 = vpop.f32.mrf.mxu2 }
 0x388   : > { %v7623_v51 = vsel %vm10070_vm0, -1e+30, %v2052_v14  ;;  %v7634_v14 = vsel %vm10072_vm13, -1e+30, %v2005_v16  ;;  %vm10073_vm0 = vnez %v9999_v33  ;;  %vm10074_vm13 = vnez %v10005_v15 }
 0x389   : > { %v2130_v39 = vmax.f32 %v7619_v0, %v7623_v51 }
 0x38a   : > { %v1481_v44 = vpop.xlane.xlu0 %1480 }
 0x38b   : > { %1615 = vadd.xlane.f32.xlu1 %v1614_v17  ;;  %2131 = vmax.xlane.f32.xlu0 %v2130_v39  ;;  %v1512_v57 = vsub.f32 %v7350_v52, %v1481_v44  ;;  %v1513_v63 = vsub.f32 %v7354_v45, %v1481_v44  ;;  %v1475_v44 = vpop.xlane.xlu2 %1474 }
 0x38c   : > { %v2008_v52 = vpop.f32.mrf.mxu1 }
 0x38d   : > { %4805 = vmatmul.msk.bf16.vlgmr.msrb.gmra.mxu1 %vm10038_vm7, %v10071_v1  ;;  %v1574_v39 = vmul.f32 1.442695, %v1512_v57  ;;  %v1576_v60 = vmul.f32 1.442695, %v1513_v63  ;;  %v7647_v16 = vsel %vm10074_vm13, -1e+30, %v2008_v52 }
 0x38e   : > { %v10076_v63 = vld [vmem:[#allocation49_spill] sm:$0xff] }
 0x38f   : > { %v2054_v24 = vpop.f32.mrf.mxu2  ;;  %5264 = vpow2.f32 %v1574_v39 }
 0x390   : > { %v7639_v35 = vsel %vm10073_vm0, -1e+30, %v2054_v24  ;;  %5266 = vpow2.f32 %v1576_v60  ;;  %vm10075_vm0 = vnez %v10008_v3 }
 0x391   : > { %v2133_v17 = vmax.f32 %v7634_v14, %v7639_v35 }
 0x393   : > { %2134 = vmax.xlane.f32.xlu2 %v2133_v17 }
 0x394   : > { %4804 = vmatmul.msk.bf16.gmra.mxu2 %vm10038_vm7, %v10063_v27 }
 0x395   : > { %v7657_v27 = vpop.eup %5264 }
 0x396   : > { %v7659_v57 = vpop.eup %5266 }
 0x397   : > { %v2057_v58 = vpop.f32.mrf.mxu2  ;;  %10078 = vst [vmem:[#allocation46_spill] sm:$0xff] %v7659_v57 }
 0x398   : > { %v7651_v24 = vsel %vm10075_vm0, -1e+30, %v2057_v58  ;;  %v10079_v58 = vld [vmem:[#allocation42_spill] sm:$0xff] }
 0x399   : > { %v2136_v45 = vmax.f32 %v7647_v16, %v7651_v24 }
 0x39b   : > { %2137 = vmax.xlane.f32.xlu1 %v2136_v45  ;;  %v2096_v17 = vpop.xlane.xlu0 %2095  ;;  %v1623_v45 = vadd.f32 %v7659_v57, %v7657_v27  ;;  %v1583_v3 = vpop.xlane.xlu2 %1582 }
 0x39c   : > { %v2142_v39 = vsub.f32 %v7376_v62, %v2096_v17  ;;  %v2143_v60 = vsub.f32 %v7380_v29, %v2096_v17  ;;  %v2010_v57 = vpop.f32.mrf.mxu1 }
 0x39d   : > { %4806 = vmatmul.msk.bf16.gmra.mxu1 %vm10077_vm14, %v10076_v63  ;;  %vm10080_vm14 = vmmov %vm10038_vm7 }
 0x39e   : > { %v2174_v52 = vmul.f32 1.442695, %v2142_v39  ;;  %v2176_v15 = vmul.f32 1.442695, %v2143_v60 }
 0x39f   : > { %3232 = vrot.lane.b32.xlu0 %v10079_v58, %s6022_s21  ;;  %v2059_v29 = vpop.f32.mrf.mxu2 }
 0x3a0   : > { %5268 = vpow2.f32 %v2174_v52 }
 0x3a1   : > { %5270 = vpow2.f32 %v2176_v15 }
 0x3a2   : > { %5272 = vrcp.f32 %v1583_v3 }
 0x3a3   : > { %1624 = vadd.xlane.f32.xlu1 %v1623_v45  ;;  %v1580_v33 = vpop.xlane.xlu0 %1579 }
 0x3a4   : > { %4813 = vmatmul.msk.bf16.vlgmr.msra.gmra.mxu2 %vm10080_vm14, %v10071_v1  ;;  %5274 = vrcp.f32 %v1580_v33 }
 0x3a6   : > { %v7669_v62 = vpop.eup %5268 }
 0x3a7   : > { %10081 = vst [vmem:[#allocation49_spill] sm:$0xff] %v7669_v62  ;;  %v7671_v17 = vpop.eup %5270 }
 0x3a8   : > { %10082 = vst [vmem:[#allocation42_spill] sm:$0xff] %v7671_v17  ;;  %v5273_v39 = vpop.eup %5272  ;;  %v2238_v60 = vadd.f32 %v7671_v17, %v7669_v62  ;;  %v10087_v62 = vld [vmem:[#allocation105_spill] sm:$0xff] }
 0x3a9   : > { %v7676_v15 = vmul.f32 %v5273_v39, %v7370_v48  ;;  %v7679_v1 = vmul.f32 %v5273_v39, %v7372_v36  ;;  %vm10088_vm7 = vnez %v10087_v62  ;;  %v2673_v62 = vpop.f32.mrf.mxu1 }
 0x3aa   : > { %v5275_v58 = vpop.eup %5274 }
 0x3ab   : > { %2239 = vadd.xlane.f32.xlu1 %v2238_v60  ;;  %10083 = vst [vmem:[#allocation111_spill] sm:$0xff] %v7676_v15  ;;  %v7682_v33 = vmul.f32 %v5275_v58, %v7388_v18  ;;  %v7685_v3 = vmul.f32 %v5275_v58, %v7390_v19  ;;  %v2099_v52 = vpop.xlane.xlu0 %2098  ;;  %v7691_v60 = vsel %vm7343_vm11, -1e+30, %v2059_v29  ;;  %v7699_v19 = vsel %vm10088_vm7, -1e+30, %v2010_v57  ;;  %v2722_v58 = vpop.f32.mrf.mxu2 }
 0x3ac   : > { %10084 = vst [vmem:[#allocation112_spill] sm:$0xff] %v7679_v1  ;;  %v2144_v45 = vsub.f32 %v7407_v32, %v2099_v52  ;;  %v2145_v17 = vsub.f32 %v7402_v61, %v2099_v52  ;;  %v10089_v32 = vld [vmem:[#allocation99_spill] sm:$0xff]  ;;  %v2139_v29 = vmax.f32 %v7699_v19, %v7691_v60  ;;  %v10090_v52 = vld [vmem:[#allocation100_spill] sm:$0xff] }
 0x3ad   : > { %10085 = vst [vmem:[#allocation113_spill] sm:$0xff] %v7682_v33  ;;  %v1706_v48 = vpack.c.bf16 %v7676_v15, %v7682_v33  ;;  %v1707_v36 = vpack.c.bf16 %v7679_v1, %v7685_v3  ;;  %v1508_v61 = vsub.f32 %v10089_v32, %v1475_v44  ;;  %v1509_v40 = vsub.f32 %v10090_v52, %v1475_v44 }
 0x3ae   : > { %10086 = vst [vmem:[#allocation114_spill] sm:$0xff] %v7685_v3  ;;  %v2178_v18 = vmul.f32 1.442695, %v2144_v45  ;;  %v2180_v39 = vmul.f32 1.442695, %v2145_v17 }
 0x3af   : > { %1730 = vmatmul.bf16.vlgmr.msra.gmra.mxu3 %v1706_v48  ;;  %1779 = vmatmul.bf16.vlgmr.msra.gmra.mxu0 %v1707_v36  ;;  %v1566_v57 = vmul.f32 1.442695, %v1508_v61  ;;  %v1568_v32 = vmul.f32 1.442695, %v1509_v40  ;;  %v10091_v61 = vld [vmem:[#allocation103_spill] sm:$0xff] }
 0x3b0   : > { %5276 = vpow2.f32 %v2178_v18 }
 0x3b1   : > { %5278 = vpow2.f32 %v2180_v39 }
 0x3b2   : > { %5280 = vpow2.f32 %v1566_v57  ;;  %v2675_v57 = vpop.f32.mrf.mxu1 }
 0x3b3   : > { %2140 = vmax.xlane.f32.xlu1 %v2139_v29  ;;  %v2105_v17 = vpop.xlane.xlu2 %2104  ;;  %v2102_v45 = vpop.xlane.xlu0 %2101  ;;  %5282 = vpow2.f32 %v1568_v32  ;;  %v10092_v29 = vld [vmem:[#allocation104_spill] sm:$0xff] }
 0x3b4   : > { %4814 = vmatmul.msk.bf16.gmra.mxu2 %vm10080_vm14, %v10076_v63  ;;  %v2146_v48 = vsub.f32 %v7420_v13, %v2102_v45  ;;  %v2147_v36 = vsub.f32 %v7416_v28, %v2102_v45  ;;  %v2724_v39 = vpop.f32.mrf.mxu2  ;;  %v1510_v13 = vsub.f32 %v10091_v61, %v7607_v47  ;;  %v1511_v52 = vsub.f32 %v10092_v29, %v7607_v47 }
 0x3b6   : > { %v7709_v18 = vpop.eup %5276  ;;  %v2182_v1 = vmul.f32 1.442695, %v2146_v48  ;;  %v2184_v44 = vmul.f32 1.442695, %v2147_v36  ;;  %v1570_v36 = vmul.f32 1.442695, %v1510_v13  ;;  %v2149_v13 = vsub.f32 %v7429_v38, %v2105_v17 }
 0x3b7   : > { %v7711_v15 = vpop.eup %5278 }
 0x3b8   : > { %v2241_v63 = vadd.f32 %v7711_v15, %v7709_v18  ;;  %5284 = vpow2.f32 %v2182_v1  ;;  %v7719_v45 = vpop.eup %5280  ;;  %v1572_v1 = vmul.f32 1.442695, %v1511_v52 }
 0x3b9   : > { %5286 = vpow2.f32 %v2184_v44  ;;  %v7721_v48 = vpop.eup %5282  ;;  %v2148_v44 = vsub.f32 %v7424_v30, %v2105_v17 }
 0x3ba   : > { %2242 = vadd.xlane.f32.xlu2 %v2241_v63  ;;  %v1617_v30 = vadd.f32 %v7721_v48, %v7719_v45  ;;  %v2678_v17 = vpop.f32.mrf.mxu1 }
 0x3bb   : > { %v1589_v28 = vpop.xlane.xlu2 %1588  ;;  %v1586_v40 = vpop.xlane.xlu0 %1585 }
 0x3bc   : > { %5288 = vrcp.f32 %v1589_v28  ;;  %v2727_v33 = vpop.f32.mrf.mxu2 }
 0x3bd   : > { %5290 = vrcp.f32 %v1586_v40 }
 0x3be   : > { %v7723_v32 = vpop.eup %5284  ;;  %5292 = vpow2.f32 %v1570_v36 }
 0x3bf   : > { %10093 = vst [vmem:[#allocation99_spill] sm:$0xff] %v7723_v32  ;;  %v7725_v63 = vpop.eup %5286  ;;  %5294 = vpow2.f32 %v1572_v1  ;;  %v2188_v1 = vmul.f32 1.442695, %v2149_v13 }
 0x3c0   : > { %10094 = vst [vmem:[#allocation100_spill] sm:$0xff] %v7725_v63  ;;  %v2244_v3 = vadd.f32 %v7725_v63, %v7723_v32 }
 0x3c2   : > { %v5289_v61 = vpop.eup %5288  ;;  %2245 = vadd.xlane.f32.xlu2 %v2244_v3 }
 0x3c3   : > { %v5291_v47 = vpop.eup %5290  ;;  %v2108_v28 = vpop.xlane.xlu2 %2107  ;;  %v7731_v40 = vmul.f32 %v5289_v61, %v7442_v22  ;;  %v7734_v29 = vmul.f32 %v5289_v61, %v7445_v54  ;;  %v2186_v22 = vmul.f32 1.442695, %v2148_v44  ;;  %v7747_v54 = vsel %vm6917_vm2, -1e+30, %v2722_v58 }
 0x3c4   : > { %v1595_v52 = vpop.xlane.xlu0 %1594  ;;  %v7740_v63 = vmul.f32 %v5291_v47, %v7436_v37  ;;  %v7743_v36 = vmul.f32 %v5291_v47, %v7438_v9  ;;  %v7753_v61 = vpop.eup %5292  ;;  %v7757_v9 = vsel %vm6911_vm1, -1e+30, %v2673_v62  ;;  %v2150_v47 = vsub.f32 %v7467_v5, %v2108_v28  ;;  %v10118_v37 = vld [vmem:[#allocation109_spill] sm:$0xff] }
 0x3c5   : > { %10095 = vst [vmem:[#allocation103_spill] sm:$0xff] %v7731_v40  ;;  %v7759_v44 = vpop.eup %5294  ;;  %5296 = vpow2.f32 %v2186_v22  ;;  %v2794_v58 = vmax.f32 %v7757_v9, %v7747_v54  ;;  %v2111_v22 = vpop.xlane.xlu1 %2110 }
 0x3c6   : > { %10096 = vst [vmem:[#allocation104_spill] sm:$0xff] %v7734_v29  ;;  %v1708_v38 = vpack.c.bf16 %v7731_v40, %v7740_v63  ;;  %v1709_v3 = vpack.c.bf16 %v7734_v29, %v7743_v36  ;;  %5298 = vrcp.f32 %v1595_v52  ;;  %v7773_v5 = vpop.f32.mrf.mxu2  ;;  %v2190_v52 = vmul.f32 1.442695, %v2150_v47 }
 0x3c7   : > { %10097 = vst [vmem:[#allocation115_spill] sm:$0xff] %v7740_v63  ;;  %5300 = vpow2.f32 %v2188_v1  ;;  %v2153_v47 = vsub.f32 %v7477_v43, %v2111_v22 }
 0x3c8   : > { %10098 = vst [vmem:[#allocation116_spill] sm:$0xff] %v7743_v36  ;;  %1735 = vmatmul.bf16.gmra.mxu3 %v1708_v38  ;;  %1784 = vmatmul.bf16.gmra.mxu0 %v1709_v3  ;;  %v2151_v36 = vsub.f32 %v7460_v31, %v2108_v28  ;;  %v1620_v38 = vadd.f32 %v7759_v44, %v7753_v61  ;;  %v7771_v3 = vsel %vm6948_vm3, -1e+30, %v2724_v39  ;;  %v7779_v31 = vsel %vm6953_vm4, -1e+30, %v2675_v57 }
 0x3c9   : > { %1618 = vadd.xlane.f32.xlu0 %v1617_v30  ;;  %v10101_v30 = vld [vmem:[#allocation45_spill] sm:$0xff]  ;;  %v2152_v28 = vsub.f32 %v7472_v26, %v2111_v22  ;;  %v2797_v39 = vmax.f32 %v7779_v31, %v7771_v3 }
 0x3ca   : > { %2795 = vmax.xlane.f32.xlu2 %v2794_v58  ;;  %v2192_v1 = vmul.f32 1.442695, %v2151_v36  ;;  %v10102_v36 = vld [vmem:[#allocation40_spill] sm:$0xff] }
 0x3cb   : > { %v2194_v40 = vmul.f32 1.442695, %v2152_v28 }
 0x3cc   : > { %3234 = vrot.lane.b32.xlu1 %v10101_v30, %s6022_s21  ;;  %v7775_v30 = vpop.eup %5296 }
 0x3cd   : > { %v5299_v63 = vpop.eup %5298 }
 0x3ce   : > { %v2114_v62 = vpop.xlane.xlu0 %2113  ;;  %v7782_v58 = vpop.eup %5300  ;;  %v7795_v26 = vmul.f32 %v5299_v63, %v7456_v25  ;;  %v7803_v43 = vmul.f32 %v5299_v63, %v7462_v12 }
 0x3cf   : > { %v1592_v13 = vpop.xlane.xlu2 %1591  ;;  %v2247_v46 = vadd.f32 %v7782_v58, %v7775_v30  ;;  %v2732_v12 = vpop.f32.mrf.mxu2 }
 0x3d0   : > { %5302 = vrcp.f32 %v1592_v13  ;;  %v7784_v13 = vpop.f32.mrf.mxu1  ;;  %10104 = vst [vmem:[#allocation40_spill] sm:$0xff] %v7795_v26  ;;  %v1598_v63 = vpop.xlane.xlu1 %1597 }
 0x3d1   : > { %1621 = vadd.xlane.f32.xlu0 %v1620_v38  ;;  %5304 = vpow2.f32 %v2190_v52  ;;  %10106 = vst [vmem:[#allocation118_spill] sm:$0xff] %v7803_v43 }
 0x3d2   : > { %5306 = vpow2.f32 %v2192_v1  ;;  %2798 = vmax.xlane.f32.xlu2 %v2797_v39  ;;  %v2196_v1 = vmul.f32 1.442695, %v2153_v47 }
 0x3d3   : > { %5308 = vpow2.f32 %v2194_v40 }
 0x3d4   : > { %3236 = vrot.lane.b32.xlu1 %v10102_v36, %s6022_s21  ;;  %v2155_v36 = vsub.f32 %v7503_v4, %v2114_v62 }
 0x3d6   : > { %v5303_v29 = vpop.eup %5302  ;;  %v1601_v57 = vpop.xlane.xlu0 %1600 }
 0x3d7   : > { %v7792_v38 = vmul.f32 %v5303_v29, %v7485_v42  ;;  %v7800_v53 = vmul.f32 %v5303_v29, %v7487_v7  ;;  %v7809_v42 = vsel %vm6965_vm6, -1e+30, %v2727_v33  ;;  %v7813_v28 = vpop.eup %5304  ;;  %v7817_v7 = vsel %vm6957_vm5, -1e+30, %v2678_v17 }
 0x3d8   : > { %v7819_v29 = vpop.eup %5306  ;;  %5310 = vrcp.f32 %v1601_v57  ;;  %v2154_v33 = vsub.f32 %v7499_v11, %v2114_v62  ;;  %v2683_v47 = vpop.f32.mrf.mxu1  ;;  %v7831_v57 = vsel %vm7033_vm10, -1e+30, %v2732_v12 }
 0x3d9   : > { %10103 = vst [vmem:[#allocation45_spill] sm:$0xff] %v7792_v38  ;;  %v1710_v22 = vpack.c.bf16 %v7795_v26, %v7792_v38  ;;  %2248 = vadd.xlane.f32.xlu0 %v2247_v46  ;;  %v1711_v25 = vpack.c.bf16 %v7803_v43, %v7800_v53  ;;  %v2800_v46 = vmax.f32 %v7817_v7, %v7809_v42  ;;  %5312 = vpow2.f32 %v2196_v1  ;;  %v2117_v11 = vpop.xlane.xlu2 %2116  ;;  %v2734_v43 = vpop.f32.mrf.mxu2 }
 0x3da   : > { %10105 = vst [vmem:[#allocation117_spill] sm:$0xff] %v7800_v53  ;;  %5314 = vrcp.f32 %v1598_v63  ;;  %v2250_v40 = vadd.f32 %v7819_v29, %v7813_v28  ;;  %v2200_v53 = vmul.f32 1.442695, %v2155_v36  ;;  %v7837_v4 = vsel %vm7029_vm9, -1e+30, %v2683_v47 }
 0x3db   : > { %1740 = vmatmul.bf16.gmra.mxu3 %v1710_v22  ;;  %1789 = vmatmul.bf16.gmra.mxu0 %v1711_v25  ;;  %v7827_v22 = vpop.eup %5308  ;;  %v2198_v25 = vmul.f32 1.442695, %v2154_v33  ;;  %v2156_v12 = vsub.f32 %v7523_v50, %v2117_v11  ;;  %v7859_v52 = vsel %vm10030_vm15, -1e+30, %v2734_v43  ;;  %vm10136_vm15 = vcmask 261120  }
 0x3dc   : > { %2801 = vmax.xlane.f32.xlu2 %v2800_v46  ;;  %v2806_v46 = vmax.f32 %v7837_v4, %v7831_v57  ;;  %vm10137_vm9 = vmmov %vm10136_vm15 }
 0x3dd   : > { %5316 = vpow2.f32 %v2198_v25  ;;  %v10114_v25 = vld [vmem:[#allocation50_spill] sm:$0xff] }
 0x3de   : > { %v2120_v17 = vpop.xlane.xlu0 %2119  ;;  %v5311_v1 = vpop.eup %5310  ;;  %5318 = vpow2.f32 %v2200_v53  ;;  %v2202_v53 = vmul.f32 1.442695, %v2156_v12 }
 0x3df   : > { %v7833_v38 = vpop.eup %5312  ;;  %v7843_v33 = vmul.f32 %v5311_v1, %v7513_v55  ;;  %v7846_v36 = vmul.f32 %v5311_v1, %v7515_v56  ;;  %v1607_v56 = vpop.xlane.xlu1 %1606  ;;  %v10117_v1 = vld [vmem:[#allocation108_spill] sm:$0xff] }
 0x3e0   : > { %v5315_v62 = vpop.eup %5314  ;;  %v2253_v63 = vadd.f32 %v7833_v38, %v7827_v22  ;;  %v2685_v50 = vpop.f32.mrf.mxu1  ;;  %5320 = vrcp.f32 %v1607_v56 }
 0x3e1   : > { %2251 = vadd.xlane.f32.xlu0 %v2250_v40  ;;  %10110 = vst [vmem:[#allocation119_spill] sm:$0xff] %v7843_v33  ;;  %v2157_v40 = vsub.f32 %v7528_v34, %v2117_v11  ;;  %v7852_v26 = vmul.f32 %v5315_v62, %v10112_v20  ;;  %v7855_v39 = vmul.f32 %v5315_v62, %v10114_v25  ;;  %v7871_v43 = vsel %vm10029_vm12, -1e+30, %v2685_v50 }
 0x3e2   : > { %10111 = vst [vmem:[#allocation120_spill] sm:$0xff] %v7846_v36  ;;  %v2158_v34 = vsub.f32 %v10117_v1, %v2120_v17  ;;  %v2159_v62 = vsub.f32 %v10118_v37, %v2120_v17 }
 0x3e3   : > { %10113 = vst [vmem:[#allocation58_spill] sm:$0xff] %v7852_v26  ;;  %v1712_v11 = vpack.c.bf16 %v7843_v33, %v7852_v26  ;;  %v1713_v20 = vpack.c.bf16 %v7846_v36, %v7855_v39  ;;  %v7867_v25 = vpop.eup %5316 }
 0x3e4   : > { %2807 = vmax.xlane.f32.xlu2 %v2806_v46  ;;  %10115 = vst [vmem:[#allocation50_spill] sm:$0xff] %v7855_v39  ;;  %v2204_v46 = vmul.f32 1.442695, %v2157_v40  ;;  %v7873_v12 = vpop.eup %5318  ;;  %v2206_v1 = vmul.f32 1.442695, %v2158_v34 }
 0x3e5   : > { %v2208_v40 = vmul.f32 1.442695, %v2159_v62  ;;  %v2256_v56 = vadd.f32 %v7873_v12, %v7867_v25 }
 0x3e6   : > { %v1604_v47 = vpop.xlane.xlu0 %1603 }
 0x3e7   : > { %5322 = vrcp.f32 %v1604_v47 }
 0x3e8   : > { %5324 = vpow2.f32 %v2202_v53 }
 0x3e9   : > { %2254 = vadd.xlane.f32.xlu0 %v2253_v63  ;;  %v2809_v63 = vmax.f32 %v7871_v43, %v7859_v52  ;;  %5326 = vpow2.f32 %v2204_v46 }
 0x3ea   : > { %5328 = vpow2.f32 %v2206_v1 }
 0x3eb   : > { %1745 = vmatmul.bf16.gmra.mxu3 %v1712_v11  ;;  %1794 = vmatmul.bf16.gmra.mxu0 %v1713_v20  ;;  %v5321_v11 = vpop.eup %5320  ;;  %v7881_v20 = vpop.xlane.xlu2 %2122  ;;  %5330 = vpow2.f32 %v2208_v40 }
 0x3ec   : > { %2810 = vmax.xlane.f32.xlu2 %v2809_v63 }
 0x3ed   : > { %v5323_v53 = vpop.eup %5322 }
 0x3ee   : > { %v2126_v37 = vpop.xlane.xlu0 %2125  ;;  %v7883_v34 = vpop.eup %5324  ;;  %v7891_v62 = vmul.f32 %v5323_v53, %v7555_v23 }
 0x3ef   : > { %v2162_v17 = vsub.f32 %v7580_v21, %v2126_v37  ;;  %v2163_v50 = vsub.f32 %v7585_v6, %v2126_v37  ;;  %v7885_v46 = vpop.eup %5326  ;;  %v7888_v6 = vmul.f32 %v5323_v53, %v7553_v59 }
 0x3f0   : > { %10121 = vst [vmem:[#allocation109_spill] sm:$0xff] %v7891_v62  ;;  %v7895_v37 = vpop.eup %5328  ;;  %v2259_v40 = vadd.f32 %v7885_v46, %v7883_v34 }
 0x3f1   : > { %v2214_v47 = vmul.f32 1.442695, %v2162_v17  ;;  %v2216_v39 = vmul.f32 1.442695, %v2163_v50  ;;  %2257 = vadd.xlane.f32.xlu0 %v2256_v56  ;;  %10120 = vst [vmem:[#allocation108_spill] sm:$0xff] %v7888_v6  ;;  %v10122_v17 = vld [vmem:[#allocation52_spill] sm:$0xff]  ;;  %v7905_v59 = vpop.eup %5330 }
 0x3f2   : > { %v7900_v50 = vmul.f32 %v5321_v11, %v10122_v17 }
 0x3f3   : > { %5332 = vpow2.f32 %v2214_v47  ;;  %v1613_v17 = vpop.xlane.xlu2 %1612 }
 0x3f4   : > { %5334 = vpow2.f32 %v2216_v39  ;;  %10123 = vst [vmem:[#allocation52_spill] sm:$0xff] %v7900_v50  ;;  %v10124_v39 = vld [vmem:[#allocation107_spill] sm:$0xff] }
 0x3f5   : > { %v7903_v56 = vmul.f32 %v5321_v11, %v10124_v39 }
 0x3f6   : > { %v2129_v21 = vpop.xlane.xlu1 %2128 }
 0x3f7   : > { %v2164_v63 = vsub.f32 %v7599_v2, %v2129_v21  ;;  %v2165_v1 = vsub.f32 %v7603_v10, %v2129_v21  ;;  %10125 = vst [vmem:[#allocation107_spill] sm:$0xff] %v7903_v56  ;;  %v1610_v2 = vpop.xlane.xlu0 %1609  ;;  %v1714_v10 = vpack.c.bf16 %v7900_v50, %v7888_v6  ;;  %v1715_v21 = vpack.c.bf16 %v7903_v56, %v7891_v62  ;;  %v10133_v62 = vld [vmem:[#allocation92_spill] sm:$0xff] }
 0x3f9   : > { %v2218_v47 = vmul.f32 1.442695, %v2164_v63  ;;  %v2220_v23 = vmul.f32 1.442695, %v2165_v1  ;;  %v7907_v53 = vpop.eup %5332  ;;  %2260 = vadd.xlane.f32.xlu0 %v2259_v40  ;;  %v2262_v63 = vadd.f32 %v7905_v59, %v7895_v37 }
 0x3fa   : > { %v7913_v26 = vpop.eup %5334 }
 0x3fb   : > { %5336 = vpow2.f32 %v2218_v47  ;;  %1750 = vmatmul.bf16.gmra.mxu3 %v1714_v10  ;;  %1799 = vmatmul.bf16.gmra.mxu0 %v1715_v21  ;;  %v2268_v11 = vadd.f32 %v7913_v26, %v7907_v53  ;;  %v10126_v47 = vld [vmem:[#allocation76_spill] sm:$0xff]  ;;  %v10128_v21 = vld [vmem:[#allocation75_spill] sm:$0xff] }
 0x3fc   : > { %5338 = vpow2.f32 %v2220_v23  ;;  %vm10127_vm14 = vnez %v10126_v47  ;;  %vm10129_vm12 = vnez %v10128_v21 }
 0x3fd   : > { %5340 = vrcp.f32 %v1610_v2  ;;  %2269 = vadd.xlane.f32.xlu2 %v2268_v11  ;;  %v7926_v23 = vsel %vm10127_vm14, -1e+30, %v7773_v5  ;;  %v7933_v11 = vsel %vm10129_vm12, -1e+30, %v7784_v13 }
 0x3fe   : > { %5342 = vrcp.f32 %v1613_v17  ;;  %2263 = vadd.xlane.f32.xlu1 %v2262_v63  ;;  %v2803_v17 = vmax.f32 %v7933_v11, %v7926_v23  ;;  %v1616_v63 = vpop.xlane.xlu1 %1615 }
 0x3ff   : > { %v2132_v13 = vpop.xlane.xlu0 %2131 }
 0x400   : > { %v2167_v21 = vsub.f32 %v7623_v51, %v2132_v13 }
 0x401   : > { %v7919_v1 = vpop.eup %5336 }
 0x402   : > { %v7921_v40 = vpop.eup %5338 }
 0x403   : > { %v5341_v39 = vpop.eup %5340  ;;  %v2271_v10 = vadd.f32 %v7921_v40, %v7919_v1 }
 0x404   : > { %v5343_v2 = vpop.eup %5342  ;;  %v7938_v56 = vmul.f32 %v5341_v39, %v7593_v8  ;;  %v7941_v5 = vmul.f32 %v5341_v39, %v7595_v41  ;;  %v10135_v8 = vld [vmem:[#allocation41_spill] sm:$0xff] }
 0x405   : > { %2272 = vadd.xlane.f32.xlu2 %v2271_v10  ;;  %v7944_v50 = vmul.f32 %v5343_v2, %v7573_v49  ;;  %v7947_v6 = vmul.f32 %v5343_v2, %v10133_v62  ;;  %v10138_v62 = vld [vmem:[#allocation56_spill] sm:$0xff] }
 0x406   : > { %10130 = vst [vmem:[#allocation121_spill] sm:$0xff] %v7938_v56  ;;  %2804 = vmax.xlane.f32.xlu1 %v2803_v17  ;;  %v10139_v17 = vld [vmem:[#allocation60_spill] sm:$0xff] }
 0x407   : > { %10131 = vst [vmem:[#allocation122_spill] sm:$0xff] %v7941_v5  ;;  %v1716_v32 = vpack.c.bf16 %v7944_v50, %v7938_v56  ;;  %v1717_v10 = vpack.c.bf16 %v7947_v6, %v7941_v5  ;;  %v2135_v5 = vpop.xlane.xlu2 %2134 }
 0x408   : > { %10132 = vst [vmem:[#allocation123_spill] sm:$0xff] %v7944_v50 }
 0x409   : > { %10134 = vst [vmem:[#allocation92_spill] sm:$0xff] %v7947_v6 }
 0x40b   : > { %1755 = vmatmul.bf16.gmra.mxu3 %v1716_v32  ;;  %1804 = vmatmul.bf16.gmra.mxu0 %v1717_v10  ;;  %v2160_v32 = vsub.f32 %v10139_v17, %v7881_v20  ;;  %v10140_v10 = vld [vmem:[#allocation91_spill] sm:$0xff] }
 0x40c   : > { %v2161_v6 = vsub.f32 %v10140_v10, %v7881_v20 }
 0x40d   : > { %3238 = vrot.lane.b32.xlu0 %v10135_v8, %s6022_s21  ;;  %v2210_v8 = vmul.f32 1.442695, %v2160_v32  ;;  %v2224_v32 = vmul.f32 1.442695, %v2167_v21 }
 0x40e   : > { %v2138_v41 = vpop.xlane.xlu1 %2137  ;;  %v2212_v50 = vmul.f32 1.442695, %v2161_v6 }
 0x40f   : > { %5344 = vpow2.f32 %v2210_v8  ;;  %v2170_v51 = vsub.f32 %v7647_v16, %v2138_v41 }
 0x410   : > { %5346 = vpow2.f32 %v2212_v50 }
 0x411   : > { %v3233_v39 = vpop.permute.xlu0 %3232 }
 0x412   : > { %4807 = vmatmul.msk.bf16.gmra.mxu1 %vm10136_vm15, %v3233_v39  ;;  %4815 = vmatmul.msk.bf16.gmra.mxu2 %vm10137_vm9, %v3233_v39  ;;  %vm10143_vm15 = vmmov %vm10137_vm9 }
 0x415   : > { %v7973_v6 = vpop.eup %5344 }
 0x416   : > { %v7957_v49 = vpop.xlane.xlu1 %1624  ;;  %v7975_v10 = vpop.eup %5346 }
 0x41d   : > { %3096 = vrot.lane.b32.xlu2 %v10138_v62, %s6024_s27  ;;  %v2166_v62 = vsub.f32 %v7619_v0, %v2132_v13  ;;  %v2171_v0 = vsub.f32 %v7651_v24, %v2138_v41 }
 0x41e   : > { %v7961_v2 = vpop.xlane.xlu1 %2239 }
 0x41f   : > { %v2222_v17 = vmul.f32 1.442695, %v2166_v62  ;;  %v2232_v16 = vmul.f32 1.442695, %v2171_v0 }
 0x426   : > { %v2141_v56 = vpop.xlane.xlu1 %2140 }
 0x427   : > { %v2172_v55 = vsub.f32 %v7699_v19, %v2141_v56  ;;  %v2173_v39 = vsub.f32 %v7691_v60, %v2141_v56  ;;  %v2168_v60 = vsub.f32 %v7634_v14, %v2135_v5  ;;  %v2265_v14 = vadd.f32 %v7975_v10, %v7973_v6 }
 0x429   : > { %v2234_v36 = vmul.f32 1.442695, %v2172_v55  ;;  %v2236_v33 = vmul.f32 1.442695, %v2173_v39  ;;  %v2169_v55 = vsub.f32 %v7639_v35, %v2135_v5  ;;  %v2226_v21 = vmul.f32 1.442695, %v2168_v60 }
 0x42a   : > { %v2230_v5 = vmul.f32 1.442695, %v2170_v51 }
 0x42b   : > { %5348 = vpow2.f32 %v2234_v36  ;;  %v2228_v35 = vmul.f32 1.442695, %v2169_v55 }
 0x42c   : > { %5350 = vpow2.f32 %v2236_v33  ;;  %v1780_v33 = vpop.f32.mrf.mxu0 }
 0x42d   : > { %v7971_v20 = vpop.xlane.xlu2 %2242  ;;  %5352 = vpow2.f32 %v2222_v17 }
 0x42e   : > { %5354 = vpow2.f32 %v2224_v32 }
 0x42f   : > { %5356 = vrcp.f32 %v1616_v63 }
 0x430   : > { %5358 = vpow2.f32 %v2226_v21 }
 0x431   : > { %v7978_v19 = vpop.eup %5348  ;;  %5360 = vpow2.f32 %v2228_v35 }
 0x432   : > { %v7981_v50 = vpop.eup %5350  ;;  %v1731_v36 = vpop.f32.mrf.mxu3  ;;  %5362 = vpow2.f32 %v2230_v5  ;;  %v10147_v5 = vld [vmem:[#allocation110_spill] sm:$0xff] }
 0x433   : > { %v2283_v56 = vadd.f32 %v7981_v50, %v7978_v19  ;;  %v7987_v13 = vadd.f32 %v1780_v33, %v1731_v36  ;;  %v7991_v62 = vpop.eup %5352  ;;  %5364 = vpow2.f32 %v2232_v16 }
 0x434   : > { %v7995_v41 = vpop.eup %5354  ;;  %v8003_v55 = vpop.f32.mrf.mxu0 }
 0x435   : > { %10141 = vst [vmem:[#allocation41_spill] sm:$0xff] %v7987_v13  ;;  %2284 = vadd.xlane.f32.xlu1 %v2283_v56  ;;  %v7993_v24 = vpop.xlane.xlu2 %2245  ;;  %v2274_v39 = vadd.f32 %v7995_v41, %v7991_v62  ;;  %v5357_v17 = vpop.eup %5356  ;;  %v10144_v56 = vld [vmem:[#allocation59_spill] sm:$0xff] }
 0x436   : > { %v7999_v32 = vpop.eup %5358  ;;  %10142 = vst [vmem:[#allocation60_spill] sm:$0xff] %v8003_v55  ;;  %v8014_v21 = vmul.f32 %v5357_v17, %v10144_v56  ;;  %v8022_v16 = vmul.f32 %v5357_v17, %v10147_v5 }
 0x437   : > { %2266 = vadd.xlane.f32.xlu0 %v2265_v14  ;;  %v8001_v60 = vpop.eup %5360 }
 0x438   : > { %v8007_v51 = vpop.eup %5362  ;;  %10145 = vst [vmem:[#allocation91_spill] sm:$0xff] %v8014_v21  ;;  %v2277_v14 = vadd.f32 %v8001_v60, %v7999_v32 }
 0x439   : > { %v8011_v33 = vpop.eup %5364  ;;  %10148 = vst [vmem:[#allocation110_spill] sm:$0xff] %v8022_v16 }
 0x43a   : > { %v8029_v13 = vpop.f32.mrf.mxu3 }
 0x43b   : > { %10150 = vst [vmem:[#allocation125_spill] sm:$0xff] %v8029_v13 }
 0x43c   : > { %v1619_v8 = vpop.xlane.xlu0 %1618 }
 0x43d   : > { %5366 = vrcp.f32 %v1619_v8  ;;  %v8009_v0 = vpop.xlane.xlu2 %2795 }
 0x43e   : > { %v3235_v63 = vpop.permute.xlu1 %3234 }
 0x43f   : > { %2275 = vadd.xlane.f32.xlu0 %v2274_v39  ;;  %4808 = vmatmul.msk.bf16.gmra.mxu1 %vm10137_vm9, %v3235_v63 }
 0x440   : > { %4816 = vmatmul.msk.bf16.gmra.mxu2 %vm10143_vm15, %v3235_v63  ;;  %v2280_v63 = vadd.f32 %v8011_v33, %v8007_v51  ;;  %vm10154_vm15 = vmmov %vm10137_vm9 }
 0x443   : > { %v5367_v36 = vpop.eup %5366 }
 0x444   : > { %v8019_v35 = vmul.f32 %v5367_v36, %v7719_v45  ;;  %v8025_v8 = vmul.f32 %v5367_v36, %v7721_v48  ;;  %v1622_v39 = vpop.xlane.xlu0 %1621 }
 0x445   : > { %v1785_v55 = vpop.f32.mrf.mxu0  ;;  %5368 = vrcp.f32 %v1622_v39  ;;  %v8035_v48 = vpop.xlane.xlu2 %2798 }
 0x446   : > { %10146 = vst [vmem:[#allocation59_spill] sm:$0xff] %v8019_v35  ;;  %2278 = vadd.xlane.f32.xlu2 %v2277_v14  ;;  %v1718_v56 = vpack.c.bf16 %v8019_v35, %v8014_v21  ;;  %v1719_v45 = vpack.c.bf16 %v8025_v8, %v8022_v16  ;;  %5370 = vrcp.f32 %v7957_v49  ;;  %v3237_v5 = vpop.permute.xlu1 %3236  ;;  %v10152_v21 = vld [vmem:[#allocation57_spill] sm:$0xff] }
 0x447   : > { %10149 = vst [vmem:[#allocation124_spill] sm:$0xff] %v8025_v8  ;;  %2281 = vadd.xlane.f32.xlu0 %v2280_v63  ;;  %5372 = vrcp.f32 %v7971_v20 }
 0x448   : > { %1760 = vmatmul.bf16.gmra.mxu3 %v1718_v56  ;;  %1809 = vmatmul.bf16.gmra.mxu0 %v1719_v45  ;;  %v10158_v45 = vld [vmem:[#allocation46_spill] sm:$0xff]  ;;  %5374 = vrcp.f32 %v7961_v2 }
 0x44b   : > { %v1736_v17 = vpop.f32.mrf.mxu3  ;;  %v5369_v36 = vpop.eup %5368 }
 0x44c   : > { %v2249_v13 = vpop.xlane.xlu0 %2248  ;;  %v8038_v14 = vadd.f32 %v1785_v55, %v1736_v17  ;;  %v5371_v39 = vpop.eup %5370  ;;  %v8047_v63 = vmul.f32 %v5369_v36, %v7753_v61  ;;  %v8050_v49 = vmul.f32 %v5369_v36, %v7759_v44  ;;  %v10162_v36 = vld [vmem:[#allocation67_spill] sm:$0xff] }
 0x44d   : > { %v8042_v35 = vpop.f32.mrf.mxu0  ;;  %v8055_v55 = vmul.f32 %v5371_v39, %v7657_v27  ;;  %v8058_v17 = vmul.f32 %v5371_v39, %v10158_v45  ;;  %5376 = vrcp.f32 %v2249_v13 }
 0x44e   : > { %10151 = vst [vmem:[#allocation126_spill] sm:$0xff] %v8038_v14  ;;  %3094 = vrot.lane.b32.xlu1 %v10152_v21, %s6024_s27  ;;  %5378 = vrcp.f32 %v7993_v24  ;;  %v10178_v21 = vld [vmem:[#allocation65_spill] sm:$0xff] }
 0x44f   : > { %10153 = vst [vmem:[#allocation127_spill] sm:$0xff] %v8042_v35  ;;  %4809 = vmatmul.msk.bf16.gmra.mxu1 %vm10137_vm9, %v3237_v5  ;;  %v8052_v56 = vpop.xlane.xlu2 %2801  ;;  %v1721_v61 = vpack.c.bf16 %v8058_v17, %v8050_v49  ;;  %v10161_v35 = vld [vmem:[#allocation53_spill] sm:$0xff] }
 0x450   : > { %4817 = vmatmul.msk.bf16.gmra.mxu2 %vm10154_vm15, %v3237_v5  ;;  %10155 = vst [vmem:[#allocation128_spill] sm:$0xff] %v8047_v63  ;;  %v1720_v5 = vpack.c.bf16 %v8055_v55, %v8047_v63  ;;  %v10168_v63 = vld [vmem:[#allocation49_spill] sm:$0xff] }
 0x451   : > { %10156 = vst [vmem:[#allocation129_spill] sm:$0xff] %v8050_v49  ;;  %v10167_v49 = vld [vmem:[#allocation66_spill] sm:$0xff] }
 0x452   : > { %10157 = vst [vmem:[#allocation130_spill] sm:$0xff] %v8055_v55 }
 0x453   : > { %10159 = vst [vmem:[#allocation46_spill] sm:$0xff] %v8058_v17  ;;  %v8060_v14 = vpop.f32.mrf.mxu3  ;;  %v5373_v17 = vpop.eup %5372 }
 0x454   : > { %10160 = vst [vmem:[#allocation131_spill] sm:$0xff] %v8060_v14  ;;  %v2252_v27 = vpop.xlane.xlu0 %2251  ;;  %v10163_v14 = vld [vmem:[#allocation68_spill] sm:$0xff]  ;;  %v8081_v20 = vmul.f32 %v5373_v17, %v7709_v18  ;;  %v8084_v2 = vmul.f32 %v5373_v17, %v7711_v15  ;;  %v10171_v15 = vld [vmem:[#allocation54_spill] sm:$0xff] }
 0x456   : > { %3090 = vrot.lane.b32.xlu1 %v10161_v35, %s6024_s27  ;;  %10166 = vst [vmem:[#allocation134_spill] sm:$0xff] %v8084_v2 }
 0x457   : > { %v8072_v39 = vpop.xlane.xlu2 %2807 }
 0x458   : > { %v1790_v44 = vpop.f32.mrf.mxu0  ;;  %1765 = vmatmul.bf16.gmra.mxu3 %v1720_v5  ;;  %1814 = vmatmul.bf16.gmra.mxu0 %v1721_v61  ;;  %v5375_v5 = vpop.eup %5374 }
 0x459   : > { %v8089_v8 = vmul.f32 %v5375_v5, %v10168_v63 }
 0x45b   : > { %3110 = vrot.lane.b32.xlu0 %v10162_v36, %s6024_s27 }
 0x45c   : > { %v2255_v61 = vpop.xlane.xlu0 %2254 }
 0x45e   : > { %v1741_v45 = vpop.f32.mrf.mxu3  ;;  %3112 = vrot.lane.b32.xlu2 %v10163_v14, %s6024_s27  ;;  %v10169_v14 = vld [vmem:[#allocation42_spill] sm:$0xff] }
 0x45f   : > { %v8076_v55 = vadd.f32 %v1790_v44, %v1741_v45  ;;  %v8092_v36 = vmul.f32 %v5375_v5, %v10169_v14  ;;  %v2366_v44 = vpack.c.bf16 %v8081_v20, %v8089_v8  ;;  %v8102_v17 = vpop.xlane.xlu2 %2810  ;;  %v10172_v14 = vld [vmem:[#allocation55_spill] sm:$0xff] }
 0x460   : > { %v8078_v16 = vpop.f32.mrf.mxu0 }
 0x461   : > { %10164 = vst [vmem:[#allocation132_spill] sm:$0xff] %v8076_v55  ;;  %v2367_v18 = vpack.c.bf16 %v8084_v2, %v8092_v36 }
 0x462   : > { %10165 = vst [vmem:[#allocation133_spill] sm:$0xff] %v8078_v16  ;;  %v10173_v16 = vld [vmem:[#allocation43_spill] sm:$0xff] }
 0x463   : > { %3108 = vrot.lane.b32.xlu0 %v10167_v49, %s6024_s27  ;;  %v8111_v49 = vpop.f32.mrf.mxu2 }
 0x464   : > { %v8107_v63 = vpop.xlane.xlu0 %2257 }
 0x466   : > { %v8098_v45 = vpop.f32.mrf.mxu3  ;;  %3092 = vrot.lane.b32.xlu2 %v10171_v15, %s6024_s27 }
 0x467   : > { %10170 = vst [vmem:[#allocation49_spill] sm:$0xff] %v8098_v45  ;;  %v5377_v45 = vpop.eup %5376 }
 0x468   : > { %v1795_v55 = vpop.f32.mrf.mxu0  ;;  %2454 = vmatmul.bf16.vlgmr.msrb.gmra.mxu3 %v2366_v44  ;;  %2503 = vmatmul.bf16.vlgmr.msrb.gmra.mxu0 %v2367_v18  ;;  %v5379_v13 = vpop.eup %5378  ;;  %v8120_v24 = vmul.f32 %v5377_v45, %v7775_v30 }
 0x469   : > { %v8117_v18 = vpop.f32.mrf.mxu1 }
 0x46a   : > { %10176 = vst [vmem:[#allocation135_spill] sm:$0xff] %v8120_v24 }
 0x46b   : > { %3088 = vrot.lane.b32.xlu0 %v10172_v14, %s6024_s27  ;;  %v8123_v14 = vmul.f32 %v5377_v45, %v7782_v58 }
 0x46c   : > { %v2261_v58 = vpop.xlane.xlu0 %2260 }
 0x46d   : > { %10177 = vst [vmem:[#allocation136_spill] sm:$0xff] %v8123_v14 }
 0x46e   : > { %v1746_v5 = vpop.f32.mrf.mxu3  ;;  %3240 = vrot.lane.b32.xlu2 %v10173_v16, %s6022_s21  ;;  %v10179_v16 = vld [vmem:[#allocation99_spill] sm:$0xff] }
 0x46f   : > { %v8113_v35 = vadd.f32 %v1795_v55, %v1746_v5  ;;  %v8128_v47 = vmul.f32 %v5379_v13, %v10179_v16  ;;  %v10181_v55 = vld [vmem:[#allocation100_spill] sm:$0xff] }
 0x470   : > { %v8115_v15 = vpop.f32.mrf.mxu0  ;;  %v2270_v44 = vpop.xlane.xlu2 %2269  ;;  %v8131_v5 = vmul.f32 %v5379_v13, %v10181_v55 }
 0x471   : > { %10174 = vst [vmem:[#allocation42_spill] sm:$0xff] %v8113_v35  ;;  %5380 = vrcp.f32 %v2270_v44  ;;  %v2690_v2 = vpop.f32.mrf.mxu1 }
 0x472   : > { %10175 = vst [vmem:[#allocation43_spill] sm:$0xff] %v8115_v15  ;;  %v2368_v15 = vpack.c.bf16 %v8120_v24, %v8128_v47  ;;  %v2369_v30 = vpack.c.bf16 %v8123_v14, %v8131_v5  ;;  %5382 = vrcp.f32 %v2255_v61 }
 0x473   : > { %3106 = vrot.lane.b32.xlu0 %v10178_v21, %s6024_s27  ;;  %10180 = vst [vmem:[#allocation99_spill] sm:$0xff] %v8128_v47  ;;  %v2739_v21 = vpop.f32.mrf.mxu2  ;;  %v10185_v47 = vld [vmem:[#allocation83_spill] sm:$0xff] }
 0x474   : > { %10182 = vst [vmem:[#allocation100_spill] sm:$0xff] %v8131_v5  ;;  %v8141_v55 = vsel %vm10044_vm8, -1e+30, %v2739_v21  ;;  %vm10186_vm9 = vnez %v10185_v47  ;;  %vm10188_vm8 = vmmov %vm10154_vm15 }
 0x475   : > { %v8145_v24 = vsel %vm10186_vm9, -1e+30, %v2690_v2 }
 0x476   : > { %v8133_v35 = vpop.f32.mrf.mxu3 }
 0x477   : > { %10183 = vst [vmem:[#allocation137_spill] sm:$0xff] %v8133_v35  ;;  %v5381_v13 = vpop.eup %5380 }
 0x478   : > { %v2273_v45 = vpop.xlane.xlu2 %2272  ;;  %2459 = vmatmul.bf16.gmra.mxu3 %v2368_v15  ;;  %2508 = vmatmul.bf16.gmra.mxu0 %v2369_v30  ;;  %v1800_v16 = vpop.f32.mrf.mxu0  ;;  %v2815_v15 = vmax.f32 %v8145_v24, %v8141_v55  ;;  %v8160_v2 = vmul.f32 %v5381_v13, %v7913_v26 }
 0x479   : > { %5384 = vrcp.f32 %v2273_v45  ;;  %v5383_v35 = vpop.eup %5382 }
 0x47a   : > { %5386 = vrcp.f32 %v2252_v27  ;;  %v8152_v27 = vmul.f32 %v5381_v13, %v7907_v53  ;;  %v8166_v53 = vmul.f32 %v5383_v35, %v7827_v22 }
 0x47b   : > { %5388 = vrcp.f32 %v2261_v58 }
 0x47c   : > { %5390 = vrcp.f32 %v8107_v63 }
 0x47e   : > { %v1751_v5 = vpop.f32.mrf.mxu3 }
 0x47f   : > { %v5385_v61 = vpop.eup %5384  ;;  %v8149_v30 = vadd.f32 %v1800_v16, %v1751_v5  ;;  %v3239_v45 = vpop.permute.xlu0 %3238  ;;  %v8169_v16 = vmul.f32 %v5383_v35, %v7833_v38  ;;  %v2842_v35 = vsub.f32 %v7757_v9, %v8009_v0 }
 0x480   : > { %v3097_v14 = vpop.permute.xlu2 %3096  ;;  %4810 = vmatmul.msk.bf16.gmra.mxu1 %vm10154_vm15, %v3239_v45  ;;  %4818 = vmatmul.msk.bf16.gmra.mxu2 %vm10188_vm8, %v3239_v45  ;;  %v8157_v21 = vmul.f32 %v5385_v61, %v7919_v1  ;;  %v8163_v47 = vmul.f32 %v5385_v61, %v7921_v40  ;;  %v5387_v5 = vpop.eup %5386  ;;  %v2845_v61 = vsub.f32 %v7771_v3, %v8035_v48 }
 0x481   : > { %10187 = vst [vmem:[#allocation138_spill] sm:$0xff] %v8149_v30  ;;  %2816 = vmax.xlane.f32.xlu1 %v2815_v15  ;;  %3130 = vmatpush.bf16.msra.mxu3 %v3097_v14  ;;  %v8175_v26 = vpop.f32.mrf.mxu0  ;;  %v8178_v40 = vmul.f32 %v5387_v5, %v7813_v28  ;;  %v8181_v13 = vmul.f32 %v5387_v5, %v7819_v29  ;;  %v2874_v15 = vmul.f32 1.442695, %v2842_v35 }
 0x482   : > { %10189 = vst [vmem:[#allocation139_spill] sm:$0xff] %v8157_v21  ;;  %v2843_v28 = vsub.f32 %v7747_v54, %v8009_v0  ;;  %v2844_v29 = vsub.f32 %v7779_v31, %v8035_v48  ;;  %v2880_v9 = vmul.f32 1.442695, %v2845_v61  ;;  %v10194_v54 = vld [vmem:[#allocation82_spill] sm:$0xff]  ;;  %v10196_v48 = vld [vmem:[#allocation81_spill] sm:$0xff]  ;;  %v2742_v61 = vpop.f32.mrf.mxu2 }
 0x483   : > { %10190 = vst [vmem:[#allocation140_spill] sm:$0xff] %v8163_v47  ;;  %v2370_v38 = vpack.c.bf16 %v8166_v53, %v8178_v40  ;;  %v2371_v22 = vpack.c.bf16 %v8169_v16, %v8181_v13  ;;  %5392 = vpow2.f32 %v2874_v15  ;;  %vm10195_vm8 = vnez %v10194_v54 }
 0x484   : > { %10191 = vst [vmem:[#allocation141_spill] sm:$0xff] %v8175_v26  ;;  %v2876_v5 = vmul.f32 1.442695, %v2843_v28  ;;  %v2878_v45 = vmul.f32 1.442695, %v2844_v29  ;;  %vm10197_vm15 = vnez %v10196_v48  ;;  %v10198_v28 = vld [vmem:[#allocation51_spill] sm:$0xff] }
 0x485   : > { %v8203_v31 = vsel %vm10195_vm8, -1e+30, %v8111_v49  ;;  %v8214_v63 = vsel %vm10197_vm15, -1e+30, %v8117_v18 }
 0x486   : > { %v8183_v14 = vpop.f32.mrf.mxu3  ;;  %5394 = vpow2.f32 %v2876_v5  ;;  %v2693_v5 = vpop.f32.mrf.mxu1 }
 0x487   : > { %10192 = vst [vmem:[#allocation142_spill] sm:$0xff] %v8183_v14  ;;  %5396 = vpow2.f32 %v2878_v45 }
 0x488   : > { %2464 = vmatmul.bf16.gmra.mxu3 %v2370_v38  ;;  %2513 = vmatmul.bf16.gmra.mxu0 %v2371_v22  ;;  %v5389_v22 = vpop.eup %5388  ;;  %5398 = vpow2.f32 %v2880_v9  ;;  %v10201_v9 = vld [vmem:[#allocation85_spill] sm:$0xff] }
 0x489   : > { %v1805_v1 = vpop.f32.mrf.mxu0  ;;  %v5391_v58 = vpop.eup %5390  ;;  %v8206_v0 = vmul.f32 %v5389_v22, %v7883_v34  ;;  %v8209_v3 = vmul.f32 %v5389_v22, %v7885_v46  ;;  %v2812_v34 = vmax.f32 %v8214_v63, %v8203_v31  ;;  %vm10202_vm8 = vnez %v10201_v9 }
 0x48a   : > { %v8220_v49 = vmul.f32 %v5391_v58, %v7873_v12  ;;  %v8228_v35 = vpop.eup %5392 }
 0x48c   : > { %v2373_v45 = vpack.c.bf16 %v8209_v3, %v8220_v49  ;;  %v8230_v18 = vpop.eup %5394 }
 0x48d   : > { %v2938_v29 = vadd.f32 %v8230_v18, %v8228_v35 }
 0x48e   : > { %v1756_v38 = vpop.f32.mrf.mxu3 }
 0x48f   : > { %v8198_v30 = vadd.f32 %v1805_v1, %v1756_v38  ;;  %v8217_v1 = vmul.f32 %v5391_v58, %v7867_v25  ;;  %v8232_v25 = vpop.eup %5396  ;;  %v10199_v38 = vld [vmem:[#allocation86_spill] sm:$0xff]  ;;  %v8248_v58 = vsel %vm10202_vm8, -1e+30, %v2693_v5 }
 0x490   : > { %v8234_v12 = vpop.eup %5398  ;;  %vm10200_vm15 = vnez %v10199_v38  ;;  %v2744_v38 = vpop.f32.mrf.mxu2 }
 0x491   : > { %10193 = vst [vmem:[#allocation143_spill] sm:$0xff] %v8198_v30  ;;  %v2372_v46 = vpack.c.bf16 %v8206_v0, %v8217_v1  ;;  %v2941_v15 = vadd.f32 %v8234_v12, %v8232_v25  ;;  %v8244_v22 = vsel %vm10200_vm15, -1e+30, %v2742_v61 }
 0x496   : > { %v8282_v48 = vpop.f32.mrf.mxu3 }
 0x497   : > { %2813 = vmax.xlane.f32.xlu2 %v2812_v34  ;;  %v10203_v34 = vld [vmem:[#allocation47_spill] sm:$0xff] }
 0x498   : > { %2469 = vmatmul.bf16.gmra.mxu3 %v2372_v46  ;;  %2518 = vmatmul.bf16.gmra.mxu0 %v2373_v45  ;;  %v2818_v46 = vmax.f32 %v8248_v58, %v8244_v22  ;;  %v2264_v45 = vpop.xlane.xlu1 %2263 }
 0x499   : > { %5400 = vrcp.f32 %v2264_v45 }
 0x49a   : > { %3086 = vrot.lane.b32.xlu1 %v10198_v28, %s6024_s27  ;;  %v10212_v28 = vld [vmem:[#allocation44_spill] sm:$0xff] }
 0x49b   : > { %10213 = vst [vmem:[#allocation44_spill] sm:$0xff] %v8282_v48 }
 0x49d   : > { %2939 = vadd.xlane.f32.xlu0 %v2938_v29  ;;  %v10204_v29 = vld [vmem:[#allocation61_spill] sm:$0xff] }
 0x49f   : > { %2942 = vadd.xlane.f32.xlu2 %v2941_v15  ;;  %v5401_v61 = vpop.eup %5400 }
 0x4a0   : > { %v2805_v26 = vpop.xlane.xlu1 %2804  ;;  %v8257_v5 = vmul.f32 %v5401_v61, %v7895_v37  ;;  %v8263_v9 = vmul.f32 %v5401_v61, %v7905_v59  ;;  %v10209_v37 = vld [vmem:[#allocation64_spill] sm:$0xff]  ;;  %v10210_v59 = vld [vmem:[#allocation62_spill] sm:$0xff]  ;;  %v8278_v61 = vpop.f32.mrf.mxu0 }
 0x4a1   : > { %10211 = vst [vmem:[#allocation148_spill] sm:$0xff] %v8278_v61  ;;  %v10215_v61 = vpack.c.bf16 %v8163_v47, %v8160_v2 }
 0x4a2   : > { %3084 = vrot.lane.b32.xlu1 %v10203_v34, %s6024_s27  ;;  %10205 = vst [vmem:[#allocation144_spill] sm:$0xff] %v8257_v5 }
 0x4a3   : > { %10207 = vst [vmem:[#allocation146_spill] sm:$0xff] %v8263_v9 }
 0x4a5   : > { %2819 = vmax.xlane.f32.xlu0 %v2818_v46 }
 0x4aa   : > { %3102 = vrot.lane.b32.xlu1 %v10204_v29, %s6024_s27  ;;  %v2267_v15 = vpop.xlane.xlu0 %2266 }
 0x4ab   : > { %5402 = vrcp.f32 %v2267_v15 }
 0x4b1   : > { %v5403_v30 = vpop.eup %5402 }
 0x4b2   : > { %v8260_v14 = vmul.f32 %v5403_v30, %v7973_v6  ;;  %v8266_v46 = vmul.f32 %v5403_v30, %v7975_v10  ;;  %v8274_v6 = vpop.xlane.xlu1 %2284  ;;  %v2695_v10 = vpop.f32.mrf.mxu1 }
 0x4b3   : > { %v2276_v30 = vpop.xlane.xlu0 %2275 }
 0x4b4   : > { %10206 = vst [vmem:[#allocation145_spill] sm:$0xff] %v8260_v14  ;;  %v2374_v45 = vpack.c.bf16 %v8260_v14, %v8257_v5  ;;  %v2375_v15 = vpack.c.bf16 %v8266_v46, %v8263_v9 }
 0x4b5   : > { %10208 = vst [vmem:[#allocation147_spill] sm:$0xff] %v8266_v46 }
 0x4b6   : > { %2474 = vmatmul.bf16.gmra.mxu3 %v2374_v45  ;;  %2523 = vmatmul.bf16.gmra.mxu0 %v2375_v15  ;;  %v2747_v15 = vpop.f32.mrf.mxu2 }
 0x4b7   : > { %3104 = vrot.lane.b32.xlu2 %v10209_v37, %s6024_s27 }
 0x4b9   : > { %v2279_v34 = vpop.xlane.xlu2 %2278  ;;  %3098 = vrot.lane.b32.xlu0 %v10210_v59, %s6024_s27  ;;  %v10214_v59 = vpack.c.bf16 %v8157_v21, %v8152_v27  ;;  %v10219_v21 = vld [vmem:[#allocation88_spill] sm:$0xff] }
 0x4ba   : > { %v2698_v54 = vpop.f32.mrf.mxu1  ;;  %5404 = vrcp.f32 %v2279_v34  ;;  %vm10220_vm8 = vnez %v10219_v21 }
 0x4bb   : > { %v2282_v46 = vpop.xlane.xlu0 %2281  ;;  %5406 = vrcp.f32 %v2276_v30  ;;  %v10221_v30 = vld [vmem:[#allocation63_spill] sm:$0xff] }
 0x4be   : > { %v2749_v48 = vpop.f32.mrf.mxu2 }
 0x4bf   : > { %3242 = vrot.lane.b32.xlu2 %v10212_v28, %s6022_s21  ;;  %v10216_v28 = vld [vmem:[#allocation48_spill] sm:$0xff] }
 0x4c0   : > { %v3095_v29 = vpop.permute.xlu1 %3094  ;;  %v5405_v44 = vpop.eup %5404 }
 0x4c1   : > { %v3113_v45 = vpop.permute.xlu2 %3112  ;;  %3131 = vmatpush.bf16.msra.mxu3 %v3095_v29 }
 0x4c2   : > { %3179 = vmatpush.bf16.msra.mxu0 %v3113_v45  ;;  %v2700_v34 = vpop.f32.mrf.mxu1 }
 0x4c5   : > { %v1810_v37 = vpop.f32.mrf.mxu0 }
 0x4c6   : > { %2479 = vmatmul.bf16.gmra.mxu3 %v10214_v59  ;;  %2528 = vmatmul.bf16.gmra.mxu0 %v10215_v61  ;;  %v2848_v59 = vsub.f32 %v7933_v11, %v2805_v26  ;;  %v5407_v61 = vpop.eup %5406  ;;  %v10222_v11 = vld [vmem:[#allocation87_spill] sm:$0xff] }
 0x4c7   : > { %3082 = vrot.lane.b32.xlu2 %v10216_v28, %s6024_s27  ;;  %v8299_v28 = vsel %vm10220_vm8, -1e+30, %v2744_v38  ;;  %vm10223_vm15 = vnez %v10222_v11  ;;  %vm10224_vm8 = vcmask 261120  }
 0x4c8   : > { %v3091_v9 = vpop.permute.xlu1 %3090  ;;  %vm10225_vm9 = vmmov %vm10224_vm8 }
 0x4c9   : > { %v3093_v29 = vpop.permute.xlu2 %3092 }
 0x4ca   : > { %3132 = vmatpush.bf16.msra.mxu3 %v3093_v29  ;;  %v8305_v29 = vmul.f32 %v5405_v44, %v7999_v32 }
 0x4cb   : > { %v1761_v45 = vpop.f32.mrf.mxu3 }
 0x4cc   : > { %v8292_v14 = vadd.f32 %v1810_v37, %v1761_v45  ;;  %v2849_v37 = vsub.f32 %v7926_v23, %v2805_v26  ;;  %v8308_v45 = vmul.f32 %v5405_v44, %v8001_v60  ;;  %v8322_v23 = vmul.f32 %v5407_v61, %v7995_v41  ;;  %v8334_v41 = vpop.f32.mrf.mxu2 }
 0x4cd   : > { %v8294_v5 = vpop.f32.mrf.mxu0  ;;  %v3111_v47 = vpop.permute.xlu0 %3110 }
 0x4ce   : > { %10217 = vst [vmem:[#allocation149_spill] sm:$0xff] %v8292_v14  ;;  %3133 = vmatpush.bf16.msra.mxu3 %v3091_v9  ;;  %3180 = vmatpush.bf16.msra.mxu0 %v3111_v47  ;;  %v8312_v9 = vsel %vm10223_vm15, -1e+30, %v2695_v10  ;;  %v8319_v47 = vmul.f32 %v5407_v61, %v7991_v62  ;;  %v2888_v60 = vmul.f32 1.442695, %v2849_v37  ;;  %v2379_v26 = vpack.c.bf16 %v8308_v45, %v8322_v23  ;;  %v10229_v62 = vld [vmem:[#allocation90_spill] sm:$0xff] }
 0x4cf   : > { %10218 = vst [vmem:[#allocation150_spill] sm:$0xff] %v8294_v5  ;;  %3100 = vrot.lane.b32.xlu2 %v10221_v30, %s6024_s27  ;;  %v2821_v38 = vmax.f32 %v8312_v9, %v8299_v28  ;;  %v2886_v5 = vmul.f32 1.442695, %v2848_v59  ;;  %v2852_v61 = vsub.f32 %v7871_v43, %v8102_v17  ;;  %v10231_v37 = vld [vmem:[#allocation89_spill] sm:$0xff] }
 0x4d0   : > { %10226 = vst [vmem:[#allocation63_spill] sm:$0xff] %v8319_v47  ;;  %v2378_v44 = vpack.c.bf16 %v8305_v29, %v8319_v47  ;;  %v10267_v47 = vld [vmem:[#allocation134_spill] sm:$0xff] }
 0x4d1   : > { %v3241_v14 = vpop.permute.xlu2 %3240  ;;  %10227 = vst [vmem:[#allocation151_spill] sm:$0xff] %v8322_v23  ;;  %5408 = vpow2.f32 %v2886_v5  ;;  %v8342_v5 = vpop.f32.mrf.mxu1  ;;  %v10266_v23 = vld [vmem:[#allocation112_spill] sm:$0xff] }
 0x4d2   : > { %4811 = vmatmul.msk.bf16.gmra.mxu1 %vm10224_vm8, %v3241_v14  ;;  %4819 = vmatmul.msk.bf16.gmra.mxu2 %vm10225_vm9, %v3241_v14  ;;  %vm10230_vm9 = vnez %v10229_v62  ;;  %5410 = vrcp.f32 %v2282_v46  ;;  %vm10232_vm8 = vnez %v10231_v37 }
 0x4d3   : > { %v8324_v32 = vpop.f32.mrf.mxu3  ;;  %v8332_v14 = vsel %vm10230_vm9, -1e+30, %v2747_v15  ;;  %5412 = vpow2.f32 %v2888_v60 }
 0x4d4   : > { %10228 = vst [vmem:[#allocation152_spill] sm:$0xff] %v8324_v32  ;;  %2822 = vmax.xlane.f32.xlu1 %v2821_v38  ;;  %v8340_v38 = vsel %vm10232_vm8, -1e+30, %v2698_v54  ;;  %5414 = vrcp.f32 %v8274_v6 }
 0x4d5   : > { %v1815_v10 = vpop.f32.mrf.mxu0  ;;  %v3109_v59 = vpop.permute.xlu0 %3108  ;;  %v2824_v15 = vmax.f32 %v8340_v38, %v8332_v14 }
 0x4d6   : > { %2484 = vmatmul.bf16.gmra.mxu3 %v2378_v44  ;;  %2533 = vmatmul.bf16.gmra.mxu0 %v2379_v26  ;;  %v2853_v44 = vsub.f32 %v7859_v52, %v8102_v17  ;;  %v10235_v17 = vld [vmem:[#allocation94_spill] sm:$0xff] }
 0x4d7   : > { %3181 = vmatpush.bf16.msra.mxu0 %v3109_v59  ;;  %v8349_v26 = vpop.eup %5408  ;;  %v2894_v59 = vmul.f32 1.442695, %v2852_v61  ;;  %vm10236_vm8 = vnez %v10235_v17  ;;  %v10239_v61 = vld [vmem:[#allocation93_spill] sm:$0xff] }
 0x4d8   : > { %v5411_v60 = vpop.eup %5410  ;;  %v2896_v54 = vmul.f32 1.442695, %v2853_v44  ;;  %v8359_v6 = vsel %vm10236_vm8, -1e+30, %v2749_v48  ;;  %vm10240_vm9 = vnez %v10239_v61 }
 0x4d9   : > { %v8355_v37 = vpop.eup %5412  ;;  %5416 = vpow2.f32 %v2894_v59  ;;  %v8362_v11 = vmul.f32 %v5411_v60, %v8007_v51  ;;  %v8369_v44 = vsel %vm10240_vm9, -1e+30, %v2700_v34  ;;  %v2846_v34 = vsub.f32 %v7817_v7, %v8052_v56 }
 0x4da   : > { %v5415_v52 = vpop.eup %5414  ;;  %5418 = vpow2.f32 %v2896_v54  ;;  %v2827_v48 = vmax.f32 %v8369_v44, %v8359_v6 }
 0x4db   : > { %v1766_v46 = vpop.f32.mrf.mxu3  ;;  %10237 = vst [vmem:[#allocation155_spill] sm:$0xff] %v8362_v11  ;;  %v8379_v51 = vmul.f32 %v5415_v52, %v7981_v50  ;;  %v2882_v61 = vmul.f32 1.442695, %v2846_v34  ;;  %v2851_v34 = vsub.f32 %v7831_v57, %v8072_v39 }
 0x4dc   : > { %2825 = vmax.xlane.f32.xlu1 %v2824_v15  ;;  %v8351_v43 = vadd.f32 %v1815_v10, %v1766_v46  ;;  %v8365_v10 = vmul.f32 %v5411_v60, %v8011_v33  ;;  %v2754_v15 = vpop.f32.mrf.mxu2  ;;  %v2947_v46 = vadd.f32 %v8355_v37, %v8349_v26  ;;  %v2705_v33 = vpop.f32.mrf.mxu1 }
 0x4dd   : > { %v8353_v32 = vpop.f32.mrf.mxu0  ;;  %v3089_v62 = vpop.permute.xlu0 %3088  ;;  %10242 = vst [vmem:[#allocation158_spill] sm:$0xff] %v8379_v51  ;;  %5420 = vpow2.f32 %v2882_v61 }
 0x4de   : > { %10233 = vst [vmem:[#allocation153_spill] sm:$0xff] %v8351_v43  ;;  %3134 = vmatpush.bf16.msra.mxu3 %v3089_v62  ;;  %v8376_v62 = vmul.f32 %v5415_v52, %v7978_v19  ;;  %v2381_v54 = vpack.c.bf16 %v8379_v51, %v8365_v10  ;;  %v2847_v19 = vsub.f32 %v7809_v42, %v8052_v56  ;;  %v10244_v52 = vld [vmem:[#allocation98_spill] sm:$0xff] }
 0x4df   : > { %10234 = vst [vmem:[#allocation154_spill] sm:$0xff] %v8353_v32  ;;  %v8391_v50 = vpop.eup %5416  ;;  %vm10245_vm9 = vnez %v10244_v52 }
 0x4e0   : > { %10238 = vst [vmem:[#allocation156_spill] sm:$0xff] %v8365_v10  ;;  %v2380_v60 = vpack.c.bf16 %v8376_v62, %v8362_v11  ;;  %v8397_v7 = vpop.eup %5418  ;;  %v2884_v56 = vmul.f32 1.442695, %v2847_v19  ;;  %v2337_v10 = vadd.f32 %v10267_v47, %v10266_v23 }
 0x4e1   : > { %10241 = vst [vmem:[#allocation157_spill] sm:$0xff] %v8376_v62  ;;  %v2953_v52 = vadd.f32 %v8397_v7, %v8391_v50 }
 0x4e2   : > { %5422 = vpow2.f32 %v2884_v56 }
 0x4e3   : > { %2948 = vadd.xlane.f32.xlu0 %v2947_v46  ;;  %v8381_v59 = vpop.f32.mrf.mxu3  ;;  %v8395_v46 = vsel %vm10245_vm9, -1e+30, %v2754_v15 }
 0x4e4   : > { %10243 = vst [vmem:[#allocation159_spill] sm:$0xff] %v8381_v59  ;;  %2828 = vmax.xlane.f32.xlu1 %v2827_v48  ;;  %v10246_v48 = vld [vmem:[#allocation97_spill] sm:$0xff]  ;;  %v2757_v15 = vpop.f32.mrf.mxu2 }
 0x4e5   : > { %v2504_v43 = vpop.f32.mrf.mxu0  ;;  %v3107_v32 = vpop.permute.xlu0 %3106  ;;  %vm10247_vm8 = vnez %v10246_v48  ;;  %v8417_v48 = vsel %vm10075_vm0, -1e+30, %v2757_v15 }
 0x4e6   : > { %2489 = vmatmul.bf16.gmra.mxu3 %v2380_v60  ;;  %2538 = vmatmul.bf16.gmra.mxu0 %v2381_v54  ;;  %v8401_v59 = vsel %vm10247_vm8, -1e+30, %v2705_v33  ;;  %v2850_v60 = vsub.f32 %v7837_v4, %v8072_v39  ;;  %v2708_v33 = vpop.f32.mrf.mxu1 }
 0x4e7   : > { %3182 = vmatpush.bf16.msra.mxu0 %v3107_v32  ;;  %v2833_v42 = vmax.f32 %v8401_v59, %v8395_v46  ;;  %v8421_v61 = vsel %vm10074_vm13, -1e+30, %v2708_v33 }
 0x4e8   : > { %v2890_v51 = vmul.f32 1.442695, %v2850_v60  ;;  %v2836_v4 = vmax.f32 %v8421_v61, %v8417_v48 }
 0x4ea   : > { %5424 = vpow2.f32 %v2890_v51 }
 0x4eb   : > { %2834 = vmax.xlane.f32.xlu0 %v2833_v42  ;;  %v2455_v17 = vpop.f32.mrf.mxu3  ;;  %v10255_v42 = vld [vmem:[#allocation96_spill] sm:$0xff] }
 0x4ec   : > { %2954 = vadd.xlane.f32.xlu1 %v2953_v52  ;;  %v8409_v32 = vadd.f32 %v2504_v43, %v2455_v17  ;;  %v2892_v43 = vmul.f32 1.442695, %v2851_v34  ;;  %v8425_v17 = vpop.eup %5420  ;;  %vm10256_vm13 = vnez %v10255_v42 }
 0x4ed   : > { %v8413_v54 = vpop.f32.mrf.mxu0  ;;  %v8427_v52 = vpop.eup %5422  ;;  %v8448_v19 = vsel %vm10256_vm13, -1e+30, %v8334_v41 }
 0x4ee   : > { %10248 = vst [vmem:[#allocation160_spill] sm:$0xff] %v8409_v32  ;;  %5426 = vpow2.f32 %v2892_v43  ;;  %v2944_v56 = vadd.f32 %v8427_v52, %v8425_v17 }
 0x4ef   : > { %10249 = vst [vmem:[#allocation161_spill] sm:$0xff] %v8413_v54 }
 0x4f0   : > { %v8433_v60 = vpop.eup %5424 }
 0x4f3   : > { %2837 = vmax.xlane.f32.xlu0 %v2836_v4  ;;  %v8429_v57 = vpop.f32.mrf.mxu3 }
 0x4f4   : > { %10252 = vst [vmem:[#allocation162_spill] sm:$0xff] %v8429_v57  ;;  %v2817_v15 = vpop.xlane.xlu1 %2816  ;;  %v8435_v33 = vpop.eup %5426 }
 0x4f5   : > { %v2509_v39 = vpop.f32.mrf.mxu0  ;;  %v2856_v32 = vsub.f32 %v8145_v24, %v2817_v15  ;;  %v2857_v4 = vsub.f32 %v8141_v55, %v2817_v15  ;;  %v2950_v51 = vadd.f32 %v8435_v33, %v8433_v60  ;;  %v10258_v24 = vld [vmem:[#allocation95_spill] sm:$0xff] }
 0x4f6   : > { %vm10259_vm0 = vnez %v10258_v24  ;;  %v2759_v24 = vpop.f32.mrf.mxu2 }
 0x4f7   : > { %v2902_v43 = vmul.f32 1.442695, %v2856_v32  ;;  %v8455_v55 = vsel %vm10259_vm0, -1e+30, %v8342_v5 }
 0x4f8   : > { %2945 = vadd.xlane.f32.xlu2 %v2944_v56  ;;  %v2904_v56 = vmul.f32 1.442695, %v2857_v4 }
 0x4f9   : > { %5428 = vpow2.f32 %v2902_v43 }
 0x4fa   : > { %5430 = vpow2.f32 %v2904_v56 }
 0x4fb   : > { %v2460_v34 = vpop.f32.mrf.mxu3 }
 0x4fc   : > { %v8438_v54 = vadd.f32 %v2509_v39, %v2460_v34  ;;  %v2830_v39 = vmax.f32 %v8455_v55, %v8448_v19 }
 0x4fd   : > { %v8441_v57 = vpop.f32.mrf.mxu0 }
 0x4fe   : > { %10253 = vst [vmem:[#allocation163_spill] sm:$0xff] %v8438_v54 }
 0x4ff   : > { %10254 = vst [vmem:[#allocation164_spill] sm:$0xff] %v8441_v57  ;;  %v8459_v15 = vpop.eup %5428 }
 0x500   : > { %2951 = vadd.xlane.f32.xlu2 %v2950_v51  ;;  %v8461_v4 = vpop.eup %5430 }
 0x503   : > { %v8450_v62 = vpop.f32.mrf.mxu3 }
 0x504   : > { %10257 = vst [vmem:[#allocation165_spill] sm:$0xff] %v8450_v62  ;;  %v2959_v62 = vadd.f32 %v8461_v4, %v8459_v15 }
 0x505   : > { %v2514_v32 = vpop.f32.mrf.mxu0 }
 0x508   : > { %2831 = vmax.xlane.f32.xlu2 %v2830_v39 }
 0x50a   : > { %v2814_v34 = vpop.xlane.xlu2 %2813 }
 0x50b   : > { %v2854_v41 = vsub.f32 %v8214_v63, %v2814_v34  ;;  %v2855_v51 = vsub.f32 %v8203_v31, %v2814_v34  ;;  %v2465_v43 = vpop.f32.mrf.mxu3  ;;  %v2710_v31 = vpop.f32.mrf.mxu1 }
 0x50c   : > { %v3087_v54 = vpop.permute.xlu1 %3086  ;;  %v8465_v57 = vadd.f32 %v2514_v32, %v2465_v43  ;;  %v10263_v43 = vld [vmem:[#allocation113_spill] sm:$0xff] }
 0x50d   : > { %v2898_v5 = vmul.f32 1.442695, %v2854_v41  ;;  %v2900_v56 = vmul.f32 1.442695, %v2855_v51  ;;  %3135 = vmatpush.bf16.msra.mxu3 %v3087_v54  ;;  %v8469_v42 = vpop.f32.mrf.mxu0 }
 0x50e   : > { %10260 = vst [vmem:[#allocation166_spill] sm:$0xff] %v8465_v57 }
 0x50f   : > { %5432 = vpow2.f32 %v2898_v5  ;;  %10261 = vst [vmem:[#allocation167_spill] sm:$0xff] %v8469_v42  ;;  %v2334_v5 = vadd.f32 %v8089_v8, %v10263_v43 }
 0x510   : > { %5434 = vpow2.f32 %v2900_v56  ;;  %2960 = vadd.xlane.f32.xlu2 %v2959_v62  ;;  %v2940_v39 = vpop.xlane.xlu0 %2939  ;;  %v10264_v56 = vld [vmem:[#allocation114_spill] sm:$0xff] }
 0x511   : > { %5436 = vrcp.f32 %v2940_v39  ;;  %v2335_v39 = vadd.f32 %v8092_v36, %v10264_v56  ;;  %v3406_v56 = vpop.f32.mrf.mxu2 }
 0x512   : > { %v2943_v63 = vpop.xlane.xlu2 %2942 }
 0x513   : > { %5438 = vrcp.f32 %v2943_v63  ;;  %v8471_v34 = vpop.f32.mrf.mxu3 }
 0x514   : > { %10262 = vst [vmem:[#allocation168_spill] sm:$0xff] %v8471_v34  ;;  %v3085_v32 = vpop.permute.xlu1 %3084 }
 0x515   : > { %v8473_v41 = vpop.eup %5432  ;;  %3136 = vmatpush.bf16.msra.mxu3 %v3085_v32  ;;  %v10265_v32 = vld [vmem:[#allocation111_spill] sm:$0xff] }
 0x516   : > { %v8475_v54 = vpop.eup %5434  ;;  %v2336_v21 = vadd.f32 %v8081_v20, %v10265_v32 }
 0x517   : > { %v5437_v51 = vpop.eup %5436  ;;  %v2956_v62 = vadd.f32 %v8475_v54, %v8473_v41 }
 0x518   : > { %v3002_v63 = vmul.f32 %v5437_v51, %v8228_v35  ;;  %v8485_v57 = vmul.f32 %v5437_v51, %v8230_v18  ;;  %v2820_v42 = vpop.xlane.xlu0 %2819 }
 0x519   : > { %v5439_v34 = vpop.eup %5438  ;;  %2957 = vadd.xlane.f32.xlu1 %v2956_v62  ;;  %v2858_v11 = vsub.f32 %v8248_v58, %v2820_v42  ;;  %v2859_v8 = vsub.f32 %v8244_v22, %v2820_v42  ;;  %v8502_v58 = vsel %vm7343_vm11, -1e+30, %v2759_v24  ;;  %v2519_v62 = vpop.f32.mrf.mxu0  ;;  %vm10275_vm11 = vcmask 261120  }
 0x51a   : > { %v8493_v43 = vadd.f32 %v3002_v63, %v2334_v5  ;;  %v8496_v36 = vadd.f32 %v8485_v57, %v2335_v39  ;;  %v3004_v35 = vmul.f32 %v5439_v34, %v8232_v25  ;;  %v3005_v18 = vmul.f32 %v5439_v34, %v8234_v12  ;;  %v3105_v51 = vpop.permute.xlu2 %3104  ;;  %v3357_v5 = vpop.f32.mrf.mxu1  ;;  %vm10276_vm8 = vmmov %vm10275_vm11 }
 0x51b   : > { %v2906_v20 = vmul.f32 1.442695, %v2858_v11  ;;  %v2908_v32 = vmul.f32 1.442695, %v2859_v8  ;;  %3183 = vmatpush.bf16.msra.mxu0 %v3105_v51  ;;  %v2470_v47 = vpop.f32.mrf.mxu3  ;;  %v8512_v34 = vsel %vm10088_vm7, -1e+30, %v2710_v31  ;;  %v3408_v51 = vpop.f32.mrf.mxu2 }
 0x51c   : > { %10268 = vst [vmem:[#allocation113_spill] sm:$0xff] %v8493_v43  ;;  %v8504_v22 = vadd.f32 %v3004_v35, %v2336_v21  ;;  %v8506_v42 = vadd.f32 %v3005_v18, %v2337_v10  ;;  %v8508_v25 = vadd.f32 %v2519_v62, %v2470_v47  ;;  %v3103_v11 = vpop.permute.xlu1 %3102  ;;  %v2839_v39 = vmax.f32 %v8512_v34, %v8502_v58 }
 0x51d   : > { %10269 = vst [vmem:[#allocation114_spill] sm:$0xff] %v8496_v36  ;;  %5440 = vpow2.f32 %v2906_v20  ;;  %v8524_v31 = vsel %vm6917_vm2, -1e+30, %v3406_v56  ;;  %v8530_v47 = vsel %vm6911_vm1, -1e+30, %v3357_v5  ;;  %v3066_v5 = vpack.c.bf16 %v3004_v35, %v3002_v63 }
 0x51e   : > { %10271 = vst [vmem:[#allocation111_spill] sm:$0xff] %v8504_v22  ;;  %5442 = vpow2.f32 %v2908_v32  ;;  %v10314_v22 = vld [vmem:[#allocation45_spill] sm:$0xff] }
 0x51f   : > { %10272 = vst [vmem:[#allocation112_spill] sm:$0xff] %v8506_v42  ;;  %3184 = vmatpush.bf16.msra.mxu0 %v3103_v11  ;;  %v3478_v11 = vmax.f32 %v8530_v47, %v8524_v31 }
 0x520   : > { %10273 = vst [vmem:[#allocation134_spill] sm:$0xff] %v8508_v25 }
 0x521   : > { %2840 = vmax.xlane.f32.xlu1 %v2839_v39  ;;  %v8538_v8 = vpop.f32.mrf.mxu0 }
 0x522   : > { %v3243_v21 = vpop.permute.xlu2 %3242  ;;  %v3359_v62 = vpop.f32.mrf.mxu1  ;;  %10280 = vst [vmem:[#allocation70_spill] sm:$0xff] %v8538_v8 }
 0x523   : > { %v8516_v24 = vpop.eup %5440  ;;  %4812 = vmatmul.msk.bf16.gmra.mxu1 %vm10275_vm11, %v3243_v21  ;;  %4820 = vmatmul.msk.bf16.gmra.mxu2 %vm10276_vm8, %v3243_v21  ;;  %v8536_v21 = vsel %vm6948_vm3, -1e+30, %v3408_v51  ;;  %v8542_v12 = vsel %vm6953_vm4, -1e+30, %v3359_v62  ;;  %v3411_v23 = vpop.f32.mrf.mxu2 }
 0x524   : > { %v8520_v10 = vpop.eup %5442  ;;  %v3481_v32 = vmax.f32 %v8542_v12, %v8536_v21  ;;  %v8550_v39 = vsel %vm6965_vm6, -1e+30, %v3411_v23 }
 0x525   : > { %v2962_v20 = vadd.f32 %v8520_v10, %v8516_v24 }
 0x527   : > { %2963 = vadd.xlane.f32.xlu2 %v2962_v20 }
 0x529   : > { %3479 = vmax.xlane.f32.xlu1 %v3478_v11  ;;  %v8546_v11 = vpop.f32.mrf.mxu3 }
 0x52a   : > { %v3083_v56 = vpop.permute.xlu2 %3082  ;;  %v3362_v20 = vpop.f32.mrf.mxu1  ;;  %10282 = vst [vmem:[#allocation69_spill] sm:$0xff] %v8546_v11 }
 0x52b   : > { %3137 = vmatpush.bf16.msra.mxu3 %v3083_v56  ;;  %v8554_v62 = vsel %vm6957_vm5, -1e+30, %v3362_v20  ;;  %v3099_v35 = vpop.permute.xlu0 %3098 }
 0x52c   : > { %v3484_v63 = vmax.f32 %v8554_v62, %v8550_v39 }
 0x52e   : > { %3138 = vmatmul.bf16.vlgmr.msra.gmra.mxu3 %v3066_v5  ;;  %v3067_v5 = vpack.c.bf16 %v3005_v18, %v8485_v57 }
 0x52f   : > { %3482 = vmax.xlane.f32.xlu2 %v3481_v32 }
 0x532   : > { %v3101_v8 = vpop.permute.xlu2 %3100 }
 0x533   : > { %3185 = vmatpush.bf16.msra.mxu0 %v3101_v8  ;;  %v2524_v56 = vpop.f32.mrf.mxu0 }
 0x537   : > { %3485 = vmax.xlane.f32.xlu2 %v3484_v63  ;;  %3186 = vmatpush.bf16.msra.mxu0 %v3099_v35 }
 0x539   : > { %v2475_v32 = vpop.f32.mrf.mxu3 }
 0x53a   : > { %v8559_v11 = vadd.f32 %v2524_v56, %v2475_v32  ;;  %3187 = vmatmul.bf16.vlgmr.msra.gmra.mxu0 %v3067_v5 }
 0x53b   : > { %v8561_v23 = vpop.f32.mrf.mxu0 }
 0x53c   : > { %10285 = vst [vmem:[#allocation71_spill] sm:$0xff] %v8559_v11 }
 0x53d   : > { %10286 = vst [vmem:[#allocation72_spill] sm:$0xff] %v8561_v23  ;;  %v3364_v23 = vpop.f32.mrf.mxu1 }
 0x541   : > { %v8563_v8 = vpop.f32.mrf.mxu3 }
 0x542   : > { %10287 = vst [vmem:[#allocation74_spill] sm:$0xff] %v8563_v8 }
 0x543   : > { %v2529_v51 = vpop.f32.mrf.mxu0 }
 0x545   : > { %v3367_v8 = vpop.f32.mrf.mxu1 }
 0x547   : > { %v2823_v25 = vpop.xlane.xlu1 %2822 }
 0x548   : > { %v2860_v20 = vsub.f32 %v8312_v9, %v2823_v25  ;;  %v2861_v36 = vsub.f32 %v8299_v28, %v2823_v25 }
 0x549   : > { %v2480_v43 = vpop.f32.mrf.mxu3 }
 0x54a   : > { %v2910_v42 = vmul.f32 1.442695, %v2860_v20  ;;  %v2912_v63 = vmul.f32 1.442695, %v2861_v36  ;;  %v8567_v35 = vadd.f32 %v2529_v51, %v2480_v43 }
 0x54b   : > { %v8569_v57 = vpop.f32.mrf.mxu0 }
 0x54c   : > { %10288 = vst [vmem:[#allocation73_spill] sm:$0xff] %v8567_v35  ;;  %5444 = vpow2.f32 %v2910_v42  ;;  %v3413_v35 = vpop.f32.mrf.mxu2 }
 0x54d   : > { %10289 = vst [vmem:[#allocation169_spill] sm:$0xff] %v8569_v57  ;;  %5446 = vpow2.f32 %v2912_v63 }
 0x54f   : > { %v2826_v18 = vpop.xlane.xlu1 %2825 }
 0x550   : > { %v2862_v56 = vsub.f32 %v8340_v38, %v2826_v18  ;;  %v2863_v5 = vsub.f32 %v8332_v14, %v2826_v18 }
 0x551   : > { %v8573_v32 = vpop.f32.mrf.mxu3 }
 0x552   : > { %10290 = vst [vmem:[#allocation170_spill] sm:$0xff] %v8573_v32  ;;  %v8575_v11 = vpop.eup %5444  ;;  %v2914_v9 = vmul.f32 1.442695, %v2862_v56  ;;  %v2916_v28 = vmul.f32 1.442695, %v2863_v5 }
 0x553   : > { %v8577_v25 = vpop.eup %5446  ;;  %v2534_v36 = vpop.f32.mrf.mxu0 }
 0x554   : > { %5448 = vpow2.f32 %v2914_v9  ;;  %v2965_v43 = vadd.f32 %v8577_v25, %v8575_v11 }
 0x555   : > { %5450 = vpow2.f32 %v2916_v28 }
 0x556   : > { %2966 = vadd.xlane.f32.xlu0 %v2965_v43  ;;  %v2949_v42 = vpop.xlane.xlu0 %2948 }
 0x557   : > { %v2829_v51 = vpop.xlane.xlu1 %2828  ;;  %5452 = vrcp.f32 %v2949_v42  ;;  %v10292_v42 = vld [vmem:[#allocation103_spill] sm:$0xff] }
 0x558   : > { %v2864_v14 = vsub.f32 %v8369_v44, %v2829_v51  ;;  %v2865_v38 = vsub.f32 %v8359_v6, %v2829_v51  ;;  %v10293_v44 = vld [vmem:[#allocation135_spill] sm:$0xff]  ;;  %v10294_v6 = vld [vmem:[#allocation104_spill] sm:$0xff] }
 0x559   : > { %v2485_v20 = vpop.f32.mrf.mxu3  ;;  %v2340_v57 = vadd.f32 %v10293_v44, %v10292_v42  ;;  %v10295_v51 = vld [vmem:[#allocation136_spill] sm:$0xff]  ;;  %v8613_v44 = vsel %vm10127_vm14, -1e+30, %v3413_v35 }
 0x55a   : > { %v8583_v63 = vpop.eup %5448  ;;  %v2918_v18 = vmul.f32 1.442695, %v2864_v14  ;;  %v2920_v56 = vmul.f32 1.442695, %v2865_v38  ;;  %v8585_v5 = vadd.f32 %v2534_v36, %v2485_v20  ;;  %v2341_v32 = vadd.f32 %v10295_v51, %v10294_v6 }
 0x55b   : > { %v8587_v9 = vpop.eup %5450  ;;  %v8601_v20 = vpop.f32.mrf.mxu0 }
 0x55c   : > { %10291 = vst [vmem:[#allocation171_spill] sm:$0xff] %v8585_v5  ;;  %5454 = vpow2.f32 %v2918_v18  ;;  %v2968_v28 = vadd.f32 %v8587_v9, %v8583_v63 }
 0x55d   : > { %v5453_v43 = vpop.eup %5452  ;;  %5456 = vpow2.f32 %v2920_v56  ;;  %10296 = vst [vmem:[#allocation103_spill] sm:$0xff] %v8601_v20 }
 0x55e   : > { %2969 = vadd.xlane.f32.xlu0 %v2968_v28  ;;  %v2835_v14 = vpop.xlane.xlu0 %2834  ;;  %v8596_v36 = vmul.f32 %v5453_v43, %v8349_v26  ;;  %v8599_v38 = vmul.f32 %v5453_v43, %v8355_v37  ;;  %v10303_v26 = vld [vmem:[#allocation118_spill] sm:$0xff] }
 0x55f   : > { %v2955_v18 = vpop.xlane.xlu1 %2954  ;;  %v2868_v5 = vsub.f32 %v8401_v59, %v2835_v14  ;;  %v2869_v56 = vsub.f32 %v8395_v46, %v2835_v14  ;;  %v8623_v14 = vsel %vm10129_vm12, -1e+30, %v3364_v23  ;;  %v2345_v20 = vadd.f32 %v8169_v16, %v10303_v26 }
 0x560   : > { %5458 = vrcp.f32 %v2955_v18  ;;  %v8606_v42 = vadd.f32 %v8596_v36, %v2340_v57  ;;  %v8609_v28 = vadd.f32 %v8599_v38, %v2341_v32  ;;  %v3487_v57 = vmax.f32 %v8623_v14, %v8613_v44  ;;  %v3416_v32 = vpop.f32.mrf.mxu2  ;;  %v10302_v18 = vld [vmem:[#allocation40_spill] sm:$0xff] }
 0x561   : > { %v2926_v37 = vmul.f32 1.442695, %v2868_v5  ;;  %v2928_v43 = vmul.f32 1.442695, %v2869_v56  ;;  %v8615_v6 = vpop.f32.mrf.mxu3  ;;  %v2344_v56 = vadd.f32 %v8166_v53, %v10302_v18 }
 0x562   : > { %10297 = vst [vmem:[#allocation135_spill] sm:$0xff] %v8606_v42  ;;  %v8617_v51 = vpop.eup %5454  ;;  %v8639_v42 = vsel %vm7033_vm10, -1e+30, %v3416_v32 }
 0x563   : > { %10298 = vst [vmem:[#allocation104_spill] sm:$0xff] %v8609_v28  ;;  %v8619_v59 = vpop.eup %5456  ;;  %5460 = vpow2.f32 %v2926_v37  ;;  %v2539_v18 = vpop.f32.mrf.mxu0 }
 0x564   : > { %10300 = vst [vmem:[#allocation136_spill] sm:$0xff] %v8615_v6  ;;  %5462 = vpow2.f32 %v2928_v43  ;;  %v2971_v35 = vadd.f32 %v8619_v59, %v8617_v51 }
 0x566   : > { %v5459_v5 = vpop.eup %5458  ;;  %2972 = vadd.xlane.f32.xlu1 %v2971_v35  ;;  %3488 = vmax.xlane.f32.xlu0 %v3487_v57  ;;  %v2838_v23 = vpop.xlane.xlu0 %2837 }
 0x567   : > { %v2870_v37 = vsub.f32 %v8421_v61, %v2838_v23  ;;  %v2871_v46 = vsub.f32 %v8417_v48, %v2838_v23  ;;  %v3012_v43 = vmul.f32 %v5459_v5, %v8391_v50  ;;  %v3013_v6 = vmul.f32 %v5459_v5, %v8397_v7  ;;  %v10308_v7 = vld [vmem:[#allocation77_spill] sm:$0xff] }
 0x568   : > { %vm10309_vm1 = vnez %v10308_v7  ;;  %v10312_v7 = vld [vmem:[#allocation116_spill] sm:$0xff] }
 0x569   : > { %v8641_v53 = vpop.eup %5460  ;;  %v2930_v16 = vmul.f32 1.442695, %v2870_v37  ;;  %v2932_v35 = vmul.f32 1.442695, %v2871_v46  ;;  %v2490_v57 = vpop.f32.mrf.mxu3  ;;  %v8643_v26 = vadd.f32 %v3012_v43, %v2344_v56  ;;  %v8645_v61 = vadd.f32 %v3013_v6, %v2345_v20  ;;  %v10310_v46 = vld [vmem:[#allocation115_spill] sm:$0xff] }
 0x56a   : > { %v8647_v48 = vpop.eup %5462  ;;  %v8649_v50 = vadd.f32 %v2539_v18, %v2490_v57  ;;  %v8653_v5 = vsel %vm10309_vm1, -1e+30, %v3367_v8  ;;  %v10311_v8 = vld [vmem:[#allocation99_spill] sm:$0xff] }
 0x56b   : > { %10305 = vst [vmem:[#allocation76_spill] sm:$0xff] %v8643_v26  ;;  %5464 = vpow2.f32 %v2930_v16  ;;  %v2946_v28 = vpop.xlane.xlu2 %2945  ;;  %v2977_v32 = vadd.f32 %v8647_v48, %v8641_v53  ;;  %v3490_v23 = vmax.f32 %v8653_v5, %v8639_v42  ;;  %v2338_v18 = vadd.f32 %v10311_v8, %v10310_v46 }
 0x56c   : > { %10306 = vst [vmem:[#allocation75_spill] sm:$0xff] %v8645_v61  ;;  %5466 = vpow2.f32 %v2932_v35 }
 0x56d   : > { %10307 = vst [vmem:[#allocation40_spill] sm:$0xff] %v8649_v50  ;;  %5468 = vrcp.f32 %v2946_v28  ;;  %2978 = vadd.xlane.f32.xlu2 %v2977_v32  ;;  %v10313_v50 = vld [vmem:[#allocation100_spill] sm:$0xff] }
 0x56e   : > { %3491 = vmax.xlane.f32.xlu0 %v3490_v23  ;;  %v2339_v61 = vadd.f32 %v10313_v50, %v10312_v7  ;;  %v2342_v50 = vadd.f32 %v8178_v40, %v10314_v22 }
 0x571   : > { %v8659_v20 = vpop.eup %5464 }
 0x572   : > { %v8661_v56 = vpop.eup %5466 }
 0x573   : > { %v5469_v37 = vpop.eup %5468  ;;  %v2952_v16 = vpop.xlane.xlu2 %2951  ;;  %v2980_v57 = vadd.f32 %v8661_v56, %v8659_v20 }
 0x574   : > { %5470 = vrcp.f32 %v2952_v16  ;;  %v3006_v35 = vmul.f32 %v5469_v37, %v8425_v17  ;;  %v3007_v28 = vmul.f32 %v5469_v37, %v8427_v52  ;;  %v10315_v16 = vld [vmem:[#allocation117_spill] sm:$0xff] }
 0x575   : > { %v2343_v17 = vadd.f32 %v8181_v13, %v10315_v16  ;;  %v10316_v13 = vld [vmem:[#allocation56_spill] sm:$0xff] }
 0x576   : > { %2981 = vadd.xlane.f32.xlu0 %v2980_v57  ;;  %v8671_v32 = vadd.f32 %v3006_v35, %v2338_v18  ;;  %v3068_v23 = vpack.c.bf16 %v8596_v36, %v3006_v35  ;;  %v8674_v26 = vadd.f32 %v3007_v28, %v2339_v61  ;;  %v3069_v46 = vpack.c.bf16 %v8599_v38, %v3007_v28  ;;  %v10319_v16 = vld [vmem:[#allocation120_spill] sm:$0xff] }
 0x578   : > { %3143 = vmatmul.bf16.gmra.mxu3 %v3068_v23  ;;  %3192 = vmatmul.bf16.gmra.mxu0 %v3069_v46  ;;  %v3418_v23 = vpop.f32.mrf.mxu2  ;;  %v10317_v46 = vld [vmem:[#allocation57_spill] sm:$0xff] }
 0x57a   : > { %v5471_v8 = vpop.eup %5470 }
 0x57b   : > { %v2832_v7 = vpop.xlane.xlu2 %2831  ;;  %v3010_v52 = vmul.f32 %v5471_v8, %v8433_v60  ;;  %v3011_v37 = vmul.f32 %v5471_v8, %v8435_v33  ;;  %v10318_v8 = vld [vmem:[#allocation119_spill] sm:$0xff] }
 0x57c   : > { %v2866_v36 = vsub.f32 %v8455_v55, %v2832_v7  ;;  %v2867_v61 = vsub.f32 %v8448_v19, %v2832_v7  ;;  %v3369_v7 = vpop.f32.mrf.mxu1 }
 0x57d   : > { %v8685_v18 = vadd.f32 %v3010_v52, %v2342_v50  ;;  %v8687_v38 = vadd.f32 %v3011_v37, %v2343_v17  ;;  %v3070_v33 = vpack.c.bf16 %v3012_v43, %v3010_v52  ;;  %v3071_v22 = vpack.c.bf16 %v3013_v6, %v3011_v37  ;;  %v10320_v37 = vld [vmem:[#allocation80_spill] sm:$0xff] }
 0x57e   : > { %v2922_v57 = vmul.f32 1.442695, %v2866_v36  ;;  %v2924_v35 = vmul.f32 1.442695, %v2867_v61  ;;  %v2348_v50 = vadd.f32 %v8206_v0, %v10318_v8  ;;  %v2349_v43 = vadd.f32 %v8209_v3, %v10319_v16  ;;  %v10322_v61 = vld [vmem:[#allocation54_spill] sm:$0xff]  ;;  %v10328_v16 = vld [vmem:[#allocation67_spill] sm:$0xff] }
 0x57f   : > { %vm10321_vm2 = vnez %v10320_v37 }
 0x580   : > { %5472 = vpow2.f32 %v2922_v57  ;;  %v8707_v36 = vsel %vm10321_vm2, -1e+30, %v3418_v23 }
 0x581   : > { %5474 = vpow2.f32 %v2924_v35  ;;  %v10323_v35 = vld [vmem:[#allocation79_spill] sm:$0xff] }
 0x582   : > { %vm10324_vm3 = vnez %v10323_v35  ;;  %v10331_v35 = vld [vmem:[#allocation144_spill] sm:$0xff] }
 0x583   : > { %v2961_v40 = vpop.xlane.xlu2 %2960  ;;  %v8717_v3 = vsel %vm10324_vm3, -1e+30, %v3369_v7 }
 0x584   : > { %5476 = vrcp.f32 %v2961_v40 }
 0x585   : > { %3780 = vrot.lane.b32.xlu2 %v10316_v13, %s6022_s21  ;;  %v10326_v13 = vld [vmem:[#allocation58_spill] sm:$0xff] }
 0x586   : > { %v8691_v60 = vpop.eup %5472 }
 0x587   : > { %v8693_v55 = vpop.eup %5474 }
 0x588   : > { %3148 = vmatmul.bf16.gmra.mxu3 %v3070_v33  ;;  %3197 = vmatmul.bf16.gmra.mxu0 %v3071_v22  ;;  %v2974_v19 = vadd.f32 %v8693_v55, %v8691_v60  ;;  %v2346_v33 = vadd.f32 %v8217_v1, %v10326_v13  ;;  %v10327_v22 = vld [vmem:[#allocation50_spill] sm:$0xff] }
 0x58a   : > { %v5477_v28 = vpop.eup %5476  ;;  %2975 = vadd.xlane.f32.xlu1 %v2974_v19  ;;  %3778 = vrot.lane.b32.xlu0 %v10317_v46, %s6022_s21  ;;  %v2347_v19 = vadd.f32 %v8220_v49, %v10327_v22 }
 0x58b   : > { %v3016_v6 = vmul.f32 %v5477_v28, %v8459_v15  ;;  %v3017_v17 = vmul.f32 %v5477_v28, %v8461_v4  ;;  %v3493_v15 = vmax.f32 %v8717_v3, %v8707_v36  ;;  %v10325_v4 = vld [vmem:[#allocation53_spill] sm:$0xff] }
 0x58c   : > { %v2958_v52 = vpop.xlane.xlu1 %2957 }
 0x58d   : > { %5478 = vrcp.f32 %v2958_v52  ;;  %3776 = vrot.lane.b32.xlu2 %v10322_v61, %s6022_s21  ;;  %v8711_v57 = vadd.f32 %v3016_v6, %v2348_v50  ;;  %v8713_v0 = vadd.f32 %v3017_v17, %v2349_v43 }
 0x592   : > { %3494 = vmax.xlane.f32.xlu1 %v3493_v15  ;;  %3774 = vrot.lane.b32.xlu0 %v10325_v4, %s6022_s21  ;;  %v10332_v4 = vld [vmem:[#allocation109_spill] sm:$0xff] }
 0x593   : > { %v5479_v40 = vpop.eup %5478 }
 0x594   : > { %v2841_v28 = vpop.xlane.xlu1 %2840  ;;  %v3014_v23 = vmul.f32 %v5479_v40, %v8473_v41  ;;  %v3015_v46 = vmul.f32 %v5479_v40, %v8475_v54  ;;  %v10329_v41 = vld [vmem:[#allocation66_spill] sm:$0xff] }
 0x595   : > { %v2872_v8 = vsub.f32 %v8512_v34, %v2841_v28  ;;  %v2873_v50 = vsub.f32 %v8502_v58, %v2841_v28  ;;  %3794 = vrot.lane.b32.xlu2 %v10328_v16, %s6022_s21  ;;  %v10333_v40 = vld [vmem:[#allocation146_spill] sm:$0xff]  ;;  %v8763_v16 = vpop.f32.mrf.mxu0 }
 0x596   : > { %v8733_v43 = vadd.f32 %v3014_v23, %v2346_v33  ;;  %v3072_v7 = vpack.c.bf16 %v3016_v6, %v3014_v23  ;;  %v8735_v52 = vadd.f32 %v3015_v46, %v2347_v19  ;;  %v3073_v1 = vpack.c.bf16 %v3017_v17, %v3015_v46  ;;  %v10330_v17 = vld [vmem:[#allocation108_spill] sm:$0xff]  ;;  %v10334_v33 = vld [vmem:[#allocation55_spill] sm:$0xff]  ;;  %v10337_v46 = vld [vmem:[#allocation65_spill] sm:$0xff]  ;;  %10338 = vst [vmem:[#allocation77_spill] sm:$0xff] %v8763_v16 }
 0x597   : > { %v2934_v37 = vmul.f32 1.442695, %v2872_v8  ;;  %v2936_v49 = vmul.f32 1.442695, %v2873_v50  ;;  %v2350_v15 = vadd.f32 %v10331_v35, %v10330_v17  ;;  %v2351_v13 = vadd.f32 %v10333_v40, %v10332_v4  ;;  %v8759_v8 = vpop.f32.mrf.mxu2  ;;  %v8761_v50 = vpop.f32.mrf.mxu1  ;;  %v10340_v35 = vld [vmem:[#allocation84_spill] sm:$0xff]  ;;  %v10342_v4 = vld [vmem:[#allocation83_spill] sm:$0xff] }
 0x598   : > { %3153 = vmatmul.bf16.gmra.mxu3 %v3072_v7  ;;  %3202 = vmatmul.bf16.gmra.mxu0 %v3073_v1  ;;  %v8765_v7 = vpop.f32.mrf.mxu3  ;;  %vm10341_vm4 = vnez %v10340_v35  ;;  %vm10343_vm5 = vnez %v10342_v4  ;;  %v10346_v35 = vld [vmem:[#allocation145_spill] sm:$0xff] }
 0x599   : > { %5480 = vpow2.f32 %v2934_v37  ;;  %10339 = vst [vmem:[#allocation115_spill] sm:$0xff] %v8765_v7 }
 0x59a   : > { %5482 = vpow2.f32 %v2936_v49  ;;  %3792 = vrot.lane.b32.xlu0 %v10329_v41, %s6022_s21  ;;  %v2964_v54 = vpop.xlane.xlu2 %2963 }
 0x59b   : > { %5484 = vrcp.f32 %v2964_v54 }
 0x59f   : > { %v8739_v58 = vpop.eup %5480  ;;  %v3423_v37 = vpop.f32.mrf.mxu2 }
 0x5a0   : > { %v8741_v34 = vpop.eup %5482 }
 0x5a1   : > { %v5485_v61 = vpop.eup %5484  ;;  %v2983_v6 = vadd.f32 %v8741_v34, %v8739_v58 }
 0x5a2   : > { %3772 = vrot.lane.b32.xlu0 %v10334_v33, %s6022_s21  ;;  %v3018_v22 = vmul.f32 %v5485_v61, %v8516_v24  ;;  %v3019_v19 = vmul.f32 %v5485_v61, %v8520_v10  ;;  %v3483_v1 = vpop.xlane.xlu2 %3482 }
 0x5a3   : > { %2984 = vadd.xlane.f32.xlu1 %v2983_v6  ;;  %v3528_v24 = vsub.f32 %v8542_v12, %v3483_v1  ;;  %v3529_v10 = vsub.f32 %v8536_v21, %v3483_v1  ;;  %v3374_v6 = vpop.f32.mrf.mxu1  ;;  %v10344_v21 = vld [vmem:[#allocation68_spill] sm:$0xff] }
 0x5a4   : > { %v8753_v28 = vadd.f32 %v3018_v22, %v2350_v15  ;;  %v8755_v23 = vadd.f32 %v3019_v19, %v2351_v13  ;;  %v8773_v15 = vsel %vm10341_vm4, -1e+30, %v3423_v37  ;;  %v8777_v40 = vsel %vm10343_vm5, -1e+30, %v3374_v6  ;;  %v3480_v13 = vpop.xlane.xlu1 %3479 }
 0x5a5   : > { %v3562_v49 = vmul.f32 1.442695, %v3528_v24  ;;  %v3564_v41 = vmul.f32 1.442695, %v3529_v10  ;;  %v3499_v12 = vmax.f32 %v8777_v40, %v8773_v15  ;;  %v3527_v24 = vsub.f32 %v8524_v31, %v3480_v13  ;;  %v10348_v31 = vld [vmem:[#allocation147_spill] sm:$0xff] }
 0x5a6   : > { %10335 = vst [vmem:[#allocation118_spill] sm:$0xff] %v8753_v28  ;;  %vm4120_vm5 = vcmask 523264  }
 0x5a7   : > { %10336 = vst [vmem:[#allocation78_spill] sm:$0xff] %v8755_v23  ;;  %5486 = vpow2.f32 %v3562_v49  ;;  %v3560_v49 = vmul.f32 1.442695, %v3527_v24 }
 0x5a8   : > { %5488 = vpow2.f32 %v3564_v41 }
 0x5aa   : > { %3790 = vrot.lane.b32.xlu0 %v10337_v46, %s6022_s21  ;;  %v3526_v46 = vsub.f32 %v8530_v47, %v3480_v13  ;;  %v10345_v47 = vld [vmem:[#allocation52_spill] sm:$0xff] }
 0x5ab   : > { %v2352_v4 = vadd.f32 %v10346_v35, %v10345_v47  ;;  %v8807_v35 = vpop.xlane.xlu2 %3485 }
 0x5ac   : > { %v3558_v10 = vmul.f32 1.442695, %v3526_v46 }
 0x5ad   : > { %v8783_v33 = vpop.eup %5486 }
 0x5ae   : > { %v8786_v1 = vpop.eup %5488  ;;  %5490 = vpow2.f32 %v3558_v10 }
 0x5af   : > { %v3625_v37 = vadd.f32 %v8786_v1, %v8783_v33  ;;  %5492 = vpow2.f32 %v3560_v49 }
 0x5b1   : > { %v3139_v54 = vpop.f32.mrf.mxu3 }
 0x5b7   : > { %v3188_v61 = vpop.f32.mrf.mxu0 }
 0x5b8   : > { %v8769_v17 = vadd.f32 %v3188_v61, %v3139_v54  ;;  %v8791_v54 = vpop.eup %5490 }
 0x5b9   : > { %v8793_v61 = vpop.eup %5492 }
 0x5ba   : > { %v3622_v10 = vadd.f32 %v8793_v61, %v8791_v54 }
 0x5bc   : > { %3796 = vrot.lane.b32.xlu1 %v10344_v21, %s6022_s21 }
 0x5be   : > { %3500 = vmax.xlane.f32.xlu2 %v3499_v12  ;;  %v10347_v12 = vld [vmem:[#allocation107_spill] sm:$0xff] }
 0x5bf   : > { %v2353_v21 = vadd.f32 %v10348_v31, %v10347_v12  ;;  %v10351_v12 = vld [vmem:[#allocation121_spill] sm:$0xff] }
 0x5c6   : > { %3626 = vadd.xlane.f32.xlu2 %v3625_v37 }
 0x5c9   : > { %v2967_v41 = vpop.xlane.xlu0 %2966 }
 0x5ca   : > { %5494 = vrcp.f32 %v2967_v41 }
 0x5d0   : > { %v5495_v6 = vpop.eup %5494 }
 0x5d1   : > { %v2970_v13 = vpop.xlane.xlu0 %2969  ;;  %v3020_v46 = vmul.f32 %v5495_v6, %v8575_v11  ;;  %v3021_v24 = vmul.f32 %v5495_v6, %v8577_v25  ;;  %v2354_v11 = vadd.f32 %v8152_v27, %v10351_v12  ;;  %v10352_v25 = vld [vmem:[#allocation122_spill] sm:$0xff]  ;;  %v10356_v27 = vld [vmem:[#allocation123_spill] sm:$0xff] }
 0x5d2   : > { %5496 = vrcp.f32 %v2970_v13  ;;  %v2355_v6 = vadd.f32 %v8160_v2, %v10352_v25  ;;  %v10358_v2 = vld [vmem:[#allocation92_spill] sm:$0xff] }
 0x5d3   : > { %v8803_v37 = vadd.f32 %v3020_v46, %v2352_v4  ;;  %v3074_v49 = vpack.c.bf16 %v3020_v46, %v3018_v22  ;;  %v8805_v41 = vadd.f32 %v3021_v24, %v2353_v21  ;;  %v3075_v16 = vpack.c.bf16 %v3021_v24, %v3019_v19  ;;  %v10355_v21 = vld [vmem:[#allocation64_spill] sm:$0xff]  ;;  %v10357_v24 = vld [vmem:[#allocation139_spill] sm:$0xff] }
 0x5d4   : > { %3623 = vadd.xlane.f32.xlu0 %v3622_v10  ;;  %v2356_v10 = vadd.f32 %v10357_v24, %v10356_v27 }
 0x5d5   : > { %10349 = vst [vmem:[#allocation99_spill] sm:$0xff] %v8803_v37  ;;  %3158 = vmatmul.bf16.gmra.mxu3 %v3074_v49  ;;  %3207 = vmatmul.bf16.gmra.mxu0 %v3075_v16  ;;  %v10359_v49 = vld [vmem:[#allocation140_spill] sm:$0xff] }
 0x5d6   : > { %10350 = vst [vmem:[#allocation116_spill] sm:$0xff] %v8805_v41  ;;  %v2357_v12 = vadd.f32 %v10359_v49, %v10358_v2 }
 0x5d8   : > { %v5497_v47 = vpop.eup %5496 }
 0x5d9   : > { %v2973_v31 = vpop.xlane.xlu1 %2972  ;;  %v8813_v13 = vpop.xlane.xlu0 %3488  ;;  %v3022_v22 = vmul.f32 %v5497_v47, %v8583_v63  ;;  %v3023_v4 = vmul.f32 %v5497_v47, %v8587_v9  ;;  %v10360_v63 = vld [vmem:[#allocation82_spill] sm:$0xff] }
 0x5da   : > { %5498 = vrcp.f32 %v2973_v31  ;;  %vm10361_vm6 = vnez %v10360_v63  ;;  %v10362_v31 = vld [vmem:[#allocation81_spill] sm:$0xff] }
 0x5db   : > { %v8817_v19 = vadd.f32 %v3022_v22, %v2354_v11  ;;  %v8819_v16 = vadd.f32 %v3023_v4, %v2355_v6  ;;  %v8830_v9 = vsel %vm10361_vm6, -1e+30, %v8759_v8  ;;  %vm10363_vm10 = vnez %v10362_v31 }
 0x5dc   : > { %vm4137_vm6 = vcmask 785408  }
 0x5dd   : > { %10353 = vst [vmem:[#allocation100_spill] sm:$0xff] %v8817_v19 }
 0x5de   : > { %10354 = vst [vmem:[#allocation45_spill] sm:$0xff] %v8819_v16  ;;  %3788 = vrot.lane.b32.xlu2 %v10355_v21, %s6022_s21  ;;  %v8839_v21 = vsel %vm10363_vm10, -1e+30, %v8761_v50 }
 0x5df   : > { %v3496_v8 = vmax.f32 %v8839_v21, %v8830_v9 }
 0x5e0   : > { %v5499_v46 = vpop.eup %5498  ;;  %v2979_v25 = vpop.xlane.xlu2 %2978 }
 0x5e1   : > { %5500 = vrcp.f32 %v2979_v25  ;;  %v8832_v47 = vpop.xlane.xlu0 %3491  ;;  %v3024_v11 = vmul.f32 %v5499_v46, %v8617_v51  ;;  %v3025_v6 = vmul.f32 %v5499_v46, %v8619_v59  ;;  %v10366_v51 = vld [vmem:[#allocation48_spill] sm:$0xff]  ;;  %v10367_v46 = vld [vmem:[#allocation59_spill] sm:$0xff] }
 0x5e2   : > { %v2360_v50 = vadd.f32 %v8305_v29, %v10367_v46  ;;  %v10368_v25 = vld [vmem:[#allocation124_spill] sm:$0xff] }
 0x5e3   : > { %v8841_v27 = vadd.f32 %v3024_v11, %v2356_v10  ;;  %v3076_v24 = vpack.c.bf16 %v3024_v11, %v3022_v22  ;;  %v8843_v2 = vadd.f32 %v3025_v6, %v2357_v12  ;;  %v3077_v49 = vpack.c.bf16 %v3025_v6, %v3023_v4  ;;  %v10369_v22 = vld [vmem:[#allocation61_spill] sm:$0xff] }
 0x5e4   : > { %v2361_v10 = vadd.f32 %v8308_v45, %v10368_v25  ;;  %v10372_v45 = vld [vmem:[#allocation128_spill] sm:$0xff] }
 0x5e5   : > { %10364 = vst [vmem:[#allocation117_spill] sm:$0xff] %v8841_v27  ;;  %3163 = vmatmul.bf16.gmra.mxu3 %v3076_v24  ;;  %3212 = vmatmul.bf16.gmra.mxu0 %v3077_v49  ;;  %v8861_v24 = vpop.f32.mrf.mxu0  ;;  %v10373_v49 = vld [vmem:[#allocation155_spill] sm:$0xff] }
 0x5e6   : > { %10365 = vst [vmem:[#allocation56_spill] sm:$0xff] %v8843_v2  ;;  %3497 = vmax.xlane.f32.xlu1 %v3496_v8  ;;  %3766 = vrot.lane.b32.xlu2 %v10366_v51, %s6022_s21  ;;  %v2362_v8 = vadd.f32 %v10373_v49, %v10372_v45  ;;  %v10374_v51 = vld [vmem:[#allocation129_spill] sm:$0xff] }
 0x5e7   : > { %v5501_v59 = vpop.eup %5500 }
 0x5e8   : > { %3786 = vrot.lane.b32.xlu0 %v10369_v22, %s6022_s21  ;;  %v3781_v4 = vpop.permute.xlu2 %3780  ;;  %v3028_v12 = vmul.f32 %v5501_v59, %v8641_v53  ;;  %v3029_v63 = vmul.f32 %v5501_v59, %v8647_v48  ;;  %v10375_v53 = vld [vmem:[#allocation156_spill] sm:$0xff]  ;;  %v10378_v22 = vld [vmem:[#allocation62_spill] sm:$0xff] }
 0x5e9   : > { %v2982_v11 = vpop.xlane.xlu0 %2981  ;;  %3814 = vmatpush.bf16.msrb.mxu3 %v3781_v4  ;;  %v2363_v46 = vadd.f32 %v10375_v53, %v10374_v51  ;;  %v8885_v4 = vpop.f32.mrf.mxu2 }
 0x5ea   : > { %5502 = vrcp.f32 %v2982_v11  ;;  %v8857_v6 = vadd.f32 %v3028_v12, %v2360_v50  ;;  %v8859_v31 = vadd.f32 %v3029_v63, %v2361_v10  ;;  %v8875_v50 = vpop.f32.mrf.mxu3 }
 0x5ec   : > { %10370 = vst [vmem:[#allocation57_spill] sm:$0xff] %v8857_v6 }
 0x5ed   : > { %10371 = vst [vmem:[#allocation119_spill] sm:$0xff] %v8859_v31 }
 0x5f0   : > { %v5503_v29 = vpop.eup %5502  ;;  %3784 = vrot.lane.b32.xlu0 %v10221_v30, %s6022_s21  ;;  %v3777_v51 = vpop.permute.xlu2 %3776 }
 0x5f1   : > { %v8870_v48 = vmul.f32 %v5503_v29, %v8659_v20  ;;  %v8873_v59 = vmul.f32 %v5503_v29, %v8661_v56  ;;  %v8887_v20 = vpop.f32.mrf.mxu1  ;;  %v3428_v2 = vpop.f32.mrf.mxu2 }
 0x5f3   : > { %v8878_v25 = vadd.f32 %v8870_v48, %v2362_v8  ;;  %v8881_v10 = vadd.f32 %v8873_v59, %v2363_v46  ;;  %v10379_v8 = vld [vmem:[#allocation51_spill] sm:$0xff] }
 0x5f5   : > { %10376 = vst [vmem:[#allocation120_spill] sm:$0xff] %v8878_v25  ;;  %v3193_v30 = vpop.f32.mrf.mxu0  ;;  %v10381_v25 = vld [vmem:[#allocation63_spill] sm:$0xff] }
 0x5f6   : > { %10377 = vst [vmem:[#allocation80_spill] sm:$0xff] %v8881_v10  ;;  %v10380_v10 = vld [vmem:[#allocation91_spill] sm:$0xff] }
 0x5f7   : > { %v2358_v31 = vadd.f32 %v10381_v25, %v10380_v10  ;;  %v10387_v10 = vld [vmem:[#allocation88_spill] sm:$0xff] }
 0x5f8   : > { %3782 = vrot.lane.b32.xlu0 %v10378_v22, %s6022_s21  ;;  %vm10388_vm11 = vnez %v10387_v10 }
 0x5f9   : > { %v3379_v27 = vpop.f32.mrf.mxu1 }
 0x5fb   : > { %v3144_v11 = vpop.f32.mrf.mxu3 }
 0x5fc   : > { %v8889_v45 = vadd.f32 %v3193_v30, %v3144_v11  ;;  %v3779_v56 = vpop.permute.xlu0 %3778  ;;  %v10382_v30 = vld [vmem:[#allocation110_spill] sm:$0xff]  ;;  %v10383_v11 = vld [vmem:[#allocation151_spill] sm:$0xff] }
 0x5fd   : > { %v2976_v29 = vpop.xlane.xlu1 %2975  ;;  %v8891_v49 = vpop.f32.mrf.mxu0  ;;  %3815 = vmatpush.bf16.msrb.mxu3 %v3779_v56  ;;  %v2359_v6 = vadd.f32 %v10383_v11, %v10382_v30  ;;  %v8917_v30 = vsel %vm10223_vm15, -1e+30, %v3379_v27  ;;  %v3531_v27 = vsub.f32 %v8550_v39, %v8807_v35 }
 0x5fe   : > { %5504 = vrcp.f32 %v2976_v29 }
 0x5ff   : > { %3770 = vrot.lane.b32.xlu1 %v10379_v8, %s6022_s21 }
 0x601   : > { %3816 = vmatpush.bf16.msrb.mxu3 %v3777_v51  ;;  %v10384_v51 = vld [vmem:[#allocation47_spill] sm:$0xff]  ;;  %v3382_v11 = vpop.f32.mrf.mxu1 }
 0x603   : > { %v8895_v53 = vpop.f32.mrf.mxu3 }
 0x604   : > { %v5505_v46 = vpop.eup %5504  ;;  %v3775_v22 = vpop.permute.xlu0 %3774 }
 0x605   : > { %3817 = vmatpush.bf16.msrb.mxu3 %v3775_v22  ;;  %v3026_v56 = vmul.f32 %v5505_v46, %v8691_v60  ;;  %v3027_v29 = vmul.f32 %v5505_v46, %v8693_v55  ;;  %v3198_v8 = vpop.f32.mrf.mxu0  ;;  %v8911_v22 = vsel %vm10388_vm11, -1e+30, %v3428_v2  ;;  %v3534_v60 = vsub.f32 %v8653_v5, %v8832_v47  ;;  %v3431_v2 = vpop.f32.mrf.mxu2 }
 0x606   : > { %v8929_v5 = vpop.xlane.xlu1 %3494 }
 0x607   : > { %3768 = vrot.lane.b32.xlu1 %v10384_v51, %s6022_s21  ;;  %v8905_v7 = vadd.f32 %v3026_v56, %v2358_v31  ;;  %v3078_v23 = vpack.c.bf16 %v3028_v12, %v3026_v56  ;;  %v8907_v28 = vadd.f32 %v3027_v29, %v2359_v6  ;;  %v3079_v25 = vpack.c.bf16 %v3029_v63, %v3027_v29  ;;  %v10390_v29 = vld [vmem:[#allocation90_spill] sm:$0xff] }
 0x608   : > { %v3535_v12 = vsub.f32 %v8639_v42, %v8832_v47  ;;  %v3530_v31 = vsub.f32 %v8554_v62, %v8807_v35  ;;  %v3574_v56 = vmul.f32 1.442695, %v3534_v60  ;;  %vm10391_vm12 = vnez %v10390_v29  ;;  %v10392_v62 = vld [vmem:[#allocation89_spill] sm:$0xff] }
 0x609   : > { %10385 = vst [vmem:[#allocation54_spill] sm:$0xff] %v8905_v7  ;;  %3168 = vmatmul.bf16.gmra.mxu3 %v3078_v23  ;;  %3217 = vmatmul.bf16.gmra.mxu0 %v3079_v25  ;;  %v3505_v23 = vmax.f32 %v8917_v30, %v8911_v22  ;;  %vm10393_vm14 = vnez %v10392_v62  ;;  %v3568_v60 = vmul.f32 1.442695, %v3531_v27  ;;  %v10395_v62 = vld [vmem:[#allocation130_spill] sm:$0xff] }
 0x60a   : > { %10386 = vst [vmem:[#allocation79_spill] sm:$0xff] %v8907_v28  ;;  %v3576_v42 = vmul.f32 1.442695, %v3535_v12  ;;  %v3566_v51 = vmul.f32 1.442695, %v3530_v31  ;;  %5506 = vpow2.f32 %v3574_v56 }
 0x60b   : > { %v3149_v55 = vpop.f32.mrf.mxu3  ;;  %v8943_v10 = vsel %vm10393_vm14, -1e+30, %v3382_v11 }
 0x60c   : > { %v8921_v6 = vadd.f32 %v3198_v8, %v3149_v55  ;;  %v8923_v63 = vpop.permute.xlu0 %3792  ;;  %v8937_v8 = vsel %vm10391_vm12, -1e+30, %v3431_v2  ;;  %5508 = vpow2.f32 %v3576_v42 }
 0x60d   : > { %v8933_v47 = vpop.f32.mrf.mxu0  ;;  %v3508_v39 = vmax.f32 %v8943_v10, %v8937_v8  ;;  %5510 = vpow2.f32 %v3566_v51  ;;  %v8947_v46 = vpop.f32.mrf.mxu2 }
 0x60f   : > { %3506 = vmax.xlane.f32.xlu2 %v3505_v23  ;;  %v8951_v23 = vpop.f32.mrf.mxu1 }
 0x610   : > { %v8949_v12 = vpop.eup %5506 }
 0x612   : > { %v8953_v2 = vpop.eup %5508 }
 0x613   : > { %v8939_v25 = vpop.f32.mrf.mxu3  ;;  %v8955_v56 = vpop.eup %5510  ;;  %v3634_v29 = vadd.f32 %v8953_v2, %v8949_v12 }
 0x614   : > { %v3773_v55 = vpop.permute.xlu0 %3772 }
 0x615   : > { %3818 = vmatpush.bf16.msrb.mxu3 %v3773_v55  ;;  %v3203_v31 = vpop.f32.mrf.mxu0  ;;  %v3436_v19 = vpop.f32.mrf.mxu2 }
 0x616   : > { %v2985_v35 = vpop.xlane.xlu1 %2984 }
 0x617   : > { %5512 = vrcp.f32 %v2985_v35  ;;  %3509 = vmax.xlane.f32.xlu2 %v3508_v39  ;;  %v10397_v39 = vld [vmem:[#allocation46_spill] sm:$0xff] }
 0x618   : > { %5514 = vpow2.f32 %v3568_v60  ;;  %v10396_v60 = vld [vmem:[#allocation157_spill] sm:$0xff]  ;;  %v10398_v35 = vld [vmem:[#allocation158_spill] sm:$0xff] }
 0x619   : > { %v2364_v55 = vadd.f32 %v10396_v60, %v10395_v62  ;;  %v2365_v28 = vadd.f32 %v10398_v35, %v10397_v39  ;;  %v8979_v39 = vsel %vm10256_vm13, -1e+30, %v3436_v19  ;;  %v3795_v19 = vpop.permute.xlu2 %3794  ;;  %v3536_v60 = vsub.f32 %v8717_v3, %v8929_v5  ;;  %v10407_v3 = vld [vmem:[#allocation94_spill] sm:$0xff] }
 0x61a   : > { %vm10408_vm15 = vnez %v10407_v3 }
 0x61b   : > { %v3154_v11 = vpop.f32.mrf.mxu3 }
 0x61c   : > { %v8957_v27 = vadd.f32 %v3203_v31, %v3154_v11 }
 0x61d   : > { %v5513_v42 = vpop.eup %5512 }
 0x61e   : > { %10394 = vst [vmem:[#allocation53_spill] sm:$0xff] %v8957_v27  ;;  %v8961_v51 = vpop.eup %5514  ;;  %v3032_v7 = vmul.f32 %v5513_v42, %v8739_v58  ;;  %v3033_v16 = vmul.f32 %v5513_v42, %v8741_v34  ;;  %v3387_v27 = vpop.f32.mrf.mxu1  ;;  %v3537_v58 = vsub.f32 %v8707_v36, %v8929_v5  ;;  %v9021_v36 = vsel %vm10408_vm15, -1e+30, %v8947_v46 }
 0x61f   : > { %3635 = vadd.xlane.f32.xlu2 %v3634_v29  ;;  %v3628_v62 = vadd.f32 %v8961_v51, %v8955_v56  ;;  %v8983_v34 = vsel %vm10259_vm0, -1e+30, %v3387_v27  ;;  %v10405_v27 = vld [vmem:[#allocation85_spill] sm:$0xff] }
 0x620   : > { %v8969_v31 = vadd.f32 %v3032_v7, %v2364_v55  ;;  %v3080_v11 = vpack.c.bf16 %v3032_v7, %v8870_v48  ;;  %v8972_v41 = vadd.f32 %v3033_v16, %v2365_v28  ;;  %v3081_v37 = vpack.c.bf16 %v3033_v16, %v8873_v59 }
 0x621   : > { %v3514_v28 = vmax.f32 %v8983_v34, %v8979_v39  ;;  %v3532_v7 = vsub.f32 %v8623_v14, %v8813_v13  ;;  %v3533_v16 = vsub.f32 %v8613_v44, %v8813_v13  ;;  %vm10406_vm0 = vnez %v10405_v27 }
 0x622   : > { %10399 = vst [vmem:[#allocation58_spill] sm:$0xff] %v8969_v31  ;;  %3173 = vmatmul.bf16.gmra.mxu3 %v3080_v11  ;;  %3222 = vmatmul.bf16.gmra.mxu0 %v3081_v37  ;;  %v10403_v37 = vld [vmem:[#allocation86_spill] sm:$0xff]  ;;  %v8999_v29 = vsel %vm10406_vm0, -1e+30, %v8887_v20 }
 0x623   : > { %10400 = vst [vmem:[#allocation50_spill] sm:$0xff] %v8972_v41  ;;  %3629 = vadd.xlane.f32.xlu0 %v3628_v62  ;;  %v3570_v48 = vmul.f32 1.442695, %v3532_v7  ;;  %v3572_v59 = vmul.f32 1.442695, %v3533_v16  ;;  %vm10404_vm13 = vnez %v10403_v37  ;;  %v3791_v16 = vpop.permute.xlu0 %3790 }
 0x624   : > { %v8994_v42 = vsel %vm10404_vm13, -1e+30, %v8885_v4  ;;  %v3580_v7 = vmul.f32 1.442695, %v3537_v58 }
 0x625   : > { %5516 = vpow2.f32 %v3570_v48  ;;  %v3502_v44 = vmax.f32 %v8999_v29, %v8994_v42 }
 0x626   : > { %5518 = vpow2.f32 %v3572_v59 }
 0x627   : > { %3515 = vmax.xlane.f32.xlu2 %v3514_v28 }
 0x62b   : > { %v9005_v4 = vpop.eup %5516 }
 0x62c   : > { %v9007_v11 = vpop.eup %5518 }
 0x62e   : > { %v3797_v14 = vpop.permute.xlu1 %3796 }
 0x62f   : > { %3863 = vmatpush.bf16.msrb.mxu0 %v3797_v14 }
 0x631   : > { %3503 = vmax.xlane.f32.xlu1 %v3502_v44  ;;  %v3501_v13 = vpop.xlane.xlu2 %3500 }
 0x632   : > { %v3540_v55 = vsub.f32 %v8777_v40, %v3501_v13  ;;  %v3541_v35 = vsub.f32 %v8773_v15, %v3501_v13  ;;  %v3631_v15 = vadd.f32 %v9007_v11, %v9005_v4  ;;  %v3578_v40 = vmul.f32 1.442695, %v3536_v60  ;;  %v10411_v13 = vld [vmem:[#allocation111_spill] sm:$0xff] }
 0x633   : > { %3864 = vmatpush.bf16.msrb.mxu0 %v3795_v19 }
 0x634   : > { %v3586_v62 = vmul.f32 1.442695, %v3540_v55  ;;  %v3588_v20 = vmul.f32 1.442695, %v3541_v35  ;;  %v10412_v35 = vld [vmem:[#allocation112_spill] sm:$0xff] }
 0x636   : > { %5520 = vpow2.f32 %v3586_v62 }
 0x637   : > { %5522 = vpow2.f32 %v3588_v20  ;;  %3865 = vmatpush.bf16.msrb.mxu0 %v8923_v63  ;;  %v10409_v63 = vld [vmem:[#allocation93_spill] sm:$0xff] }
 0x638   : > { %vm10410_vm8 = vnez %v10409_v63  ;;  %v10414_v63 = vld [vmem:[#allocation97_spill] sm:$0xff] }
 0x639   : > { %3632 = vadd.xlane.f32.xlu1 %v3631_v15  ;;  %v3627_v28 = vpop.xlane.xlu2 %3626  ;;  %v9028_v19 = vsel %vm10410_vm8, -1e+30, %v8951_v23  ;;  %v3438_v15 = vpop.f32.mrf.mxu2  ;;  %vm10415_vm1 = vnez %v10414_v63 }
 0x63a   : > { %5524 = vrcp.f32 %v3627_v28  ;;  %v3511_v37 = vmax.f32 %v9028_v19, %v9021_v36 }
 0x63b   : > { %3866 = vmatpush.bf16.msrb.mxu0 %v3791_v16  ;;  %5526 = vpow2.f32 %v3578_v40  ;;  %v3389_v40 = vpop.f32.mrf.mxu1  ;;  %v9059_v16 = vpop.f32.mrf.mxu0 }
 0x63c   : > { %v9016_v48 = vpop.eup %5520  ;;  %5528 = vpow2.f32 %v3580_v7  ;;  %v9057_v7 = vsel %vm10245_vm9, -1e+30, %v3438_v15 }
 0x63d   : > { %v9023_v5 = vpop.eup %5522 }
 0x63e   : > { %v3643_v59 = vadd.f32 %v9023_v5, %v9016_v48 }
 0x640   : > { %v5525_v27 = vpop.eup %5524  ;;  %3644 = vadd.xlane.f32.xlu2 %v3643_v59  ;;  %v9063_v59 = vsel %vm10415_vm1, -1e+30, %v3389_v40  ;;  %v10418_v40 = vld [vmem:[#allocation102_spill] sm:$0xff] }
 0x641   : > { %v9036_v46 = vmul.f32 %v5525_v27, %v8783_v33  ;;  %v9039_v14 = vmul.f32 %v5525_v27, %v8786_v1  ;;  %3512 = vmax.xlane.f32.xlu1 %v3511_v37  ;;  %v3789_v44 = vpop.permute.xlu2 %3788  ;;  %v9041_v23 = vpop.eup %5526  ;;  %v3517_v37 = vmax.f32 %v9063_v59, %v9057_v7  ;;  %vm10419_vm9 = vnez %v10418_v40 }
 0x642   : > { %3867 = vmatpush.bf16.msrb.mxu0 %v3789_v44  ;;  %v9047_v20 = vpop.eup %5528 }
 0x643   : > { %v3720_v55 = vadd.f32 %v9036_v46, %v10411_v13  ;;  %v3721_v62 = vadd.f32 %v9039_v14, %v10412_v35  ;;  %v3637_v1 = vadd.f32 %v9047_v20, %v9041_v23  ;;  %v9069_v13 = vpop.f32.mrf.mxu3  ;;  %v10416_v35 = vld [vmem:[#allocation113_spill] sm:$0xff] }
 0x645   : > { %v4293_v60 = vmul.f32 0.25, %v3720_v55  ;;  %v4294_v58 = vmul.f32 0.25, %v3721_v62  ;;  %v3441_v55 = vpop.f32.mrf.mxu2 }
 0x646   : > { %v9075_v28 = vsel %vm10419_vm9, -1e+30, %v3441_v55 }
 0x647   : > { %4325 = vst [vmem:[%s9049_s15 + $0x10] sm:$0xff] %v4293_v60  ;;  %v3624_v33 = vpop.xlane.xlu0 %3623  ;;  %v10417_v60 = vld [vmem:[#allocation114_spill] sm:$0xff] }
 0x648   : > { %4326 = vst [vmem:[%s9049_s15 + $0x18] sm:$0xff] %v4294_v58  ;;  %5530 = vrcp.f32 %v3624_v33  ;;  %v3392_v33 = vpop.f32.mrf.mxu1 }
 0x649   : > { %3638 = vadd.xlane.f32.xlu1 %v3637_v1 }
 0x64e   : > { %v5531_v3 = vpop.eup %5530 }
 0x64f   : > { %v3686_v27 = vmul.f32 %v5531_v3, %v8791_v54  ;;  %v3687_v44 = vmul.f32 %v5531_v3, %v8793_v61  ;;  %v10420_v54 = vld [vmem:[#allocation101_spill] sm:$0xff] }
 0x650   : > { %vm10421_vm2 = vnez %v10420_v54 }
 0x651   : > { %v3718_v62 = vadd.f32 %v3686_v27, %v10416_v35  ;;  %v3719_v58 = vadd.f32 %v3687_v44, %v10417_v60  ;;  %3518 = vmax.xlane.f32.xlu1 %v3517_v37  ;;  %v9080_v61 = vsel %vm10421_vm2, -1e+30, %v3392_v33 }
 0x652   : > { %v3208_v63 = vpop.f32.mrf.mxu0  ;;  %v3520_v3 = vmax.f32 %v9080_v61, %v9075_v28 }
 0x653   : > { %v4291_v1 = vmul.f32 0.25, %v3718_v62  ;;  %v4292_v15 = vmul.f32 0.25, %v3719_v58 }
 0x655   : > { %4323 = vst [vmem:[%s9049_s15] sm:$0xff] %v4291_v1 }
 0x656   : > { %4324 = vst [vmem:[%s9049_s15 + $0x8] sm:$0xff] %v4292_v15 }
 0x658   : > { %v3159_v35 = vpop.f32.mrf.mxu3 }
 0x659   : > { %v3498_v60 = vpop.xlane.xlu1 %3497  ;;  %v9085_v37 = vadd.f32 %v3208_v63, %v3159_v35  ;;  %3521 = vmax.xlane.f32.xlu1 %v3520_v3  ;;  %v3443_v35 = vpop.f32.mrf.mxu2 }
 0x65a   : > { %v3538_v62 = vsub.f32 %v8839_v21, %v3498_v60  ;;  %v3539_v55 = vsub.f32 %v8830_v9, %v3498_v60  ;;  %v3787_v58 = vpop.permute.xlu0 %3786  ;;  %v3210_v33 = vpop.f32.mrf.mxu0 }
 0x65b   : > { %3868 = vmatpush.bf16.msrb.mxu0 %v3787_v58  ;;  %v3394_v58 = vpop.f32.mrf.mxu1 }
 0x65c   : > { %v3582_v1 = vmul.f32 1.442695, %v3538_v62  ;;  %v3584_v40 = vmul.f32 1.442695, %v3539_v55  ;;  %v9108_v63 = vsel %vm10088_vm7, -1e+30, %v3394_v58 }
 0x65d   : > { %vm10473_vm7 = vcmask 261120  }
 0x65e   : > { %5532 = vpow2.f32 %v3582_v1  ;;  %vm10475_vm4 = vmmov %vm10473_vm7 }
 0x65f   : > { %5534 = vpow2.f32 %v3584_v40  ;;  %v10422_v40 = vld [vmem:[#allocation106_spill] sm:$0xff]  ;;  %vm10478_vm10 = vmmov %vm10475_vm4 }
 0x660   : > { %v3161_v15 = vpop.f32.mrf.mxu3  ;;  %vm10423_vm3 = vnez %v10422_v40  ;;  %vm10480_vm11 = vmmov %vm10475_vm4 }
 0x661   : > { %v9089_v54 = vadd.f32 %v3210_v33, %v3161_v15  ;;  %v9103_v33 = vsel %vm10423_vm3, -1e+30, %v3443_v35  ;;  %v3750_v35 = vpack.c.bf16 %v9036_v46, %v3686_v27  ;;  %vm10483_vm12 = vmmov %vm10475_vm4 }
 0x662   : > { %v3785_v41 = vpop.permute.xlu0 %3784  ;;  %v3213_v60 = vpop.f32.mrf.mxu0  ;;  %v3523_v31 = vmax.f32 %v9108_v63, %v9103_v33  ;;  %vm10485_vm14 = vmmov %vm10475_vm4 }
 0x663   : > { %3869 = vmatpush.bf16.msrb.mxu0 %v3785_v41  ;;  %v3751_v41 = vpack.c.bf16 %v9039_v14, %v3687_v44  ;;  %vm10488_vm13 = vmmov %vm10475_vm4 }
 0x664   : > { %v9093_v3 = vpop.eup %5532  ;;  %vm10490_vm0 = vmmov %vm10475_vm4 }
 0x665   : > { %v9095_v21 = vpop.eup %5534  ;;  %vm10493_vm15 = vmmov %vm10490_vm0 }
 0x666   : > { %v3640_v9 = vadd.f32 %v9095_v21, %v9093_v3  ;;  %vm10495_vm8 = vmmov %vm10490_vm0 }
 0x667   : > { %vm10498_vm1 = vmmov %vm10490_vm0 }
 0x668   : > { %3641 = vadd.xlane.f32.xlu0 %v3640_v9  ;;  %v3164_v62 = vpop.f32.mrf.mxu3  ;;  %vm10500_vm9 = vmmov %vm10490_vm0 }
 0x669   : > { %v9099_v55 = vadd.f32 %v3213_v60, %v3164_v62  ;;  %v3767_v62 = vpop.permute.xlu2 %3766  ;;  %vm10503_vm2 = vmmov %vm10490_vm0 }
 0x66a   : > { %v3783_v1 = vpop.permute.xlu0 %3782  ;;  %vm10505_vm3 = vmmov %vm10490_vm0 }
 0x66b   : > { %3870 = vmatpush.bf16.msrb.mxu0 %v3783_v1 }
 0x66e   : > { %3871 = vmatmul.bf16.vlgmr.msrb.gmra.mxu0 %v3751_v41 }
 0x670   : > { %3524 = vmax.xlane.f32.xlu0 %v3523_v31 }
 0x671   : > { %v3771_v9 = vpop.permute.xlu1 %3770 }
 0x672   : > { %3819 = vmatpush.bf16.msrb.mxu3 %v3771_v9 }
 0x679   : > { %v3769_v60 = vpop.permute.xlu1 %3768 }
 0x67a   : > { %3820 = vmatpush.bf16.msrb.mxu3 %v3769_v60 }
 0x67e   : > { %3821 = vmatpush.bf16.msrb.mxu3 %v3767_v62 }
 0x681   : > { %3822 = vmatmul.bf16.vlgmr.msrb.gmra.mxu3 %v3750_v35 }
 0x682   : > { %v3507_v1 = vpop.xlane.xlu2 %3506 }
 0x683   : > { %v3544_v14 = vsub.f32 %v8917_v30, %v3507_v1  ;;  %v3545_v44 = vsub.f32 %v8911_v22, %v3507_v1 }
 0x685   : > { %v3594_v58 = vmul.f32 1.442695, %v3544_v14  ;;  %v3596_v40 = vmul.f32 1.442695, %v3545_v44 }
 0x687   : > { %5536 = vpow2.f32 %v3594_v58 }
 0x688   : > { %5538 = vpow2.f32 %v3596_v40 }
 0x68a   : > { %v3510_v41 = vpop.xlane.xlu2 %3509 }
 0x68b   : > { %v3546_v31 = vsub.f32 %v8943_v10, %v3510_v41  ;;  %v3547_v15 = vsub.f32 %v8937_v8, %v3510_v41 }
 0x68d   : > { %v9117_v9 = vpop.eup %5536  ;;  %v3598_v60 = vmul.f32 1.442695, %v3546_v31  ;;  %v3600_v62 = vmul.f32 1.442695, %v3547_v15 }
 0x68e   : > { %v9119_v46 = vpop.eup %5538 }
 0x68f   : > { %5540 = vpow2.f32 %v3598_v60  ;;  %v3649_v30 = vadd.f32 %v9119_v46, %v9117_v9 }
 0x690   : > { %5542 = vpow2.f32 %v3600_v62 }
 0x691   : > { %3650 = vadd.xlane.f32.xlu1 %v3649_v30 }
 0x692   : > { %v3636_v22 = vpop.xlane.xlu2 %3635 }
 0x693   : > { %5544 = vrcp.f32 %v3636_v22 }
 0x695   : > { %v9123_v27 = vpop.eup %5540 }
 0x696   : > { %v9125_v35 = vpop.eup %5542  ;;  %v3630_v10 = vpop.xlane.xlu0 %3629 }
 0x697   : > { %5546 = vrcp.f32 %v3630_v10  ;;  %v3652_v8 = vadd.f32 %v9125_v35, %v9123_v27 }
 0x699   : > { %v5545_v1 = vpop.eup %5544  ;;  %3653 = vadd.xlane.f32.xlu0 %v3652_v8 }
 0x69a   : > { %v3516_v14 = vpop.xlane.xlu2 %3515  ;;  %v9130_v44 = vmul.f32 %v5545_v1, %v8949_v12  ;;  %v9133_v58 = vmul.f32 %v5545_v1, %v8953_v2 }
 0x69b   : > { %v3550_v40 = vsub.f32 %v8983_v34, %v3516_v14  ;;  %v3551_v41 = vsub.f32 %v8979_v39, %v3516_v14 }
 0x69c   : > { %v3726_v31 = vadd.f32 %v9130_v44, %v8685_v18  ;;  %v3727_v15 = vadd.f32 %v9133_v58, %v8687_v38 }
 0x69d   : > { %v5547_v60 = vpop.eup %5546  ;;  %v3606_v62 = vmul.f32 1.442695, %v3550_v40  ;;  %v3608_v12 = vmul.f32 1.442695, %v3551_v41 }
 0x69e   : > { %v3690_v30 = vmul.f32 %v5547_v60, %v8955_v56  ;;  %v3691_v2 = vmul.f32 %v5547_v60, %v8961_v51  ;;  %v4299_v22 = vmul.f32 0.25, %v3726_v31  ;;  %v4300_v34 = vmul.f32 0.25, %v3727_v15 }
 0x69f   : > { %5548 = vpow2.f32 %v3606_v62 }
 0x6a0   : > { %5550 = vpow2.f32 %v3608_v12  ;;  %v3722_v39 = vadd.f32 %v3690_v30, %v8671_v32  ;;  %v3723_v18 = vadd.f32 %v3691_v2, %v8674_v26  ;;  %4331 = vst [vmem:[%s9049_s15 + $0x40] sm:$0xff] %v4299_v22 }
 0x6a1   : > { %4332 = vst [vmem:[%s9049_s15 + $0x48] sm:$0xff] %v4300_v34 }
 0x6a2   : > { %v4295_v38 = vmul.f32 0.25, %v3722_v39  ;;  %v4296_v10 = vmul.f32 0.25, %v3723_v18  ;;  %v10425_v18 = vld [vmem:[#allocation135_spill] sm:$0xff] }
 0x6a4   : > { %v3504_v8 = vpop.xlane.xlu1 %3503  ;;  %4327 = vst [vmem:[%s9049_s15 + $0x20] sm:$0xff] %v4295_v38 }
 0x6a5   : > { %v9148_v1 = vpop.eup %5548  ;;  %v3542_v56 = vsub.f32 %v8999_v29, %v3504_v8  ;;  %v3543_v51 = vsub.f32 %v8994_v42, %v3504_v8  ;;  %4328 = vst [vmem:[%s9049_s15 + $0x28] sm:$0xff] %v4296_v10  ;;  %v10426_v8 = vld [vmem:[#allocation104_spill] sm:$0xff] }
 0x6a6   : > { %v9153_v14 = vpop.eup %5550 }
 0x6a7   : > { %v3590_v40 = vmul.f32 1.442695, %v3542_v56  ;;  %v3592_v41 = vmul.f32 1.442695, %v3543_v51  ;;  %v3658_v26 = vadd.f32 %v9153_v14, %v9148_v1 }
 0x6a9   : > { %5552 = vpow2.f32 %v3590_v40  ;;  %3659 = vadd.xlane.f32.xlu1 %v3658_v26 }
 0x6aa   : > { %5554 = vpow2.f32 %v3592_v41 }
 0x6ac   : > { %v3633_v32 = vpop.xlane.xlu1 %3632 }
 0x6ad   : > { %5556 = vrcp.f32 %v3633_v32 }
 0x6af   : > { %v9157_v31 = vpop.eup %5552 }
 0x6b0   : > { %v9159_v15 = vpop.eup %5554 }
 0x6b1   : > { %v3646_v42 = vadd.f32 %v9159_v15, %v9157_v31 }
 0x6b3   : > { %v5557_v29 = vpop.eup %5556  ;;  %3647 = vadd.xlane.f32.xlu2 %v3646_v42  ;;  %v3645_v60 = vpop.xlane.xlu2 %3644 }
 0x6b4   : > { %v3513_v62 = vpop.xlane.xlu1 %3512  ;;  %5558 = vrcp.f32 %v3645_v60  ;;  %v3692_v12 = vmul.f32 %v5557_v29, %v9005_v4  ;;  %v3693_v22 = vmul.f32 %v5557_v29, %v9007_v11 }
 0x6b5   : > { %v3548_v34 = vsub.f32 %v9028_v19, %v3513_v62  ;;  %v3549_v39 = vsub.f32 %v9021_v36, %v3513_v62 }
 0x6b6   : > { %v3724_v38 = vadd.f32 %v3692_v12, %v10425_v18  ;;  %v3752_v10 = vpack.c.bf16 %v3692_v12, %v3690_v30  ;;  %v3725_v56 = vadd.f32 %v3693_v22, %v10426_v8  ;;  %v3753_v51 = vpack.c.bf16 %v3693_v22, %v3691_v2 }
 0x6b7   : > { %v3602_v40 = vmul.f32 1.442695, %v3548_v34  ;;  %v3604_v41 = vmul.f32 1.442695, %v3549_v39  ;;  %v10427_v39 = vld [vmem:[#allocation76_spill] sm:$0xff] }
 0x6b8   : > { %3827 = vmatmul.bf16.gmra.mxu3 %v3752_v10  ;;  %v4297_v26 = vmul.f32 0.25, %v3724_v38  ;;  %3876 = vmatmul.bf16.gmra.mxu0 %v3753_v51  ;;  %v4298_v4 = vmul.f32 0.25, %v3725_v56  ;;  %v10428_v10 = vld [vmem:[#allocation75_spill] sm:$0xff] }
 0x6b9   : > { %5560 = vpow2.f32 %v3602_v40 }
 0x6ba   : > { %v5559_v11 = vpop.eup %5558  ;;  %5562 = vpow2.f32 %v3604_v41  ;;  %4329 = vst [vmem:[%s9049_s15 + $0x30] sm:$0xff] %v4297_v26 }
 0x6bb   : > { %4330 = vst [vmem:[%s9049_s15 + $0x38] sm:$0xff] %v4298_v4  ;;  %v9172_v36 = vmul.f32 %v5559_v11, %v9016_v48  ;;  %v9175_v19 = vmul.f32 %v5559_v11, %v9023_v5 }
 0x6bc   : > { %v3639_v30 = vpop.xlane.xlu1 %3638 }
 0x6bd   : > { %5564 = vrcp.f32 %v3639_v30  ;;  %v3732_v2 = vadd.f32 %v9172_v36, %v8711_v57  ;;  %v3733_v32 = vadd.f32 %v9175_v19, %v8713_v0  ;;  %v9207_v30 = vpop.f32.mrf.mxu0 }
 0x6bf   : > { %v9181_v42 = vpop.eup %5560  ;;  %v4305_v29 = vmul.f32 0.25, %v3732_v2  ;;  %v4306_v60 = vmul.f32 0.25, %v3733_v32 }
 0x6c0   : > { %v9183_v62 = vpop.eup %5562 }
 0x6c1   : > { %v3655_v48 = vadd.f32 %v9183_v62, %v9181_v42  ;;  %4337 = vst [vmem:[%s9049_s15 + $0x70] sm:$0xff] %v4305_v29 }
 0x6c2   : > { %4338 = vst [vmem:[%s9049_s15 + $0x78] sm:$0xff] %v4306_v60 }
 0x6c3   : > { %v5565_v5 = vpop.eup %5564  ;;  %3656 = vadd.xlane.f32.xlu2 %v3655_v48  ;;  %v10429_v48 = vld [vmem:[#allocation162_spill] sm:$0xff] }
 0x6c4   : > { %v3519_v12 = vpop.xlane.xlu1 %3518  ;;  %v3696_v22 = vmul.f32 %v5565_v5, %v9041_v23  ;;  %v3697_v57 = vmul.f32 %v5565_v5, %v9047_v20  ;;  %v10430_v5 = vld [vmem:[#allocation161_spill] sm:$0xff] }
 0x6c5   : > { %v3552_v0 = vsub.f32 %v9063_v59, %v3519_v12  ;;  %v3553_v34 = vsub.f32 %v9057_v7, %v3519_v12  ;;  %v9217_v60 = vpop.f32.mrf.mxu0  ;;  %v2507_v12 = vadd.f32 %v10430_v5, %v10429_v48 }
 0x6c6   : > { %v3728_v18 = vadd.f32 %v3696_v22, %v10427_v39  ;;  %v3754_v38 = vpack.c.bf16 %v3696_v22, %v9130_v44  ;;  %v3729_v8 = vadd.f32 %v3697_v57, %v10428_v10  ;;  %v3755_v56 = vpack.c.bf16 %v3697_v57, %v9133_v58 }
 0x6c7   : > { %v3610_v51 = vmul.f32 1.442695, %v3552_v0  ;;  %v3612_v40 = vmul.f32 1.442695, %v3553_v34 }
 0x6c8   : > { %3832 = vmatmul.bf16.gmra.mxu3 %v3754_v38  ;;  %v4301_v23 = vmul.f32 0.25, %v3728_v18  ;;  %3881 = vmatmul.bf16.gmra.mxu0 %v3755_v56  ;;  %v4302_v41 = vmul.f32 0.25, %v3729_v8  ;;  %v10431_v18 = vld [vmem:[#allocation160_spill] sm:$0xff] }
 0x6c9   : > { %5566 = vpow2.f32 %v3610_v51  ;;  %v5092_v38 = vpack.i.bf16 %v2507_v12, %v10431_v18  ;;  %v3206_v18 = vadd.f32 %v9059_v16, %v9069_v13  ;;  %v10436_v16 = vld [vmem:[#allocation99_spill] sm:$0xff] }
 0x6ca   : > { %5568 = vpow2.f32 %v3612_v40  ;;  %4333 = vst [vmem:[%s9049_s15 + $0x50] sm:$0xff] %v4301_v23 }
 0x6cb   : > { %4334 = vst [vmem:[%s9049_s15 + $0x58] sm:$0xff] %v4302_v41 }
 0x6cc   : > { %v3522_v20 = vpop.xlane.xlu1 %3521 }
 0x6cd   : > { %v3554_v7 = vsub.f32 %v9080_v61, %v3522_v20  ;;  %v3555_v59 = vsub.f32 %v9075_v28, %v3522_v20  ;;  %v9213_v61 = vpop.f32.mrf.mxu3  ;;  %v9232_v20 = vpop.f32.mrf.mxu0 }
 0x6cf   : > { %v9201_v44 = vpop.eup %5566  ;;  %v3614_v26 = vmul.f32 1.442695, %v3554_v7  ;;  %v3616_v4 = vmul.f32 1.442695, %v3555_v59  ;;  %v3191_v59 = vadd.f32 %v8861_v24, %v8875_v50  ;;  %v3196_v24 = vadd.f32 %v8891_v49, %v8895_v53  ;;  %v10435_v49 = vld [vmem:[#allocation53_spill] sm:$0xff] }
 0x6d0   : > { %v9203_v58 = vpop.eup %5568 }
 0x6d1   : > { %5570 = vpow2.f32 %v3614_v26  ;;  %v3661_v11 = vadd.f32 %v9203_v58, %v9201_v44  ;;  %v5112_v50 = vpack.i.bf16 %v3196_v24, %v8889_v45  ;;  %v5142_v45 = vpack.i.bf16 %v3206_v18, %v10435_v49  ;;  %v10443_v24 = vld [vmem:[#allocation166_spill] sm:$0xff] }
 0x6d2   : > { %5572 = vpow2.f32 %v3616_v4  ;;  %v10447_v49 = vld [vmem:[#allocation74_spill] sm:$0xff] }
 0x6d3   : > { %3662 = vadd.xlane.f32.xlu0 %v3661_v11 }
 0x6d5   : > { %v9221_v22 = vpop.f32.mrf.mxu3  ;;  %v9248_v11 = vpop.f32.mrf.mxu0 }
 0x6d7   : > { %v9209_v2 = vpop.eup %5570 }
 0x6d8   : > { %v9211_v32 = vpop.eup %5572 }
 0x6d9   : > { %v3664_v28 = vadd.f32 %v9211_v32, %v9209_v2 }
 0x6db   : > { %3665 = vadd.xlane.f32.xlu2 %v3664_v28  ;;  %v3642_v29 = vpop.xlane.xlu0 %3641 }
 0x6dc   : > { %5574 = vrcp.f32 %v3642_v29  ;;  %v5097_v29 = vpack.i.bf16 %v3191_v59, %v8769_v17 }
 0x6dd   : > { %v3225_v5 = vpop.f32.mrf.mxu0 }
 0x6e2   : > { %v5575_v57 = vpop.eup %5574 }
 0x6e3   : > { %v3525_v0 = vpop.xlane.xlu0 %3524  ;;  %v3698_v34 = vmul.f32 %v5575_v57, %v9093_v3  ;;  %v3699_v39 = vmul.f32 %v5575_v57, %v9095_v21  ;;  %v3201_v57 = vadd.f32 %v8933_v47, %v8939_v25 }
 0x6e4   : > { %v3556_v10 = vsub.f32 %v9108_v63, %v3525_v0  ;;  %v3557_v8 = vsub.f32 %v9103_v33, %v3525_v0  ;;  %v10432_v33 = vld [vmem:[#allocation165_spill] sm:$0xff] }
 0x6e5   : > { %v3730_v56 = vadd.f32 %v3698_v34, %v8733_v43  ;;  %v3756_v51 = vpack.c.bf16 %v9172_v36, %v3698_v34  ;;  %v3731_v40 = vadd.f32 %v3699_v39, %v8735_v52  ;;  %v3757_v23 = vpack.c.bf16 %v9175_v19, %v3699_v39  ;;  %v10433_v43 = vld [vmem:[#allocation164_spill] sm:$0xff]  ;;  %v9238_v36 = vpop.f32.mrf.mxu3  ;;  %v10434_v52 = vld [vmem:[#allocation163_spill] sm:$0xff] }
 0x6e6   : > { %v3618_v41 = vmul.f32 1.442695, %v3556_v10  ;;  %v3620_v3 = vmul.f32 1.442695, %v3557_v8  ;;  %v2512_v7 = vadd.f32 %v10433_v43, %v10432_v33  ;;  %v5127_v0 = vpack.i.bf16 %v3201_v57, %v8921_v6 }
 0x6e7   : > { %5093 = vrot.lane.b32.xlu0 %v5092_v38, %s6022_s21  ;;  %3837 = vmatmul.bf16.gmra.mxu3 %v3756_v51  ;;  %v4303_v63 = vmul.f32 0.25, %v3730_v56  ;;  %v4304_v21 = vmul.f32 0.25, %v3731_v40  ;;  %v10437_v51 = vld [vmem:[#allocation116_spill] sm:$0xff]  ;;  %v10440_v33 = vpack.i.bf16 %v9089_v54, %v9085_v37 }
 0x6e8   : > { %5576 = vpow2.f32 %v3618_v41  ;;  %3886 = vmatmul.bf16.gmra.mxu0 %v3757_v23  ;;  %v5107_v19 = vpack.i.bf16 %v2512_v7, %v10434_v52  ;;  %v3216_v52 = vadd.f32 %v9207_v30, %v9213_v61  ;;  %v3221_v61 = vadd.f32 %v9232_v20, %v9238_v36 }
 0x6e9   : > { %5578 = vpow2.f32 %v3620_v3  ;;  %4335 = vst [vmem:[%s9049_s15 + $0x60] sm:$0xff] %v4303_v63  ;;  %v10438_v63 = vld [vmem:[#allocation168_spill] sm:$0xff] }
 0x6ea   : > { %4336 = vst [vmem:[%s9049_s15 + $0x68] sm:$0xff] %v4304_v21  ;;  %v5172_v57 = vpack.i.bf16 %v3216_v52, %v9099_v55 }
 0x6eb   : > { %v3872_v17 = vpop.f32.mrf.mxu0 }
 0x6ed   : > { %v9254_v48 = vpop.f32.mrf.mxu3 }
 0x6ee   : > { %v9244_v26 = vpop.eup %5576 }
 0x6ef   : > { %v9246_v4 = vpop.eup %5578  ;;  %5108 = vrot.lane.b32.xlu0 %v5107_v19, %s6022_s21  ;;  %v10441_v19 = vld [vmem:[#allocation100_spill] sm:$0xff] }
 0x6f0   : > { %v3667_v28 = vadd.f32 %v9246_v4, %v9244_v26 }
 0x6f2   : > { %3668 = vadd.xlane.f32.xlu1 %v3667_v28  ;;  %v10442_v28 = vld [vmem:[#allocation45_spill] sm:$0xff] }
 0x6f3   : > { %5098 = vrot.lane.b32.xlu2 %v5097_v29, %s6024_s27  ;;  %v3874_v38 = vpop.f32.mrf.mxu0 }
 0x6f5   : > { %v3176_v12 = vpop.f32.mrf.mxu3 }
 0x6f6   : > { %v3226_v36 = vadd.f32 %v3225_v5, %v3176_v12  ;;  %v10452_v5 = vld [vmem:[#allocation170_spill] sm:$0xff]  ;;  %v10453_v12 = vld [vmem:[#allocation169_spill] sm:$0xff] }
 0x6fb   : > { %5113 = vrot.lane.b32.xlu2 %v5112_v50, %s6024_s27 }
 0x703   : > { %5128 = vrot.lane.b32.xlu2 %v5127_v0, %s6024_s27 }
 0x704   : > { %v3823_v34 = vpop.f32.mrf.mxu3  ;;  %v3651_v39 = vpop.xlane.xlu1 %3650 }
 0x705   : > { %5580 = vrcp.f32 %v3651_v39  ;;  %v3873_v8 = vadd.f32 %v3872_v17, %v3823_v34  ;;  %v10446_v17 = vld [vmem:[#allocation134_spill] sm:$0xff]  ;;  %v3219_v39 = vadd.f32 %v9217_v60, %v9221_v22 }
 0x706   : > { %v10449_v60 = vld [vmem:[#allocation54_spill] sm:$0xff] }
 0x707   : > { %v5187_v55 = vpack.i.bf16 %v3221_v61, %v3219_v39 }
 0x70b   : > { %v5581_v53 = vpop.eup %5580  ;;  %5143 = vrot.lane.b32.xlu2 %v5142_v45, %s6024_s27  ;;  %v10448_v45 = vld [vmem:[#allocation72_spill] sm:$0xff] }
 0x70c   : > { %v3825_v10 = vpop.f32.mrf.mxu3  ;;  %v3654_v47 = vpop.xlane.xlu0 %3653  ;;  %v9270_v6 = vmul.f32 %v5581_v53, %v9117_v9  ;;  %v9273_v25 = vmul.f32 %v5581_v53, %v9119_v46  ;;  %v10439_v46 = vld [vmem:[#allocation167_spill] sm:$0xff]  ;;  %v2527_v53 = vadd.f32 %v10448_v45, %v10447_v49 }
 0x70d   : > { %v3875_v56 = vadd.f32 %v3874_v38, %v3825_v10  ;;  %5582 = vrcp.f32 %v3654_v47  ;;  %v2517_v21 = vadd.f32 %v10439_v46, %v10438_v63  ;;  %v10450_v47 = vld [vmem:[#allocation79_spill] sm:$0xff]  ;;  %v10455_v63 = vld [vmem:[#allocation118_spill] sm:$0xff] }
 0x70e   : > { %v3736_v13 = vadd.f32 %v9270_v6, %v10436_v16  ;;  %v3737_v40 = vadd.f32 %v9273_v25, %v10437_v51 }
 0x70f   : > { %v5102_v23 = vpack.i.bf16 %v3875_v56, %v3873_v8  ;;  %v5122_v37 = vpack.i.bf16 %v2517_v21, %v10443_v24  ;;  %v10451_v56 = vld [vmem:[#allocation71_spill] sm:$0xff] }
 0x710   : > { %v4309_v41 = vmul.f32 0.25, %v3736_v13  ;;  %v4310_v3 = vmul.f32 0.25, %v3737_v40  ;;  %v5152_v16 = vpack.i.bf16 %v2527_v53, %v10451_v56  ;;  %v3224_v13 = vadd.f32 %v9248_v11, %v9254_v48  ;;  %v10454_v48 = vld [vmem:[#allocation73_spill] sm:$0xff]  ;;  %v10458_v24 = vld [vmem:[#allocation103_spill] sm:$0xff]  ;;  %v10464_v53 = vld [vmem:[#allocation56_spill] sm:$0xff] }
 0x711   : > { %5103 = vrot.lane.b32.xlu1 %v5102_v23, %s6023_s12  ;;  %v2532_v23 = vadd.f32 %v10453_v12, %v10452_v5  ;;  %v10465_v5 = vld [vmem:[#allocation57_spill] sm:$0xff] }
 0x712   : > { %4341 = vst [vmem:[%s9049_s15 + $0x90] sm:$0xff] %v4309_v41 }
 0x713   : > { %v5583_v9 = vpop.eup %5582  ;;  %5158 = vrot.lane.b32.xlu2 %v10440_v33, %s6024_s27  ;;  %4342 = vst [vmem:[%s9049_s15 + $0x98] sm:$0xff] %v4310_v3  ;;  %v10456_v33 = vld [vmem:[#allocation78_spill] sm:$0xff] }
 0x714   : > { %v9289_v43 = vmul.f32 %v5583_v9, %v9123_v27  ;;  %v9292_v7 = vmul.f32 %v5583_v9, %v9125_v35  ;;  %v10444_v27 = vld [vmem:[#allocation69_spill] sm:$0xff]  ;;  %v10445_v35 = vld [vmem:[#allocation70_spill] sm:$0xff]  ;;  %v5167_v9 = vpack.i.bf16 %v2532_v23, %v10454_v48 }
 0x715   : > { %v2522_v0 = vadd.f32 %v10445_v35, %v10444_v27  ;;  %v10461_v27 = vld [vmem:[#allocation77_spill] sm:$0xff] }
 0x716   : > { %v3738_v59 = vadd.f32 %v9289_v43, %v10441_v19  ;;  %v3739_v29 = vadd.f32 %v9292_v7, %v10442_v28 }
 0x717   : > { %v5137_v34 = vpack.i.bf16 %v2522_v0, %v10446_v17 }
 0x718   : > { %v4311_v54 = vmul.f32 0.25, %v3738_v59  ;;  %v4312_v50 = vmul.f32 0.25, %v3739_v29  ;;  %v10457_v29 = vld [vmem:[#allocation136_spill] sm:$0xff] }
 0x719   : > { %5123 = vrot.lane.b32.xlu1 %v5122_v37, %s6022_s21 }
 0x71a   : > { %4343 = vst [vmem:[%s9049_s15 + $0xa0] sm:$0xff] %v4311_v54 }
 0x71b   : > { %5173 = vrot.lane.b32.xlu2 %v5172_v57, %s6024_s27  ;;  %4344 = vst [vmem:[%s9049_s15 + $0xa8] sm:$0xff] %v4312_v50  ;;  %v10460_v57 = vld [vmem:[#allocation115_spill] sm:$0xff] }
 0x71c   : > { %v3660_v30 = vpop.xlane.xlu1 %3659  ;;  %v2542_v35 = vadd.f32 %v10461_v27, %v10460_v57  ;;  %v10469_v57 = vld [vmem:[#allocation58_spill] sm:$0xff] }
 0x71d   : > { %5584 = vrcp.f32 %v3660_v30 }
 0x721   : > { %5138 = vrot.lane.b32.xlu1 %v5137_v34, %s6022_s21  ;;  %v10462_v34 = vld [vmem:[#allocation40_spill] sm:$0xff] }
 0x722   : > { %v5197_v39 = vpack.i.bf16 %v2542_v35, %v10462_v34 }
 0x723   : > { %v5585_v18 = vpop.eup %5584  ;;  %5188 = vrot.lane.b32.xlu2 %v5187_v55, %s6024_s27 }
 0x724   : > { %v9318_v38 = vmul.f32 %v5585_v18, %v9148_v1  ;;  %v9321_v20 = vmul.f32 %v5585_v18, %v9153_v14  ;;  %v4897_v1 = vld [vmem:[#allocation14 + $0x38] sm:$0xff]  ;;  %v5202_v14 = vpack.i.bf16 %v3226_v36, %v3224_v13  ;;  %v10463_v18 = vld [vmem:[#allocation117_spill] sm:$0xff] }
 0x725   : > { %4226 = vmatpush.bf16.xpose.msra.mxu1 %v4897_v1 }
 0x726   : > { %v3648_v10 = vpop.xlane.xlu2 %3647  ;;  %v3742_v22 = vadd.f32 %v9318_v38, %v10449_v60  ;;  %v3743_v8 = vadd.f32 %v9321_v20, %v10450_v47 }
 0x727   : > { %5586 = vrcp.f32 %v3648_v10 }
 0x728   : > { %v4315_v51 = vmul.f32 0.25, %v3742_v22  ;;  %v4316_v40 = vmul.f32 0.25, %v3743_v8  ;;  %v4894_v22 = vld [vmem:[#allocation14 + $0x20] sm:$0xff] }
 0x729   : > { %5153 = vrot.lane.b32.xlu1 %v5152_v16, %s6022_s21 }
 0x72a   : > { %4347 = vst [vmem:[%s9049_s15 + $0xc0] sm:$0xff] %v4315_v51 }
 0x72b   : > { %5203 = vrot.lane.b32.xlu2 %v5202_v14, %s6024_s27  ;;  %4348 = vst [vmem:[%s9049_s15 + $0xc8] sm:$0xff] %v4316_v40 }
 0x72d   : > { %v5587_v41 = vpop.eup %5586 }
 0x72e   : > { %v3702_v3 = vmul.f32 %v5587_v41, %v9157_v31  ;;  %v3703_v11 = vmul.f32 %v5587_v41, %v9159_v15  ;;  %v4896_v31 = vld [vmem:[#allocation14 + $0x30] sm:$0xff]  ;;  %v2537_v15 = vadd.f32 %v10458_v24, %v10457_v29  ;;  %v10466_v41 = vld [vmem:[#allocation119_spill] sm:$0xff]  ;;  %v4891_v29 = vld [vmem:[#allocation14 + $0x8] sm:$0xff] }
 0x72f   : > { %4227 = vmatpush.bf16.xpose.msra.mxu1 %v4896_v31 }
 0x730   : > { %v3734_v46 = vadd.f32 %v3702_v3, %v10455_v63  ;;  %v3758_v21 = vpack.c.bf16 %v9270_v6, %v3702_v3  ;;  %v3735_v52 = vadd.f32 %v3703_v11, %v10456_v33  ;;  %v3759_v19 = vpack.c.bf16 %v9273_v25, %v3703_v11  ;;  %v10459_v6 = vld [vmem:[#allocation171_spill] sm:$0xff]  ;;  %v4895_v25 = vld [vmem:[#allocation14 + $0x28] sm:$0xff] }
 0x731   : > { %5168 = vrot.lane.b32.xlu1 %v5167_v9, %s6022_s21  ;;  %v5182_v50 = vpack.i.bf16 %v2537_v15, %v10459_v6 }
 0x732   : > { %3842 = vmatmul.bf16.gmra.mxu3 %v3758_v21  ;;  %v4307_v59 = vmul.f32 0.25, %v3734_v46  ;;  %3891 = vmatmul.bf16.gmra.mxu0 %v3759_v19  ;;  %v4308_v28 = vmul.f32 0.25, %v3735_v52  ;;  %v4892_v21 = vld [vmem:[#allocation14 + $0x10] sm:$0xff]  ;;  %v10467_v19 = vld [vmem:[#allocation120_spill] sm:$0xff] }
 0x734   : > { %4339 = vst [vmem:[%s9049_s15 + $0x80] sm:$0xff] %v4307_v59 }
 0x735   : > { %4340 = vst [vmem:[%s9049_s15 + $0x88] sm:$0xff] %v4308_v28  ;;  %v3877_v37 = vpop.f32.mrf.mxu0  ;;  %v10468_v28 = vld [vmem:[#allocation80_spill] sm:$0xff] }
 0x736   : > { %v3657_v54 = vpop.xlane.xlu2 %3656 }
 0x737   : > { %5588 = vrcp.f32 %v3657_v54  ;;  %4228 = vmatpush.bf16.xpose.msra.mxu1 %v4895_v25 }
 0x739   : > { %5183 = vrot.lane.b32.xlu1 %v5182_v50, %s6022_s21 }
 0x73b   : > { %v3828_v0 = vpop.f32.mrf.mxu3 }
 0x73c   : > { %v3878_v47 = vadd.f32 %v3877_v37, %v3828_v0  ;;  %v4890_v37 = vld [vmem:[#allocation14] sm:$0xff]  ;;  %v10470_v0 = vld [vmem:[#allocation50_spill] sm:$0xff] }
 0x73d   : > { %v5589_v30 = vpop.eup %5588  ;;  %v3879_v55 = vpop.f32.mrf.mxu0 }
 0x73e   : > { %v3708_v61 = vmul.f32 %v5589_v30, %v9181_v42  ;;  %v3709_v17 = vmul.f32 %v5589_v30, %v9183_v62 }
 0x73f   : > { %4229 = vmatpush.bf16.xpose.msra.mxu1 %v4894_v22 }
 0x740   : > { %v3740_v49 = vadd.f32 %v3708_v61, %v10463_v18  ;;  %v3760_v45 = vpack.c.bf16 %v3708_v61, %v9289_v43  ;;  %v3741_v36 = vadd.f32 %v3709_v17, %v10464_v53  ;;  %v3761_v10 = vpack.c.bf16 %v3709_v17, %v9292_v7  ;;  %v4893_v7 = vld [vmem:[#allocation14 + $0x18] sm:$0xff] }
 0x741   : > { %5198 = vrot.lane.b32.xlu1 %v5197_v39, %s6022_s21 }
 0x742   : > { %3847 = vmatmul.bf16.gmra.mxu3 %v3760_v45  ;;  %v4313_v60 = vmul.f32 0.25, %v3740_v49  ;;  %3896 = vmatmul.bf16.gmra.mxu0 %v3761_v10  ;;  %v4314_v42 = vmul.f32 0.25, %v3741_v36  ;;  %v10471_v36 = vld [vmem:[#allocation125_spill] sm:$0xff]  ;;  %v10472_v10 = vld [vmem:[#allocation60_spill] sm:$0xff] }
 0x743   : > { %v3830_v62 = vpop.f32.mrf.mxu3 }
 0x744   : > { %4345 = vst [vmem:[%s9049_s15 + $0xb0] sm:$0xff] %v4313_v60  ;;  %v3880_v8 = vadd.f32 %v3879_v55, %v3830_v62  ;;  %v1783_v60 = vadd.f32 %v10472_v10, %v10471_v36  ;;  %v10474_v62 = vld [vmem:[#allocation41_spill] sm:$0xff] }
 0x745   : > { %4346 = vst [vmem:[%s9049_s15 + $0xb8] sm:$0xff] %v4314_v42  ;;  %v3882_v43 = vpop.f32.mrf.mxu0 }
 0x746   : > { %v5117_v56 = vpack.i.bf16 %v3880_v8, %v3878_v47  ;;  %v3663_v16 = vpop.xlane.xlu0 %3662 }
 0x747   : > { %5590 = vrcp.f32 %v3663_v16  ;;  %4230 = vmatpush.bf16.xpose.msra.mxu1 %v4893_v7 }
 0x748   : > { %5118 = vrot.lane.b32.xlu0 %v5117_v56, %s6023_s12 }
 0x74b   : > { %v3833_v13 = vpop.f32.mrf.mxu3 }
 0x74d   : > { %v5591_v1 = vpop.eup %5590  ;;  %v3884_v63 = vpop.f32.mrf.mxu0 }
 0x74e   : > { %v3666_v51 = vpop.xlane.xlu2 %3665  ;;  %v3712_v40 = vmul.f32 %v5591_v1, %v9201_v44  ;;  %v3713_v14 = vmul.f32 %v5591_v1, %v9203_v58  ;;  %v3883_v44 = vadd.f32 %v3882_v43, %v3833_v13 }
 0x74f   : > { %5592 = vrcp.f32 %v3666_v51  ;;  %4231 = vmatpush.bf16.xpose.msra.mxu1 %v4892_v21 }
 0x750   : > { %v3744_v12 = vadd.f32 %v3712_v40, %v10465_v5  ;;  %v3762_v23 = vpack.c.bf16 %v3712_v40, %v9318_v38  ;;  %v3745_v3 = vadd.f32 %v3713_v14, %v10466_v41  ;;  %v3763_v11 = vpack.c.bf16 %v3713_v14, %v9321_v20 }
 0x752   : > { %3852 = vmatmul.bf16.gmra.mxu3 %v3762_v23  ;;  %v4317_v48 = vmul.f32 0.25, %v3744_v12  ;;  %3901 = vmatmul.bf16.gmra.mxu0 %v3763_v11  ;;  %v4318_v9 = vmul.f32 0.25, %v3745_v3  ;;  %v10476_v11 = vld [vmem:[#allocation131_spill] sm:$0xff] }
 0x753   : > { %v3835_v46 = vpop.f32.mrf.mxu3 }
 0x754   : > { %4349 = vst [vmem:[%s9049_s15 + $0xd0] sm:$0xff] %v4317_v48  ;;  %v3885_v58 = vadd.f32 %v3884_v63, %v3835_v46  ;;  %v10477_v48 = vld [vmem:[#allocation127_spill] sm:$0xff] }
 0x755   : > { %v5593_v33 = vpop.eup %5592  ;;  %4350 = vst [vmem:[%s9049_s15 + $0xd8] sm:$0xff] %v4318_v9  ;;  %v1788_v9 = vadd.f32 %v10477_v48, %v10476_v11  ;;  %v10489_v11 = vld [vmem:[#allocation42_spill] sm:$0xff] }
 0x756   : > { %v5132_v38 = vpack.i.bf16 %v3885_v58, %v3883_v44  ;;  %v3714_v52 = vmul.f32 %v5593_v33, %v9209_v2  ;;  %v3715_v20 = vmul.f32 %v5593_v33, %v9211_v32  ;;  %v5099_v42 = vpop.permute.xlu2 %5098  ;;  %v10479_v44 = vld [vmem:[#allocation126_spill] sm:$0xff] }
 0x757   : > { %4232 = vmatpush.bf16.xpose.msra.mxu1 %v4891_v29  ;;  %v5101_v8 = vunpack.i.h.bf16 %v5099_v42  ;;  %v5100_v56 = vunpack.i.l.bf16 %v5099_v42 }
 0x758   : > { %5133 = vrot.lane.b32.xlu0 %v5132_v38, %s6023_s12  ;;  %v3746_v59 = vadd.f32 %v3714_v52, %v10467_v19  ;;  %v3747_v31 = vadd.f32 %v3715_v20, %v10468_v28 }
 0x75a   : > { %v4319_v24 = vmul.f32 0.25, %v3746_v59  ;;  %v4320_v15 = vmul.f32 0.25, %v3747_v31 }
 0x75c   : > { %4351 = vst [vmem:[%s9049_s15 + $0xe0] sm:$0xff] %v4319_v24 }
 0x75d   : > { %4352 = vst [vmem:[%s9049_s15 + $0xe8] sm:$0xff] %v4320_v15 }
 0x75e   : > { %v5114_v63 = vpop.permute.xlu2 %5113 }
 0x75f   : > { %4233 = vmatpush.bf16.xpose.msra.mxu1 %v4890_v37  ;;  %v5116_v33 = vunpack.i.h.bf16 %v5114_v63  ;;  %v5115_v38 = vunpack.i.l.bf16 %v5114_v63 }
 0x765   : > { %v3669_v54 = vpop.xlane.xlu1 %3668  ;;  %v3887_v6 = vpop.f32.mrf.mxu0 }
 0x766   : > { %5594 = vrcp.f32 %v3669_v54 }
 0x76a   : > { %v3838_v2 = vpop.f32.mrf.mxu3 }
 0x76b   : > { %v3888_v18 = vadd.f32 %v3887_v6, %v3838_v2 }
 0x76c   : > { %v5595_v32 = vpop.eup %5594 }
 0x76d   : > { %v3716_v50 = vmul.f32 %v5595_v32, %v9244_v26  ;;  %v3717_v25 = vmul.f32 %v5595_v32, %v9246_v4  ;;  %v3889_v34 = vpop.f32.mrf.mxu0  ;;  %v5094_v26 = vpop.permute.xlu0 %5093 }
 0x76e   : > { %v5096_v4 = vunpack.i.h.bf16 %v5094_v26  ;;  %v5095_v53 = vunpack.i.l.bf16 %v5094_v26 }
 0x76f   : > { %v3748_v27 = vadd.f32 %v3716_v50, %v10469_v57  ;;  %v3764_v35 = vpack.c.bf16 %v3716_v50, %v3714_v52  ;;  %v3749_v30 = vadd.f32 %v3717_v25, %v10470_v0  ;;  %v3765_v61 = vpack.c.bf16 %v3717_v25, %v3715_v20 }
 0x770   : > { %v4105_v22 = vsel %vm10473_vm7, %v1783_v60, %v5096_v4  ;;  %v4104_v47 = vsel %vm10475_vm4, %v10474_v62, %v5095_v53  ;;  %vm10508_vm7 = vmmov %vm10490_vm0 }
 0x771   : > { %3857 = vmatmul.bf16.gmra.mxu3 %v3764_v35  ;;  %v4321_v17 = vmul.f32 0.25, %v3748_v27  ;;  %3906 = vmatmul.bf16.gmra.mxu0 %v3765_v61  ;;  %v4322_v39 = vmul.f32 0.25, %v3749_v30  ;;  %v4121_v13 = vsel %vm4120_vm5, %v4104_v47, %v5100_v56  ;;  %v4122_v1 = vsel %vm4120_vm5, %v4105_v22, %v5101_v8  ;;  %v10481_v27 = vld [vmem:[#allocation49_spill] sm:$0xff]  ;;  %v5129_v30 = vpop.permute.xlu2 %5128  ;;  %vm10511_vm4 = vmmov %vm10490_vm0 }
 0x772   : > { %v3840_v55 = vpop.f32.mrf.mxu3  ;;  %v10482_v35 = vld [vmem:[#allocation133_spill] sm:$0xff] }
 0x773   : > { %4353 = vst [vmem:[%s9049_s15 + $0xf0] sm:$0xff] %v4321_v17  ;;  %v3890_v49 = vadd.f32 %v3889_v34, %v3840_v55  ;;  %v1793_v0 = vadd.f32 %v10482_v35, %v10481_v27  ;;  %v10484_v17 = vld [vmem:[#allocation132_spill] sm:$0xff]  ;;  %v5131_v55 = vunpack.i.h.bf16 %v5129_v30 }
 0x774   : > { %4354 = vst [vmem:[%s9049_s15 + $0xf8] sm:$0xff] %v4322_v39 }
 0x775   : > { %v5147_v45 = vpack.i.bf16 %v3890_v49, %v3888_v18  ;;  %v5109_v12 = vpop.permute.xlu0 %5108  ;;  %v5130_v18 = vunpack.i.l.bf16 %v5129_v30 }
 0x776   : > { %v5111_v23 = vunpack.i.h.bf16 %v5109_v12  ;;  %v5110_v41 = vunpack.i.l.bf16 %v5109_v12  ;;  %v10487_v12 = vld [vmem:[#allocation43_spill] sm:$0xff] }
 0x777   : > { %5148 = vrot.lane.b32.xlu0 %v5147_v45, %s6023_s12 }
 0x778   : > { %v4107_v21 = vsel %vm10478_vm10, %v1788_v9, %v5111_v23  ;;  %v4106_v58 = vsel %vm10480_vm11, %v10479_v44, %v5110_v41 }
 0x779   : > { %v4123_v59 = vsel %vm4120_vm5, %v4106_v58, %v5115_v38  ;;  %v4124_v28 = vsel %vm4120_vm5, %v4107_v21, %v5116_v33  ;;  %v5144_v41 = vpop.permute.xlu2 %5143 }
 0x77a   : > { %v5146_v9 = vunpack.i.h.bf16 %v5144_v41  ;;  %v5145_v63 = vunpack.i.l.bf16 %v5144_v41 }
 0x781   : > { %v5159_v27 = vpop.permute.xlu2 %5158 }
 0x783   : > { %v5104_v16 = vpop.permute.xlu1 %5103 }
 0x784   : > { %v5106_v43 = vunpack.i.h.bf16 %v5104_v16  ;;  %v5105_v7 = vunpack.i.l.bf16 %v5104_v16 }
 0x786   : > { %v4138_v51 = vsel %vm4137_vm6, %v4121_v13, %v5105_v7  ;;  %v4139_v40 = vsel %vm4137_vm6, %v4122_v1, %v5106_v43 }
 0x787   : > { %v4154_v14 = vpack.c.bf16 %v4139_v40, %v4138_v51 }
 0x789   : > { %4234 = vmatmul.bf16.vlgmr.msra.gmra.mxu1 %v4154_v14 }
 0x78b   : > { %v5124_v32 = vpop.permute.xlu1 %5123 }
 0x78c   : > { %v5126_v50 = vunpack.i.h.bf16 %v5124_v32  ;;  %v5125_v25 = vunpack.i.l.bf16 %v5124_v32 }
 0x78e   : > { %v4109_v61 = vsel %vm10483_vm12, %v1793_v0, %v5126_v50  ;;  %v4108_v34 = vsel %vm10485_vm14, %v10484_v17, %v5125_v25  ;;  %v10491_v50 = vld [vmem:[#allocation142_spill] sm:$0xff]  ;;  %v10492_v25 = vld [vmem:[#allocation141_spill] sm:$0xff]  ;;  %v5160_v17 = vunpack.i.l.bf16 %v5159_v27 }
 0x78f   : > { %v4125_v4 = vsel %vm4120_vm5, %v4108_v34, %v5130_v18  ;;  %v4126_v53 = vsel %vm4120_vm5, %v4109_v61, %v5131_v55  ;;  %v10494_v0 = vld [vmem:[#allocation138_spill] sm:$0xff]  ;;  %v5161_v61 = vunpack.i.h.bf16 %v5159_v27 }
 0x793   : > { %v5139_v51 = vpop.permute.xlu1 %5138 }
 0x794   : > { %v5141_v40 = vunpack.i.h.bf16 %v5139_v51  ;;  %v5140_v14 = vunpack.i.l.bf16 %v5139_v51 }
 0x796   : > { %v4110_v48 = vsel %vm10490_vm0, %v10489_v11, %v5140_v14 }
 0x797   : > { %v4127_v58 = vsel %vm4120_vm5, %v4110_v48, %v5145_v63  ;;  %v10501_v63 = vld [vmem:[#allocation152_spill] sm:$0xff] }
 0x7af   : > { %v3892_v5 = vpop.f32.mrf.mxu0 }
 0x7b5   : > { %v3843_v3 = vpop.f32.mrf.mxu3 }
 0x7b6   : > { %v3893_v15 = vadd.f32 %v3892_v5, %v3843_v3  ;;  %v10486_v5 = vld [vmem:[#allocation137_spill] sm:$0xff] }
 0x7b7   : > { %v3894_v46 = vpop.f32.mrf.mxu0  ;;  %v1798_v23 = vadd.f32 %v10487_v12, %v10486_v5 }
 0x7b9   : > { %v4111_v3 = vsel %vm10488_vm13, %v1798_v23, %v5141_v40 }
 0x7ba   : > { %v5119_v52 = vpop.permute.xlu0 %5118  ;;  %v4128_v33 = vsel %vm4120_vm5, %v4111_v3, %v5146_v9 }
 0x7bb   : > { %v5121_v20 = vunpack.i.h.bf16 %v5119_v52  ;;  %v5120_v19 = vunpack.i.l.bf16 %v5119_v52 }
 0x7bd   : > { %v3845_v31 = vpop.f32.mrf.mxu3  ;;  %v4140_v29 = vsel %vm4137_vm6, %v4123_v59, %v5120_v19  ;;  %v4141_v24 = vsel %vm4137_vm6, %v4124_v28, %v5121_v20 }
 0x7be   : > { %v3895_v37 = vadd.f32 %v3894_v46, %v3845_v31  ;;  %v4155_v54 = vpack.c.bf16 %v4141_v24, %v4140_v29 }
 0x7bf   : > { %v3897_v6 = vpop.f32.mrf.mxu0 }
 0x7c0   : > { %v5162_v2 = vpack.i.bf16 %v3895_v37, %v3893_v15  ;;  %4239 = vmatmul.bf16.gmra.mxu1 %v4155_v54 }
 0x7c2   : > { %5163 = vrot.lane.b32.xlu0 %v5162_v2, %s6023_s12 }
 0x7c5   : > { %v3848_v57 = vpop.f32.mrf.mxu3 }
 0x7c6   : > { %v3898_v42 = vadd.f32 %v3897_v6, %v3848_v57  ;;  %v5154_v6 = vpop.permute.xlu1 %5153  ;;  %v1803_v57 = vadd.f32 %v10492_v25, %v10491_v50  ;;  %v10506_v25 = vld [vmem:[#allocation159_spill] sm:$0xff] }
 0x7c7   : > { %v3899_v39 = vpop.f32.mrf.mxu0  ;;  %v5156_v2 = vunpack.i.h.bf16 %v5154_v6  ;;  %v5155_v32 = vunpack.i.l.bf16 %v5154_v6 }
 0x7c9   : > { %v4113_v35 = vsel %vm10493_vm15, %v1803_v57, %v5156_v2  ;;  %v4112_v30 = vsel %vm10495_vm8, %v10494_v0, %v5155_v32  ;;  %v10507_v57 = vld [vmem:[#allocation154_spill] sm:$0xff] }
 0x7ca   : > { %v5134_v49 = vpop.permute.xlu0 %5133  ;;  %v4129_v18 = vsel %vm4120_vm5, %v4112_v30, %v5160_v17  ;;  %v1818_v27 = vadd.f32 %v10507_v57, %v10506_v25  ;;  %v10510_v30 = vld [vmem:[#allocation153_spill] sm:$0xff] }
 0x7cb   : > { %v5136_v45 = vunpack.i.h.bf16 %v5134_v49  ;;  %v5135_v26 = vunpack.i.l.bf16 %v5134_v49  ;;  %v4130_v49 = vsel %vm4120_vm5, %v4113_v35, %v5161_v61 }
 0x7cd   : > { %v3850_v36 = vpop.f32.mrf.mxu3  ;;  %v4142_v10 = vsel %vm4137_vm6, %v4125_v4, %v5135_v26  ;;  %v4143_v60 = vsel %vm4137_vm6, %v4126_v53, %v5136_v45 }
 0x7ce   : > { %v3900_v22 = vadd.f32 %v3899_v39, %v3850_v36  ;;  %v4156_v62 = vpack.c.bf16 %v4143_v60, %v4142_v10  ;;  %v5169_v53 = vpop.permute.xlu1 %5168 }
 0x7cf   : > { %v3902_v8 = vpop.f32.mrf.mxu0  ;;  %v5171_v10 = vunpack.i.h.bf16 %v5169_v53  ;;  %v5170_v60 = vunpack.i.l.bf16 %v5169_v53 }
 0x7d0   : > { %v5177_v47 = vpack.i.bf16 %v3900_v22, %v3898_v42  ;;  %4244 = vmatmul.bf16.gmra.mxu1 %v4156_v62  ;;  %v10496_v42 = vld [vmem:[#allocation44_spill] sm:$0xff] }
 0x7d1   : > { %v10497_v22 = vld [vmem:[#allocation148_spill] sm:$0xff] }
 0x7d2   : > { %5178 = vrot.lane.b32.xlu0 %v5177_v47, %s6023_s12  ;;  %v1808_v62 = vadd.f32 %v10497_v22, %v10496_v42  ;;  %v5174_v47 = vpop.permute.xlu2 %5173 }
 0x7d5   : > { %v3853_v56 = vpop.f32.mrf.mxu3 }
 0x7d6   : > { %v3903_v7 = vadd.f32 %v3902_v8, %v3853_v56  ;;  %v4115_v8 = vsel %vm10498_vm1, %v1808_v62, %v5171_v10  ;;  %v10499_v56 = vld [vmem:[#allocation143_spill] sm:$0xff]  ;;  %v5184_v3 = vpop.permute.xlu1 %5183 }
 0x7d7   : > { %v3904_v16 = vpop.f32.mrf.mxu0  ;;  %v5186_v48 = vunpack.i.h.bf16 %v5184_v3  ;;  %v5185_v9 = vunpack.i.l.bf16 %v5184_v3 }
 0x7dd   : > { %v3855_v43 = vpop.f32.mrf.mxu3 }
 0x7de   : > { %v3905_v13 = vadd.f32 %v3904_v16, %v3855_v43  ;;  %v4114_v16 = vsel %vm10500_vm9, %v10499_v56, %v5170_v60  ;;  %v5176_v43 = vunpack.i.h.bf16 %v5174_v47  ;;  %v5199_v6 = vpop.permute.xlu1 %5198 }
 0x7df   : > { %v5201_v32 = vunpack.i.h.bf16 %v5199_v6  ;;  %v5200_v50 = vunpack.i.l.bf16 %v5199_v6 }
 0x7e0   : > { %v5192_v1 = vpack.i.bf16 %v3905_v13, %v3903_v7  ;;  %v5175_v7 = vunpack.i.l.bf16 %v5174_v47  ;;  %v4132_v5 = vsel %vm4120_vm5, %v4115_v8, %v5176_v43 }
 0x7e1   : > { %v4119_v0 = vsel %vm10508_vm7, %v1818_v27, %v5201_v32  ;;  %v4118_v61 = vsel %vm10511_vm4, %v10510_v30, %v5200_v50 }
 0x7e2   : > { %5193 = vrot.lane.b32.xlu0 %v5192_v1, %s6023_s12  ;;  %v4131_v14 = vsel %vm4120_vm5, %v4114_v16, %v5175_v7 }
 0x7e9   : > { %v5149_v46 = vpop.permute.xlu0 %5148 }
 0x7ea   : > { %v5151_v21 = vunpack.i.h.bf16 %v5149_v46  ;;  %v5150_v44 = vunpack.i.l.bf16 %v5149_v46  ;;  %v10502_v46 = vld [vmem:[#allocation150_spill] sm:$0xff] }
 0x7ec   : > { %v4144_v38 = vsel %vm4137_vm6, %v4127_v58, %v5150_v44  ;;  %v4145_v52 = vsel %vm4137_vm6, %v4128_v33, %v5151_v21  ;;  %v1813_v21 = vadd.f32 %v10502_v46, %v10501_v63  ;;  %v5189_v44 = vpop.permute.xlu2 %5188  ;;  %v10504_v33 = vld [vmem:[#allocation149_spill] sm:$0xff] }
 0x7ed   : > { %v4157_v20 = vpack.c.bf16 %v4145_v52, %v4144_v38  ;;  %v4116_v38 = vsel %vm10505_vm3, %v10504_v33, %v5185_v9  ;;  %v5191_v52 = vunpack.i.h.bf16 %v5189_v44 }
 0x7ee   : > { %v3907_v19 = vpop.f32.mrf.mxu0  ;;  %v4117_v58 = vsel %vm10503_vm2, %v1813_v21, %v5186_v48 }
 0x7ef   : > { %4249 = vmatmul.bf16.gmra.mxu1 %v4157_v20  ;;  %v5190_v20 = vunpack.i.l.bf16 %v5189_v44 }
 0x7f4   : > { %v3858_v59 = vpop.f32.mrf.mxu3  ;;  %v5204_v35 = vpop.permute.xlu2 %5203 }
 0x7f5   : > { %v3908_v29 = vadd.f32 %v3907_v19, %v3858_v59  ;;  %v5206_v17 = vunpack.i.h.bf16 %v5204_v35 }
 0x7f6   : > { %v3909_v28 = vpop.f32.mrf.mxu0 }
 0x7fc   : > { %v3860_v31 = vpop.f32.mrf.mxu3 }
 0x7fd   : > { %v3910_v24 = vadd.f32 %v3909_v28, %v3860_v31 }
 0x7ff   : > { %v5207_v15 = vpack.i.bf16 %v3910_v24, %v3908_v29  ;;  %v4133_v29 = vsel %vm4120_vm5, %v4116_v38, %v5190_v20  ;;  %v4134_v24 = vsel %vm4120_vm5, %v4117_v58, %v5191_v52 }
 0x801   : > { %5208 = vrot.lane.b32.xlu0 %v5207_v15, %s6023_s12  ;;  %s5856_s12 = scalar_lea.hbm %s10514_s5, 1024 }
 0x802   : > { %p5858_p2 = scmp.lt.s32.totalorder %s5856_s12, %s5852_s7 }
 0x804   : > { %p5859_p6 = por %p5858_p2, %p5857_p9 }
 0x806   : > { %v4235_v37 = vpop.f32.mrf.mxu1  ;;  %p5860_p10 = pnand %p5859_p6, %p5855_p5 }
 0x807   : > { %4275 = vst [vmem:[%s9427_s9] sm:$0xff] %v4235_v37 }
 0x80e   : > { %v4237_v54 = vpop.f32.mrf.mxu1 }
 0x80f   : > { %4276 = vst [vmem:[%s9427_s9 + $0x8] sm:$0xff] %v4237_v54 }
 0x834   : > { %v5164_v34 = vpop.permute.xlu0 %5163 }
 0x835   : > { %v5166_v39 = vunpack.i.h.bf16 %v5164_v34  ;;  %v5165_v55 = vunpack.i.l.bf16 %v5164_v34  ;;  %v5205_v34 = vunpack.i.l.bf16 %v5204_v35 }
 0x837   : > { %v4146_v45 = vsel %vm4137_vm6, %v4129_v18, %v5165_v55  ;;  %v4147_v26 = vsel %vm4137_vm6, %v4130_v49, %v5166_v39 }
 0x838   : > { %v4158_v4 = vpack.c.bf16 %v4147_v26, %v4146_v45  ;;  %v4135_v45 = vsel %vm4120_vm5, %v4118_v61, %v5205_v34  ;;  %v4136_v26 = vsel %vm4120_vm5, %v4119_v0, %v5206_v17 }
 0x83a   : > { %4254 = vmatmul.bf16.gmra.mxu1 %v4158_v4 }
 0x83d   : > { %v4240_v36 = vpop.f32.mrf.mxu1 }
 0x83e   : > { %4277 = vst [vmem:[%s9427_s9 + $0x10] sm:$0xff] %v4240_v36 }
 0x844   : > { %v5179_v13 = vpop.permute.xlu0 %5178 }
 0x845   : > { %v5181_v1 = vunpack.i.h.bf16 %v5179_v13  ;;  %v5180_v51 = vunpack.i.l.bf16 %v5179_v13  ;;  %v4242_v40 = vpop.f32.mrf.mxu1 }
 0x846   : > { %4278 = vst [vmem:[%s9427_s9 + $0x18] sm:$0xff] %v4242_v40 }
 0x847   : > { %v4148_v12 = vsel %vm4137_vm6, %v4131_v14, %v5180_v51  ;;  %v4149_v23 = vsel %vm4137_vm6, %v4132_v5, %v5181_v1 }
 0x848   : > { %v4159_v41 = vpack.c.bf16 %v4149_v23, %v4148_v12 }
 0x84a   : > { %4259 = vmatmul.bf16.gmra.mxu1 %v4159_v41 }
 0x84d   : > { %v4245_v11 = vpop.f32.mrf.mxu1 }
 0x84e   : > { %4279 = vst [vmem:[%s9427_s9 + $0x20] sm:$0xff] %v4245_v11 }
 0x854   : > { %v5194_v19 = vpop.permute.xlu0 %5193 }
 0x855   : > { %v5196_v59 = vunpack.i.h.bf16 %v5194_v19  ;;  %v5195_v28 = vunpack.i.l.bf16 %v5194_v19  ;;  %v4247_v31 = vpop.f32.mrf.mxu1 }
 0x856   : > { %4280 = vst [vmem:[%s9427_s9 + $0x28] sm:$0xff] %v4247_v31 }
 0x857   : > { %v4150_v15 = vsel %vm4137_vm6, %v4133_v29, %v5195_v28  ;;  %v4151_v37 = vsel %vm4137_vm6, %v4134_v24, %v5196_v59 }
 0x858   : > { %v4160_v54 = vpack.c.bf16 %v4151_v37, %v4150_v15 }
 0x85a   : > { %4264 = vmatmul.bf16.gmra.mxu1 %v4160_v54 }
 0x86c   : > { %v4250_v2 = vpop.f32.mrf.mxu1 }
 0x86d   : > { %4281 = vst [vmem:[%s9427_s9 + $0x30] sm:$0xff] %v4250_v2 }
 0x873   : > { %v5209_v39 = vpop.permute.xlu0 %5208 }
 0x874   : > { %v5211_v55 = vunpack.i.h.bf16 %v5209_v39  ;;  %v5210_v18 = vunpack.i.l.bf16 %v5209_v39  ;;  %v4252_v49 = vpop.f32.mrf.mxu1 }
 0x875   : > { %4282 = vst [vmem:[%s9427_s9 + $0x38] sm:$0xff] %v4252_v49 }
 0x876   : > { %v4152_v4 = vsel %vm4137_vm6, %v4135_v45, %v5210_v18  ;;  %v4153_v53 = vsel %vm4137_vm6, %v4136_v26, %v5211_v55 }
 0x877   : > { %v4161_v36 = vpack.c.bf16 %v4153_v53, %v4152_v4 }
 0x879   : > { %4269 = vmatmul.bf16.gmra.mxu1 %v4161_v36 }
 0x87a   : > { %5863 = shalt.err (!%p5860_p10)
}
 0x87b   : > { %s6025_s15 = smov 256   ;;  %s6026_s16 = smov 16  }
 0x87c   : > { %4941 = dma.vmem_to_hbm [thread:$0]  (%p6257_p4), %s4396_s1, 4096, %s4398_s30, %s4361_s4, %s6025_s15, %s6025_s15, %s6026_s16  }
 0x87d   : > { %s4372_s6 = sadd.s32 %s10512_s10, %s4898_s24  ;;  %s10515_s29 = sld [smem:[#allocation179_spill]] }
 0x87e   : > { %s4857_s14 = sshll.u32 %s4372_s6, 3  ;;  %s4375_s1 = sshll.u32 %s9427_s9, 4  ;;  %s4376_s1 = int_to_ptr.vmem [resolvable:$true] %s4375_s1 }
 0x87f   : > { %s4356_s20 = scalar_lea.sflag [#allocation4], %s6314_s25 }
 0x883   : > { %s4374_s30 = scalar_lea.hbm %s10515_s29, %s4857_s14  ;;  %s5884_s24 = scalar_lea.hbm %s10515_s29, 512 }
 0x884   : > { %s4377_s4 = sshll.u32 %s4374_s30, 4  ;;  %s4378_s4 = int_to_ptr.hbm [resolvable:$true] %s4377_s4 }
 0x885   : > { %s5878_s7 = sshra.s32 %s4378_s4, 4  ;;  %s5879_s7 = int_to_ptr.hbm [resolvable:$true] %s5878_s7 }
 0x886   : > { %s5880_s22 = scalar_lea.hbm %s5879_s7, 128  ;;  %p5885_p8 = scmp.lt.s32.totalorder %s5879_s7, %s10515_s29 }
 0x887   : > { %p5881_p0 = scmp.ne.s32.totalorder %s5879_s7, %s5880_s22  ;;  %p5886_p12 = scmp.lt.s32.totalorder %s5884_s24, %s5880_s22 }
 0x889   : > { %p5882_p11 = pnand %p5881_p0, %p6257_p4  ;;  %p5887_p1 = por %p5886_p12, %p5885_p8 }
 0x88b   : > { %p5883_p13 = pneg %p5882_p11 }
 0x88d   : > { %p5888_p3 = pnand %p5887_p1, %p5883_p13 }
 0x8b7   : > { %v4255_v10 = vpop.f32.mrf.mxu1 }
 0x8b8   : > { %4283 = vst [vmem:[%s9427_s9 + $0x40] sm:$0xff] %v4255_v10 }
 0x8bf   : > { %v4257_v60 = vpop.f32.mrf.mxu1 }
 0x8c0   : > { %4284 = vst [vmem:[%s9427_s9 + $0x48] sm:$0xff] %v4257_v60 }
 0x8c7   : > { %v4260_v42 = vpop.f32.mrf.mxu1 }
 0x8c8   : > { %4285 = vst [vmem:[%s9427_s9 + $0x50] sm:$0xff] %v4260_v42 }
 0x8cf   : > { %v4262_v22 = vpop.f32.mrf.mxu1 }
 0x8d0   : > { %4286 = vst [vmem:[%s9427_s9 + $0x58] sm:$0xff] %v4262_v22 }
 0x8d7   : > { %v4265_v62 = vpop.f32.mrf.mxu1 }
 0x8d8   : > { %4287 = vst [vmem:[%s9427_s9 + $0x60] sm:$0xff] %v4265_v62 }
 0x8df   : > { %v4267_v47 = vpop.f32.mrf.mxu1 }
 0x8e0   : > { %4288 = vst [vmem:[%s9427_s9 + $0x68] sm:$0xff] %v4267_v47 }
 0x8f6   : > { %v4270_v8 = vpop.f32.mrf.mxu1 }
 0x8f7   : > { %4289 = vst [vmem:[%s9427_s9 + $0x70] sm:$0xff] %v4270_v8 }
 0x8fe   : > { %v4272_v56 = vpop.f32.mrf.mxu1 }
 0x8ff   : > { %4290 = vst [vmem:[%s9427_s9 + $0x78] sm:$0xff] %v4272_v56 }
 0x900   : > { %5891 = shalt.err (!%p5888_p3)
}
 0x901   : > { %s6027_s25 = smov 128   ;;  %s6028_s9 = smov 8  }
 0x902   : > { %4940 = dma.vmem_to_hbm [thread:$0]  (%p6257_p4), %s4376_s1, 2048, %s4378_s4, %s4356_s20, %s6027_s25, %s6025_s15, %s6028_s9  }
 0x903 PF: > { %s10516_s27 = sld [smem:[#allocation28_spill]]  ;;  %p4986_p5 = scmp.ge.s32.totalorder %s6010_s19, 2 }
 0x905   : > { %p4971_p9 = pnand %p4986_p5, %p6153_p7 }
 0x907   : > { %p4972_p2 = pneg %p4971_p9 }
 0x909   : > { %s4412_s16 = sand.u32 1, %s10516_s27  }
 0x90a   : > { %s4413_s6 = scalar_lea.sflag [#allocation4], %s4412_s16 }
 0x90b   : > { %5961 = dma.done.wait (%p4972_p2), %s4413_s6, 2048  }
 0x90c   : > { %5963 = vsyncadd (%p4972_p2), %s4413_s6, 4294965248  ;;  %s4423_s14 = scalar_lea.sflag [#allocation18], %s4412_s16 }
 0x90d   : > { %5965 = dma.done.wait (%p4972_p2), %s4423_s14, 4096  }
 0x90e   : > { %5967 = vsyncadd (%p4972_p2), %s4423_s14, 4294963200  ;;  %s37_s19 = sadd.s32 1, %s6010_s19   ;;  %s10518_s30 = sld [smem:[#allocation27_spill]] }
 0x90f   : > { %p34_p6 = scmp.ge.s32.totalorder %s37_s19, 6   ;;  %s10519_s0 = sld [smem:[#allocation29_spill]] }
 0x910   : > { %s10520_s14 = sld [smem:[#allocation39_spill]]  ;;  %s10523_s10 = smov %s5978_s11 }
 0x911   : > { %s10521_s28 = sld [smem:[#allocation36_spill]]  ;;  %s10524_s11 = smov %s6271_s2 }
 0x912   : > { %s10522_s23 = sld [smem:[#allocation38_spill]]  ;;  %s10525_s12 = smov %s5986_s13 }
 0x913   : > { %s10527_s15 = smov %s6002_s17  ;;  %s10528_s16 = smov %s6006_s18 }
 0x914   :  { %36 = sbr.rel (!%p34_p6) target bundleno = 27 (0x1b), region = 167 }
 0x915   : > { %s10526_s13 = smov %s10519_s0 }
 0x917   : > { %s10529_s17 = smov %s10521_s28 }
 0x918   : > { %s10530_s18 = smov %s10522_s23 }
 0x919   :  { %4429 = vsyncpa [#allocation3], 1 }
 0x91a   :  { %4431 = vsyncpa [#allocation3 + $0x1], 1 }
 0x91b   :  { %4432 = vsyncpa [#allocation6], 1 }
 0x91c   :  { %4434 = vsyncpa [#allocation6 + $0x1], 1 }
 0x91d   :  { %4435 = vsyncpa [#allocation9], 1 }
 0x91e   :  { %4437 = vsyncpa [#allocation9 + $0x1], 1 }
 0x91f   :  { %4438 = vsyncpa [#allocation12], 1 }
 0x920   :  { %4439 = vsyncpa [#allocation15], 1 }
 0x921   :  { %4440 = vsyncpa [#allocation4], 1 }
 0x922   :  { %4442 = vsyncpa [#allocation4 + $0x1], 1 }
 0x923   :  { %4443 = vsyncpa [#allocation18], 1 }
 0x924   :  { %4445 = vsyncpa [#allocation18 + $0x1], 1 }

</bundles_post_ra>
